<compile_context>
chip_gen: v6e
topology: v6e:2x2x1
jax: 0.10.0
libtpu: 0.0.40
codegen_flags: <defaults>
</compile_context>

<pallas_src>
import numpy as np
import jax
import jax.numpy as jnp
from jax.experimental import pallas as pl
from jax.experimental.pallas import tpu as pltpu

EPS = 1e-5
PAD = 128   # lane padding on each side of the flattened spatial axis (>= max tap shift 68)


# ----------------------------------------------------------------------------
# Fused kernel: conv1 -> bn -> pool -> relu -> conv2 -> ... -> conv3 -> pool+decimate -> out
# ----------------------------------------------------------------------------
def _make_kernel(bsz, h0, w0):
    n0 = bsz * h0 * w0
    log2w = int(np.log2(w0))
    n_pix = (h0 // 8) * (w0 // 8)          # live output pixels per batch after 3 pools

    def tap_mask(h_idx, w_idx, dh, dw, s):
        """0/1 float mask (1, n0): is the (dh, dw) neighbour (on the s-dilated grid)
        an in-bounds pixel for this target position?  None means 'always valid'."""
        conds = []
        if dh < 0:
            conds.append(h_idx >= (-dh) * s)
        if dh > 0:
            conds.append(h_idx < h0 - dh * s)
        if dw < 0:
            conds.append(w_idx >= (-dw) * s)
        if dw > 0:
            conds.append(w_idx < w0 - dw * s)
        if not conds:
            return None
        c = conds[0]
        for extra in conds[1:]:
            c = c & extra
        return jnp.where(c, 1.0, 0.0)

    def kernel(x_ref, w1, w2, w3, g1, be1, g2, be2, g3, be3, s_ref,
               out_ref, a_buf, col_buf):
        rows = a_buf.shape[0]
        # Only the PAD margins must stay zero (frame-edge tap / pool reads land there);
        # the interior is fully rewritten every layer.
        a_buf[:, 0:PAD] = jnp.zeros((rows, PAD), jnp.float32)
        a_buf[:, PAD + n0:PAD + n0 + PAD] = jnp.zeros((rows, PAD), jnp.float32)
        a_buf[0:1, PAD:PAD + n0] = x_ref[...]          # layer-1 activation (1, n0)

        # Per-lane (h, w) coordinates of the flattened frame n = b*H*W + h*W + w.
        n_idx = jax.lax.broadcasted_iota(jnp.int32, (1, n0), 1)
        w_idx = n_idx & (w0 - 1)
        h_idx = (n_idx >> log2w) & (h0 - 1)

        layers = ((w1, g1, be1, 1, 8, 1),
                  (w2, g2, be2, 8, 16, 2),
                  (w3, g3, be3, 16, 32, 4))

        for li, (w_ref, g_ref, b_ref, cin, cout, s) in enumerate(layers):
            # ---- Conv3x3 (stride 1, zero pad 1) on the s-dilated grid ------------
            # im2col: 9 statically shifted, edge-masked slices of the padded activation
            # buffer -> one (cout, 9*cin) @ (9*cin, n0) MXU dot.  cin == 1 uses rank-1.
            acc = None
            for kh in range(3):
                for kw in range(3):
                    t = kh * 3 + kw
                    dh, dw = kh - 1, kw - 1
                    k = (dh * w0 + dw) * s                    # flat lane shift
                    xs = a_buf[0:cin, PAD + k:PAD + k + n0]   # (cin, n0)
                    m = tap_mask(h_idx, w_idx, dh, dw, s)
                    if m is not None:
                        xs = xs * m
                    if cin == 1:
                        prod = w_ref[:, t:t + 1] * xs         # rank-1 update (VPU)
                        acc = prod if acc is None else acc + prod
                    else:
                        col_buf[t * cin:(t + 1) * cin, :] = xs
            if cin > 1:
                acc = jnp.dot(w_ref[...], col_buf[0:9 * cin, :],
                              preferred_element_type=jnp.float32)   # (cout, n0)

            # ---- BatchNorm2d statistics (training-mode batch stats) --------------
            # Non-live lanes of acc are exactly 0 (masked taps + live_out-masked inputs),
            # so plain sums over all lanes already give the live-pixel statistics.
            # (Conv bias omitted: it cancels exactly in the mean subtraction.)
            inv_n = 1.0 / float(n0 // (s * s))
            mean = jnp.sum(acc, axis=1, keepdims=True) * inv_n
            var = jnp.sum(acc * acc, axis=1, keepdims=True) * inv_n - mean * mean
            scale = jax.lax.rsqrt(var + EPS) * g_ref[...]
            shift = b_ref[...]

            if li < 2:
                # ---- AvgPool2d(2): 3 shifted adds on a_buf (reused as staging) ----
                # BN affine is applied to the pooled result (affine commutes with mean).
                a_buf[0:cout, PAD:PAD + n0] = acc
                dpw, dph = s, s * w0
                p = (acc
                     + a_buf[0:cout, PAD + dpw:PAD + dpw + n0]
                     + a_buf[0:cout, PAD + dph:PAD + dph + n0]
                     + a_buf[0:cout, PAD + dph + dpw:PAD + dph + dpw + n0]) * 0.25
                y = jnp.maximum((p - mean) * scale + shift, 0.0)
                so = 2 * s
                live_out = jnp.where(((h_idx & (so - 1)) == 0) &
                                     ((w_idx & (so - 1)) == 0), 1.0, 0.0)
                a_buf[0:cout, PAD:PAD + n0] = y * live_out    # next layer's input
            else:
                # ---- AvgPool2d(2) + stride-8 decimation as ONE selection matmul --
                # s_ref[n, j] = 0.25 at the 4 pooled tap lanes of output column j.
                pooled = jnp.dot(acc, s_ref[...],
                                 preferred_element_type=jnp.float32)  # (32, bsz*n_pix)
                y = jnp.maximum((pooled - mean) * scale + shift, 0.0)
                for b in range(bsz):
                    out_ref[b * cout:(b + 1) * cout, :] = y[:, b * n_pix:(b + 1) * n_pix]

    return kernel


# ----------------------------------------------------------------------------
# Host-side, one-time parameter preparation (kept OUT of the jitted call path)
# ----------------------------------------------------------------------------
def prepare_params(params, bsz, h0, w0):
    (w1, _, g1, b1), (w2, _, g2, b2), (w3, _, g3, b3) = params

    def flat_w(w):
        w = np.asarray(w)
        co, ci, _, _ = w.shape
        # [co, ci, kh, kw] -> [co, (kh*3+kw)*ci + ci_idx]  (matches im2col row order)
        return jnp.asarray(w.transpose(0, 2, 3, 1).reshape(co, 9 * ci))

    def col(v):
        return jnp.asarray(np.asarray(v).reshape(-1, 1))

    # Fused AvgPool2d(2) + stride-8 decimation matrix for layer 3 (dilation s=4):
    # S[n, j] = 0.25 iff flat lane n is one of the 4 avg-pooled taps of output column j.
    s = 4
    hh, ww = h0 // 8, w0 // 8
    n0 = bsz * h0 * w0
    S = np.zeros((n0, bsz * hh * ww), np.float32)
    for b in range(bsz):
        for ho in range(hh):
            for wo in range(ww):
                j = (b * hh + ho) * ww + wo
                base = b * h0 * w0 + (8 * ho) * w0 + 8 * wo
                for dh in (0, 1):
                    for dw in (0, 1):
                        S[base + dh * s * w0 + dw * s, j] = 0.25
    return (flat_w(w1), flat_w(w2), flat_w(w3),
            col(g1), col(b1), col(g2), col(b2), col(g3), col(b3),
            jnp.asarray(S))


# ----------------------------------------------------------------------------
# Forward pass (jitted): pure-reshape glue + single pallas_call
# ----------------------------------------------------------------------------
def _forward(x, prepped):
    bsz, cin0, h0, w0 = x.shape
    assert cin0 == 1
    assert (h0 & (h0 - 1)) == 0 and (w0 & (w0 - 1)) == 0 and h0 >= 8 and w0 >= 8
    n0 = bsz * h0 * w0
    n_pix = (h0 // 8) * (w0 // 8)

    a0 = x.reshape(1, n0)     # cin == 1: NCHW flatten == (1, B*H*W), pure bitcast

    out2d = pl.pallas_call(
        _make_kernel(bsz, h0, w0),
        out_shape=jax.ShapeDtypeStruct((bsz * 32, n_pix), jnp.float32),
        in_specs=[pl.BlockSpec(memory_space=pltpu.MemorySpace.VMEM)] * 11,
        out_specs=pl.BlockSpec(memory_space=pltpu.MemorySpace.VMEM),
        scratch_shapes=[pltpu.VMEM((16, n0 + 2 * PAD), jnp.float32),   # activation / pool staging
                        pltpu.VMEM((9 * 16, n0), jnp.float32)],        # im2col buffer
    )(a0, *prepped)

    return out2d.reshape(bsz, 32, h0 // 8, w0 // 8)     # pure reshape, no data movement


inception_v2_forward = jax.jit(_forward)


# ----------------------------------------------------------------------------
# Parameters and pure-JAX reference (faithful to the PyTorch module)
# ----------------------------------------------------------------------------
def init_params(key):
    """Conv2d(1->8), (8->16), (16->32), k=3, with bias; BN affine params."""
    chans = [(1, 8), (8, 16), (16, 32)]
    params = []
    for li, (cin, cout) in enumerate(chans):
        k0, k1, k2, k3 = jax.random.split(jax.random.fold_in(key, li), 4)
        w = 0.1 * jax.random.normal(k0, (cout, cin, 3, 3), jnp.float32)
        b = 0.1 * jax.random.normal(k1, (cout,), jnp.float32)
        gamma = 1.0 + 0.1 * jax.random.normal(k2, (cout,), jnp.float32)
        beta = 0.1 * jax.random.normal(k3, (cout,), jnp.float32)
        params.append((w, b, gamma, beta))
    return params


def reference_forward(x, params):
    out = x
    for (w, b, gamma, beta) in params:
        y = jax.lax.conv_general_dilated(
            out, w, window_strides=(1, 1), padding=((1, 1), (1, 1)),
            dimension_numbers=("NCHW", "OIHW", "NCHW"))
        y = y + b[None, :, None, None]                 # bias (cancels under train-mode BN)
        mean = y.mean(axis=(0, 2, 3), keepdims=True)
        var = ((y - mean) ** 2).mean(axis=(0, 2, 3), keepdims=True)
        y = (y - mean) * jax.lax.rsqrt(var + EPS)
        y = y * gamma[None, :, None, None] + beta[None, :, None, None]
        bsz, c, h, wdt = y.shape
        y = y.reshape(bsz, c, h // 2, 2, wdt // 2, 2).mean(axis=(3, 5))
        out = jnp.maximum(y, 0.0)
    return out


if __name__ == "__main__":
    key = jax.random.PRNGKey(0)
    kx, kp = jax.random.split(key)
    x = jax.random.normal(kx, (2, 1, 16, 16), jnp.float32)   # [batch, channel, h, w]
    params = init_params(kp)
    prepped = prepare_params(params, 2, 16, 16)              # host-side, once

    out = jax.block_until_ready(inception_v2_forward(x, prepped))
    assert out.shape == (2, 32, 2, 2), out.shape

    ref = jax.block_until_ready(reference_forward(x, params))
    np.testing.assert_allclose(np.asarray(out), np.asarray(ref), rtol=1e-3, atol=1e-4)

    print("KERNEL_OK")
</pallas_src>

<mosaic_0001>
module attributes {stable_mosaic.version = 11 : i64} {
  func.func @kernel(%arg0: memref<1x512xf32, #tpu.memory_space<vmem>>, %arg1: memref<8x9xf32, #tpu.memory_space<vmem>>, %arg2: memref<16x72xf32, #tpu.memory_space<vmem>>, %arg3: memref<32x144xf32, #tpu.memory_space<vmem>>, %arg4: memref<8x1xf32, #tpu.memory_space<vmem>>, %arg5: memref<8x1xf32, #tpu.memory_space<vmem>>, %arg6: memref<16x1xf32, #tpu.memory_space<vmem>>, %arg7: memref<16x1xf32, #tpu.memory_space<vmem>>, %arg8: memref<32x1xf32, #tpu.memory_space<vmem>>, %arg9: memref<32x1xf32, #tpu.memory_space<vmem>>, %arg10: memref<512x8xf32, #tpu.memory_space<vmem>>, %arg11: memref<64x4xf32, #tpu.memory_space<vmem>>, %arg12: memref<16x768xf32, #tpu.memory_space<vmem>>, %arg13: memref<144x512xf32, #tpu.memory_space<vmem>>) attributes {dimension_semantics = [], scalar_prefetch = 0 : i64, scratch_operands = 2 : i64, tpu.core_type = #tpu.core_type<tc>} {
    %cst = arith.constant 0.000000e+00 : f32
    %0 = vector.broadcast %cst : f32 to vector<16x128xf32>
    %c0 = arith.constant 0 : index
    %c0_0 = arith.constant 0 : index
    %1 = vector.load %arg12[%c0, %c0_0] : memref<16x768xf32, #tpu.memory_space<vmem>>, vector<16x128xf32>
    tpu.vector_store %arg12[%c0, %c0_0], %0 {strides = array<i32>} : memref<16x768xf32, #tpu.memory_space<vmem>>, vector<16x128xf32>,
    %cst_1 = arith.constant 0.000000e+00 : f32
    %2 = vector.broadcast %cst_1 : f32 to vector<16x128xf32>
    %c0_2 = arith.constant 0 : index
    %c640 = arith.constant 640 : index
    %3 = vector.load %arg12[%c0_2, %c640] : memref<16x768xf32, #tpu.memory_space<vmem>>, vector<16x128xf32>
    tpu.vector_store %arg12[%c0_2, %c640], %2 {strides = array<i32>} : memref<16x768xf32, #tpu.memory_space<vmem>>, vector<16x128xf32>,
    %c0_3 = arith.constant 0 : index
    %c0_4 = arith.constant 0 : index
    %4 = vector.load %arg0[%c0_3, %c0_4] : memref<1x512xf32, #tpu.memory_space<vmem>>, vector<1x512xf32>
    %c0_5 = arith.constant 0 : index
    %c128 = arith.constant 128 : index
    %5 = vector.load %arg12[%c0_5, %c128] : memref<16x768xf32, #tpu.memory_space<vmem>>, vector<1x512xf32>
    tpu.vector_store %arg12[%c0_5, %c128], %4 {strides = array<i32>} : memref<16x768xf32, #tpu.memory_space<vmem>>, vector<1x512xf32>,
    %6 = tpu.iota {dimensions = array<i32: 1>} : vector<1x512xi32>
    %c15_i32 = arith.constant 15 : i32
    %7 = vector.broadcast %c15_i32 : i32 to vector<1x512xi32>
    %8 = arith.andi %6, %7 : vector<1x512xi32>
    %c4_i32 = arith.constant 4 : i32
    %9 = vector.broadcast %c4_i32 : i32 to vector<1x512xi32>
    %10 = arith.shrsi %6, %9 : vector<1x512xi32>
    %c15_i32_6 = arith.constant 15 : i32
    %11 = vector.broadcast %c15_i32_6 : i32 to vector<1x512xi32>
    %12 = arith.andi %10, %11 : vector<1x512xi32>
    %c0_7 = arith.constant 0 : index
    %c111 = arith.constant 111 : index
    %13 = vector.load %arg12[%c0_7, %c111] : memref<16x768xf32, #tpu.memory_space<vmem>>, vector<1x512xf32>
    %c1_i32 = arith.constant 1 : i32
    %14 = vector.broadcast %c1_i32 : i32 to vector<1x512xi32>
    %15 = arith.cmpi sge, %12, %14 : vector<1x512xi32>
    %c1_i32_8 = arith.constant 1 : i32
    %16 = vector.broadcast %c1_i32_8 : i32 to vector<1x512xi32>
    %17 = arith.cmpi sge, %8, %16 : vector<1x512xi32>
    %18 = arith.andi %15, %17 : vector<1x512xi1>
    %cst_9 = arith.constant 1.000000e+00 : f32
    %cst_10 = arith.constant 0.000000e+00 : f32
    %19 = vector.broadcast %cst_9 : f32 to vector<1x512xf32>
    %20 = vector.broadcast %cst_10 : f32 to vector<1x512xf32>
    %21 = arith.select %18, %19, %20 : vector<1x512xi1>, vector<1x512xf32>
    %22 = arith.mulf %13, %21 : vector<1x512xf32>
    %c0_11 = arith.constant 0 : index
    %c0_12 = arith.constant 0 : index
    %23 = vector.load %arg1[%c0_11, %c0_12] : memref<8x9xf32, #tpu.memory_space<vmem>>, vector<8x1xf32>
    %24 = vector.broadcast %23 : vector<8x1xf32> to vector<8x512xf32>
    %25 = vector.broadcast %22 : vector<1x512xf32> to vector<8x512xf32>
    %26 = arith.mulf %24, %25 : vector<8x512xf32>
    %c0_13 = arith.constant 0 : index
    %c112 = arith.constant 112 : index
    %27 = vector.load %arg12[%c0_13, %c112] : memref<16x768xf32, #tpu.memory_space<vmem>>, vector<1x512xf32>
    %c1_i32_14 = arith.constant 1 : i32
    %28 = vector.broadcast %c1_i32_14 : i32 to vector<1x512xi32>
    %29 = arith.cmpi sge, %12, %28 : vector<1x512xi32>
    %cst_15 = arith.constant 1.000000e+00 : f32
    %cst_16 = arith.constant 0.000000e+00 : f32
    %30 = vector.broadcast %cst_15 : f32 to vector<1x512xf32>
    %31 = vector.broadcast %cst_16 : f32 to vector<1x512xf32>
    %32 = arith.select %29, %30, %31 : vector<1x512xi1>, vector<1x512xf32>
    %33 = arith.mulf %27, %32 : vector<1x512xf32>
    %c0_17 = arith.constant 0 : index
    %c1 = arith.constant 1 : index
    %34 = vector.load %arg1[%c0_17, %c1] : memref<8x9xf32, #tpu.memory_space<vmem>>, vector<8x1xf32>
    %35 = vector.broadcast %34 : vector<8x1xf32> to vector<8x512xf32>
    %36 = vector.broadcast %33 : vector<1x512xf32> to vector<8x512xf32>
    %37 = arith.mulf %35, %36 : vector<8x512xf32>
    %38 = arith.addf %26, %37 : vector<8x512xf32>
    %c0_18 = arith.constant 0 : index
    %c113 = arith.constant 113 : index
    %39 = vector.load %arg12[%c0_18, %c113] : memref<16x768xf32, #tpu.memory_space<vmem>>, vector<1x512xf32>
    %c1_i32_19 = arith.constant 1 : i32
    %40 = vector.broadcast %c1_i32_19 : i32 to vector<1x512xi32>
    %41 = arith.cmpi sge, %12, %40 : vector<1x512xi32>
    %c15_i32_20 = arith.constant 15 : i32
    %42 = vector.broadcast %c15_i32_20 : i32 to vector<1x512xi32>
    %43 = arith.cmpi slt, %8, %42 : vector<1x512xi32>
    %44 = arith.andi %41, %43 : vector<1x512xi1>
    %cst_21 = arith.constant 1.000000e+00 : f32
    %cst_22 = arith.constant 0.000000e+00 : f32
    %45 = vector.broadcast %cst_21 : f32 to vector<1x512xf32>
    %46 = vector.broadcast %cst_22 : f32 to vector<1x512xf32>
    %47 = arith.select %44, %45, %46 : vector<1x512xi1>, vector<1x512xf32>
    %48 = arith.mulf %39, %47 : vector<1x512xf32>
    %c0_23 = arith.constant 0 : index
    %c2 = arith.constant 2 : index
    %49 = vector.load %arg1[%c0_23, %c2] : memref<8x9xf32, #tpu.memory_space<vmem>>, vector<8x1xf32>
    %50 = vector.broadcast %49 : vector<8x1xf32> to vector<8x512xf32>
    %51 = vector.broadcast %48 : vector<1x512xf32> to vector<8x512xf32>
    %52 = arith.mulf %50, %51 : vector<8x512xf32>
    %53 = arith.addf %38, %52 : vector<8x512xf32>
    %c0_24 = arith.constant 0 : index
    %c127 = arith.constant 127 : index
    %54 = vector.load %arg12[%c0_24, %c127] : memref<16x768xf32, #tpu.memory_space<vmem>>, vector<1x512xf32>
    %c1_i32_25 = arith.constant 1 : i32
    %55 = vector.broadcast %c1_i32_25 : i32 to vector<1x512xi32>
    %56 = arith.cmpi sge, %8, %55 : vector<1x512xi32>
    %cst_26 = arith.constant 1.000000e+00 : f32
    %cst_27 = arith.constant 0.000000e+00 : f32
    %57 = vector.broadcast %cst_26 : f32 to vector<1x512xf32>
    %58 = vector.broadcast %cst_27 : f32 to vector<1x512xf32>
    %59 = arith.select %56, %57, %58 : vector<1x512xi1>, vector<1x512xf32>
    %60 = arith.mulf %54, %59 : vector<1x512xf32>
    %c0_28 = arith.constant 0 : index
    %c3 = arith.constant 3 : index
    %61 = vector.load %arg1[%c0_28, %c3] : memref<8x9xf32, #tpu.memory_space<vmem>>, vector<8x1xf32>
    %62 = vector.broadcast %61 : vector<8x1xf32> to vector<8x512xf32>
    %63 = vector.broadcast %60 : vector<1x512xf32> to vector<8x512xf32>
    %64 = arith.mulf %62, %63 : vector<8x512xf32>
    %65 = arith.addf %53, %64 : vector<8x512xf32>
    %c0_29 = arith.constant 0 : index
    %c128_30 = arith.constant 128 : index
    %66 = vector.load %arg12[%c0_29, %c128_30] : memref<16x768xf32, #tpu.memory_space<vmem>>, vector<1x512xf32>
    %c0_31 = arith.constant 0 : index
    %c4 = arith.constant 4 : index
    %67 = vector.load %arg1[%c0_31, %c4] : memref<8x9xf32, #tpu.memory_space<vmem>>, vector<8x1xf32>
    %68 = vector.broadcast %67 : vector<8x1xf32> to vector<8x512xf32>
    %69 = vector.broadcast %66 : vector<1x512xf32> to vector<8x512xf32>
    %70 = arith.mulf %68, %69 : vector<8x512xf32>
    %71 = arith.addf %65, %70 : vector<8x512xf32>
    %c0_32 = arith.constant 0 : index
    %c129 = arith.constant 129 : index
    %72 = vector.load %arg12[%c0_32, %c129] : memref<16x768xf32, #tpu.memory_space<vmem>>, vector<1x512xf32>
    %c15_i32_33 = arith.constant 15 : i32
    %73 = vector.broadcast %c15_i32_33 : i32 to vector<1x512xi32>
    %74 = arith.cmpi slt, %8, %73 : vector<1x512xi32>
    %cst_34 = arith.constant 1.000000e+00 : f32
    %cst_35 = arith.constant 0.000000e+00 : f32
    %75 = vector.broadcast %cst_34 : f32 to vector<1x512xf32>
    %76 = vector.broadcast %cst_35 : f32 to vector<1x512xf32>
    %77 = arith.select %74, %75, %76 : vector<1x512xi1>, vector<1x512xf32>
    %78 = arith.mulf %72, %77 : vector<1x512xf32>
    %c0_36 = arith.constant 0 : index
    %c5 = arith.constant 5 : index
    %79 = vector.load %arg1[%c0_36, %c5] : memref<8x9xf32, #tpu.memory_space<vmem>>, vector<8x1xf32>
    %80 = vector.broadcast %79 : vector<8x1xf32> to vector<8x512xf32>
    %81 = vector.broadcast %78 : vector<1x512xf32> to vector<8x512xf32>
    %82 = arith.mulf %80, %81 : vector<8x512xf32>
    %83 = arith.addf %71, %82 : vector<8x512xf32>
    %c0_37 = arith.constant 0 : index
    %c143 = arith.constant 143 : index
    %84 = vector.load %arg12[%c0_37, %c143] : memref<16x768xf32, #tpu.memory_space<vmem>>, vector<1x512xf32>
    %c15_i32_38 = arith.constant 15 : i32
    %85 = vector.broadcast %c15_i32_38 : i32 to vector<1x512xi32>
    %86 = arith.cmpi slt, %12, %85 : vector<1x512xi32>
    %c1_i32_39 = arith.constant 1 : i32
    %87 = vector.broadcast %c1_i32_39 : i32 to vector<1x512xi32>
    %88 = arith.cmpi sge, %8, %87 : vector<1x512xi32>
    %89 = arith.andi %86, %88 : vector<1x512xi1>
    %cst_40 = arith.constant 1.000000e+00 : f32
    %cst_41 = arith.constant 0.000000e+00 : f32
    %90 = vector.broadcast %cst_40 : f32 to vector<1x512xf32>
    %91 = vector.broadcast %cst_41 : f32 to vector<1x512xf32>
    %92 = arith.select %89, %90, %91 : vector<1x512xi1>, vector<1x512xf32>
    %93 = arith.mulf %84, %92 : vector<1x512xf32>
    %c0_42 = arith.constant 0 : index
    %c6 = arith.constant 6 : index
    %94 = vector.load %arg1[%c0_42, %c6] : memref<8x9xf32, #tpu.memory_space<vmem>>, vector<8x1xf32>
    %95 = vector.broadcast %94 : vector<8x1xf32> to vector<8x512xf32>
    %96 = vector.broadcast %93 : vector<1x512xf32> to vector<8x512xf32>
    %97 = arith.mulf %95, %96 : vector<8x512xf32>
    %98 = arith.addf %83, %97 : vector<8x512xf32>
    %c0_43 = arith.constant 0 : index
    %c144 = arith.constant 144 : index
    %99 = vector.load %arg12[%c0_43, %c144] : memref<16x768xf32, #tpu.memory_space<vmem>>, vector<1x512xf32>
    %c15_i32_44 = arith.constant 15 : i32
    %100 = vector.broadcast %c15_i32_44 : i32 to vector<1x512xi32>
    %101 = arith.cmpi slt, %12, %100 : vector<1x512xi32>
    %cst_45 = arith.constant 1.000000e+00 : f32
    %cst_46 = arith.constant 0.000000e+00 : f32
    %102 = vector.broadcast %cst_45 : f32 to vector<1x512xf32>
    %103 = vector.broadcast %cst_46 : f32 to vector<1x512xf32>
    %104 = arith.select %101, %102, %103 : vector<1x512xi1>, vector<1x512xf32>
    %105 = arith.mulf %99, %104 : vector<1x512xf32>
    %c0_47 = arith.constant 0 : index
    %c7 = arith.constant 7 : index
    %106 = vector.load %arg1[%c0_47, %c7] : memref<8x9xf32, #tpu.memory_space<vmem>>, vector<8x1xf32>
    %107 = vector.broadcast %106 : vector<8x1xf32> to vector<8x512xf32>
    %108 = vector.broadcast %105 : vector<1x512xf32> to vector<8x512xf32>
    %109 = arith.mulf %107, %108 : vector<8x512xf32>
    %110 = arith.addf %98, %109 : vector<8x512xf32>
    %c0_48 = arith.constant 0 : index
    %c145 = arith.constant 145 : index
    %111 = vector.load %arg12[%c0_48, %c145] : memref<16x768xf32, #tpu.memory_space<vmem>>, vector<1x512xf32>
    %c15_i32_49 = arith.constant 15 : i32
    %112 = vector.broadcast %c15_i32_49 : i32 to vector<1x512xi32>
    %113 = arith.cmpi slt, %12, %112 : vector<1x512xi32>
    %c15_i32_50 = arith.constant 15 : i32
    %114 = vector.broadcast %c15_i32_50 : i32 to vector<1x512xi32>
    %115 = arith.cmpi slt, %8, %114 : vector<1x512xi32>
    %116 = arith.andi %113, %115 : vector<1x512xi1>
    %cst_51 = arith.constant 1.000000e+00 : f32
    %cst_52 = arith.constant 0.000000e+00 : f32
    %117 = vector.broadcast %cst_51 : f32 to vector<1x512xf32>
    %118 = vector.broadcast %cst_52 : f32 to vector<1x512xf32>
    %119 = arith.select %116, %117, %118 : vector<1x512xi1>, vector<1x512xf32>
    %120 = arith.mulf %111, %119 : vector<1x512xf32>
    %c0_53 = arith.constant 0 : index
    %c8 = arith.constant 8 : index
    %121 = vector.load %arg1[%c0_53, %c8] : memref<8x9xf32, #tpu.memory_space<vmem>>, vector<8x1xf32>
    %122 = vector.broadcast %121 : vector<8x1xf32> to vector<8x512xf32>
    %123 = vector.broadcast %120 : vector<1x512xf32> to vector<8x512xf32>
    %124 = arith.mulf %122, %123 : vector<8x512xf32>
    %125 = arith.addf %110, %124 : vector<8x512xf32>
    %cst_54 = arith.constant dense<0.000000e+00> : vector<8xf32>
    %126 = vector.multi_reduction <add>, %125, %cst_54 [1] : vector<8x512xf32> to vector<8xf32>
    %127 = vector.shape_cast %126 : vector<8xf32> to vector<8x1xf32>
    %cst_55 = arith.constant 0.001953125 : f32
    %128 = vector.broadcast %cst_55 : f32 to vector<8x1xf32>
    %129 = arith.mulf %127, %128 : vector<8x1xf32>
    %130 = arith.mulf %125, %125 : vector<8x512xf32>
    %cst_56 = arith.constant dense<0.000000e+00> : vector<8xf32>
    %131 = vector.multi_reduction <add>, %130, %cst_56 [1] : vector<8x512xf32> to vector<8xf32>
    %132 = vector.shape_cast %131 : vector<8xf32> to vector<8x1xf32>
    %cst_57 = arith.constant 0.001953125 : f32
    %133 = vector.broadcast %cst_57 : f32 to vector<8x1xf32>
    %134 = arith.mulf %132, %133 : vector<8x1xf32>
    %135 = arith.mulf %129, %129 : vector<8x1xf32>
    %136 = arith.subf %134, %135 : vector<8x1xf32>
    %cst_58 = arith.constant 9.99999974E-6 : f32
    %137 = vector.broadcast %cst_58 : f32 to vector<8x1xf32>
    %138 = arith.addf %136, %137 : vector<8x1xf32>
    %139 = math.rsqrt %138 : vector<8x1xf32>
    %c0_59 = arith.constant 0 : index
    %c0_60 = arith.constant 0 : index
    %140 = vector.load %arg4[%c0_59, %c0_60] : memref<8x1xf32, #tpu.memory_space<vmem>>, vector<8x1xf32>
    %141 = arith.mulf %139, %140 : vector<8x1xf32>
    %c0_61 = arith.constant 0 : index
    %c0_62 = arith.constant 0 : index
    %142 = vector.load %arg5[%c0_61, %c0_62] : memref<8x1xf32, #tpu.memory_space<vmem>>, vector<8x1xf32>
    %c0_63 = arith.constant 0 : index
    %c128_64 = arith.constant 128 : index
    %143 = vector.load %arg12[%c0_63, %c128_64] : memref<16x768xf32, #tpu.memory_space<vmem>>, vector<8x512xf32>
    tpu.vector_store %arg12[%c0_63, %c128_64], %125 {strides = array<i32>} : memref<16x768xf32, #tpu.memory_space<vmem>>, vector<8x512xf32>,
    %c0_65 = arith.constant 0 : index
    %c129_66 = arith.constant 129 : index
    %144 = vector.load %arg12[%c0_65, %c129_66] : memref<16x768xf32, #tpu.memory_space<vmem>>, vector<8x512xf32>
    %145 = arith.addf %125, %144 : vector<8x512xf32>
    %c0_67 = arith.constant 0 : index
    %c144_68 = arith.constant 144 : index
    %146 = vector.load %arg12[%c0_67, %c144_68] : memref<16x768xf32, #tpu.memory_space<vmem>>, vector<8x512xf32>
    %147 = arith.addf %145, %146 : vector<8x512xf32>
    %c0_69 = arith.constant 0 : index
    %c145_70 = arith.constant 145 : index
    %148 = vector.load %arg12[%c0_69, %c145_70] : memref<16x768xf32, #tpu.memory_space<vmem>>, vector<8x512xf32>
    %149 = arith.addf %147, %148 : vector<8x512xf32>
    %cst_71 = arith.constant 2.500000e-01 : f32
    %150 = vector.broadcast %cst_71 : f32 to vector<8x512xf32>
    %151 = arith.mulf %149, %150 : vector<8x512xf32>
    %152 = vector.broadcast %129 : vector<8x1xf32> to vector<8x512xf32>
    %153 = arith.subf %151, %152 : vector<8x512xf32>
    %154 = vector.broadcast %141 : vector<8x1xf32> to vector<8x512xf32>
    %155 = arith.mulf %153, %154 : vector<8x512xf32>
    %156 = vector.broadcast %142 : vector<8x1xf32> to vector<8x512xf32>
    %157 = arith.addf %155, %156 : vector<8x512xf32>
    %cst_72 = arith.constant 0.000000e+00 : f32
    %158 = vector.broadcast %cst_72 : f32 to vector<8x512xf32>
    %159 = arith.maximumf %157, %158 : vector<8x512xf32>
    %c1_i32_73 = arith.constant 1 : i32
    %160 = vector.broadcast %c1_i32_73 : i32 to vector<1x512xi32>
    %161 = arith.andi %12, %160 : vector<1x512xi32>
    %c0_i32 = arith.constant 0 : i32
    %162 = vector.broadcast %c0_i32 : i32 to vector<1x512xi32>
    %163 = arith.cmpi eq, %161, %162 : vector<1x512xi32>
    %c1_i32_74 = arith.constant 1 : i32
    %164 = vector.broadcast %c1_i32_74 : i32 to vector<1x512xi32>
    %165 = arith.andi %8, %164 : vector<1x512xi32>
    %c0_i32_75 = arith.constant 0 : i32
    %166 = vector.broadcast %c0_i32_75 : i32 to vector<1x512xi32>
    %167 = arith.cmpi eq, %165, %166 : vector<1x512xi32>
    %168 = arith.andi %163, %167 : vector<1x512xi1>
    %cst_76 = arith.constant 1.000000e+00 : f32
    %cst_77 = arith.constant 0.000000e+00 : f32
    %169 = vector.broadcast %cst_76 : f32 to vector<1x512xf32>
    %170 = vector.broadcast %cst_77 : f32 to vector<1x512xf32>
    %171 = arith.select %168, %169, %170 : vector<1x512xi1>, vector<1x512xf32>
    %172 = vector.broadcast %171 : vector<1x512xf32> to vector<8x512xf32>
    %173 = arith.mulf %159, %172 : vector<8x512xf32>
    %c0_78 = arith.constant 0 : index
    %c128_79 = arith.constant 128 : index
    %174 = vector.load %arg12[%c0_78, %c128_79] : memref<16x768xf32, #tpu.memory_space<vmem>>, vector<8x512xf32>
    tpu.vector_store %arg12[%c0_78, %c128_79], %173 {strides = array<i32>} : memref<16x768xf32, #tpu.memory_space<vmem>>, vector<8x512xf32>,
    %c0_80 = arith.constant 0 : index
    %c94 = arith.constant 94 : index
    %175 = vector.load %arg12[%c0_80, %c94] : memref<16x768xf32, #tpu.memory_space<vmem>>, vector<8x512xf32>
    %c2_i32 = arith.constant 2 : i32
    %176 = vector.broadcast %c2_i32 : i32 to vector<1x512xi32>
    %177 = arith.cmpi sge, %12, %176 : vector<1x512xi32>
    %c2_i32_81 = arith.constant 2 : i32
    %178 = vector.broadcast %c2_i32_81 : i32 to vector<1x512xi32>
    %179 = arith.cmpi sge, %8, %178 : vector<1x512xi32>
    %180 = arith.andi %177, %179 : vector<1x512xi1>
    %cst_82 = arith.constant 1.000000e+00 : f32
    %cst_83 = arith.constant 0.000000e+00 : f32
    %181 = vector.broadcast %cst_82 : f32 to vector<1x512xf32>
    %182 = vector.broadcast %cst_83 : f32 to vector<1x512xf32>
    %183 = arith.select %180, %181, %182 : vector<1x512xi1>, vector<1x512xf32>
    %184 = vector.broadcast %183 : vector<1x512xf32> to vector<8x512xf32>
    %185 = arith.mulf %175, %184 : vector<8x512xf32>
    %c0_84 = arith.constant 0 : index
    %c0_85 = arith.constant 0 : index
    %186 = vector.load %arg13[%c0_84, %c0_85] : memref<144x512xf32, #tpu.memory_space<vmem>>, vector<8x512xf32>
    tpu.vector_store %arg13[%c0_84, %c0_85], %185 {strides = array<i32>} : memref<144x512xf32, #tpu.memory_space<vmem>>, vector<8x512xf32>,
    %c0_86 = arith.constant 0 : index
    %c96 = arith.constant 96 : index
    %187 = vector.load %arg12[%c0_86, %c96] : memref<16x768xf32, #tpu.memory_space<vmem>>, vector<8x512xf32>
    %c2_i32_87 = arith.constant 2 : i32
    %188 = vector.broadcast %c2_i32_87 : i32 to vector<1x512xi32>
    %189 = arith.cmpi sge, %12, %188 : vector<1x512xi32>
    %cst_88 = arith.constant 1.000000e+00 : f32
    %cst_89 = arith.constant 0.000000e+00 : f32
    %190 = vector.broadcast %cst_88 : f32 to vector<1x512xf32>
    %191 = vector.broadcast %cst_89 : f32 to vector<1x512xf32>
    %192 = arith.select %189, %190, %191 : vector<1x512xi1>, vector<1x512xf32>
    %193 = vector.broadcast %192 : vector<1x512xf32> to vector<8x512xf32>
    %194 = arith.mulf %187, %193 : vector<8x512xf32>
    %c8_90 = arith.constant 8 : index
    %c0_91 = arith.constant 0 : index
    %195 = vector.load %arg13[%c8_90, %c0_91] : memref<144x512xf32, #tpu.memory_space<vmem>>, vector<8x512xf32>
    tpu.vector_store %arg13[%c8_90, %c0_91], %194 {strides = array<i32>} : memref<144x512xf32, #tpu.memory_space<vmem>>, vector<8x512xf32>,
    %c0_92 = arith.constant 0 : index
    %c98 = arith.constant 98 : index
    %196 = vector.load %arg12[%c0_92, %c98] : memref<16x768xf32, #tpu.memory_space<vmem>>, vector<8x512xf32>
    %c2_i32_93 = arith.constant 2 : i32
    %197 = vector.broadcast %c2_i32_93 : i32 to vector<1x512xi32>
    %198 = arith.cmpi sge, %12, %197 : vector<1x512xi32>
    %c14_i32 = arith.constant 14 : i32
    %199 = vector.broadcast %c14_i32 : i32 to vector<1x512xi32>
    %200 = arith.cmpi slt, %8, %199 : vector<1x512xi32>
    %201 = arith.andi %198, %200 : vector<1x512xi1>
    %cst_94 = arith.constant 1.000000e+00 : f32
    %cst_95 = arith.constant 0.000000e+00 : f32
    %202 = vector.broadcast %cst_94 : f32 to vector<1x512xf32>
    %203 = vector.broadcast %cst_95 : f32 to vector<1x512xf32>
    %204 = arith.select %201, %202, %203 : vector<1x512xi1>, vector<1x512xf32>
    %205 = vector.broadcast %204 : vector<1x512xf32> to vector<8x512xf32>
    %206 = arith.mulf %196, %205 : vector<8x512xf32>
    %c16 = arith.constant 16 : index
    %c0_96 = arith.constant 0 : index
    %207 = vector.load %arg13[%c16, %c0_96] : memref<144x512xf32, #tpu.memory_space<vmem>>, vector<8x512xf32>
    tpu.vector_store %arg13[%c16, %c0_96], %206 {strides = array<i32>} : memref<144x512xf32, #tpu.memory_space<vmem>>, vector<8x512xf32>,
    %c0_97 = arith.constant 0 : index
    %c126 = arith.constant 126 : index
    %208 = vector.load %arg12[%c0_97, %c126] : memref<16x768xf32, #tpu.memory_space<vmem>>, vector<8x512xf32>
    %c2_i32_98 = arith.constant 2 : i32
    %209 = vector.broadcast %c2_i32_98 : i32 to vector<1x512xi32>
    %210 = arith.cmpi sge, %8, %209 : vector<1x512xi32>
    %cst_99 = arith.constant 1.000000e+00 : f32
    %cst_100 = arith.constant 0.000000e+00 : f32
    %211 = vector.broadcast %cst_99 : f32 to vector<1x512xf32>
    %212 = vector.broadcast %cst_100 : f32 to vector<1x512xf32>
    %213 = arith.select %210, %211, %212 : vector<1x512xi1>, vector<1x512xf32>
    %214 = vector.broadcast %213 : vector<1x512xf32> to vector<8x512xf32>
    %215 = arith.mulf %208, %214 : vector<8x512xf32>
    %c24 = arith.constant 24 : index
    %c0_101 = arith.constant 0 : index
    %216 = vector.load %arg13[%c24, %c0_101] : memref<144x512xf32, #tpu.memory_space<vmem>>, vector<8x512xf32>
    tpu.vector_store %arg13[%c24, %c0_101], %215 {strides = array<i32>} : memref<144x512xf32, #tpu.memory_space<vmem>>, vector<8x512xf32>,
    %c0_102 = arith.constant 0 : index
    %c128_103 = arith.constant 128 : index
    %217 = vector.load %arg12[%c0_102, %c128_103] : memref<16x768xf32, #tpu.memory_space<vmem>>, vector<8x512xf32>
    %c32 = arith.constant 32 : index
    %c0_104 = arith.constant 0 : index
    %218 = vector.load %arg13[%c32, %c0_104] : memref<144x512xf32, #tpu.memory_space<vmem>>, vector<8x512xf32>
    tpu.vector_store %arg13[%c32, %c0_104], %217 {strides = array<i32>} : memref<144x512xf32, #tpu.memory_space<vmem>>, vector<8x512xf32>,
    %c0_105 = arith.constant 0 : index
    %c130 = arith.constant 130 : index
    %219 = vector.load %arg12[%c0_105, %c130] : memref<16x768xf32, #tpu.memory_space<vmem>>, vector<8x512xf32>
    %c14_i32_106 = arith.constant 14 : i32
    %220 = vector.broadcast %c14_i32_106 : i32 to vector<1x512xi32>
    %221 = arith.cmpi slt, %8, %220 : vector<1x512xi32>
    %cst_107 = arith.constant 1.000000e+00 : f32
    %cst_108 = arith.constant 0.000000e+00 : f32
    %222 = vector.broadcast %cst_107 : f32 to vector<1x512xf32>
    %223 = vector.broadcast %cst_108 : f32 to vector<1x512xf32>
    %224 = arith.select %221, %222, %223 : vector<1x512xi1>, vector<1x512xf32>
    %225 = vector.broadcast %224 : vector<1x512xf32> to vector<8x512xf32>
    %226 = arith.mulf %219, %225 : vector<8x512xf32>
    %c40 = arith.constant 40 : index
    %c0_109 = arith.constant 0 : index
    %227 = vector.load %arg13[%c40, %c0_109] : memref<144x512xf32, #tpu.memory_space<vmem>>, vector<8x512xf32>
    tpu.vector_store %arg13[%c40, %c0_109], %226 {strides = array<i32>} : memref<144x512xf32, #tpu.memory_space<vmem>>, vector<8x512xf32>,
    %c0_110 = arith.constant 0 : index
    %c158 = arith.constant 158 : index
    %228 = vector.load %arg12[%c0_110, %c158] : memref<16x768xf32, #tpu.memory_space<vmem>>, vector<8x512xf32>
    %c14_i32_111 = arith.constant 14 : i32
    %229 = vector.broadcast %c14_i32_111 : i32 to vector<1x512xi32>
    %230 = arith.cmpi slt, %12, %229 : vector<1x512xi32>
    %c2_i32_112 = arith.constant 2 : i32
    %231 = vector.broadcast %c2_i32_112 : i32 to vector<1x512xi32>
    %232 = arith.cmpi sge, %8, %231 : vector<1x512xi32>
    %233 = arith.andi %230, %232 : vector<1x512xi1>
    %cst_113 = arith.constant 1.000000e+00 : f32
    %cst_114 = arith.constant 0.000000e+00 : f32
    %234 = vector.broadcast %cst_113 : f32 to vector<1x512xf32>
    %235 = vector.broadcast %cst_114 : f32 to vector<1x512xf32>
    %236 = arith.select %233, %234, %235 : vector<1x512xi1>, vector<1x512xf32>
    %237 = vector.broadcast %236 : vector<1x512xf32> to vector<8x512xf32>
    %238 = arith.mulf %228, %237 : vector<8x512xf32>
    %c48 = arith.constant 48 : index
    %c0_115 = arith.constant 0 : index
    %239 = vector.load %arg13[%c48, %c0_115] : memref<144x512xf32, #tpu.memory_space<vmem>>, vector<8x512xf32>
    tpu.vector_store %arg13[%c48, %c0_115], %238 {strides = array<i32>} : memref<144x512xf32, #tpu.memory_space<vmem>>, vector<8x512xf32>,
    %c0_116 = arith.constant 0 : index
    %c160 = arith.constant 160 : index
    %240 = vector.load %arg12[%c0_116, %c160] : memref<16x768xf32, #tpu.memory_space<vmem>>, vector<8x512xf32>
    %c14_i32_117 = arith.constant 14 : i32
    %241 = vector.broadcast %c14_i32_117 : i32 to vector<1x512xi32>
    %242 = arith.cmpi slt, %12, %241 : vector<1x512xi32>
    %cst_118 = arith.constant 1.000000e+00 : f32
    %cst_119 = arith.constant 0.000000e+00 : f32
    %243 = vector.broadcast %cst_118 : f32 to vector<1x512xf32>
    %244 = vector.broadcast %cst_119 : f32 to vector<1x512xf32>
    %245 = arith.select %242, %243, %244 : vector<1x512xi1>, vector<1x512xf32>
    %246 = vector.broadcast %245 : vector<1x512xf32> to vector<8x512xf32>
    %247 = arith.mulf %240, %246 : vector<8x512xf32>
    %c56 = arith.constant 56 : index
    %c0_120 = arith.constant 0 : index
    %248 = vector.load %arg13[%c56, %c0_120] : memref<144x512xf32, #tpu.memory_space<vmem>>, vector<8x512xf32>
    tpu.vector_store %arg13[%c56, %c0_120], %247 {strides = array<i32>} : memref<144x512xf32, #tpu.memory_space<vmem>>, vector<8x512xf32>,
    %c0_121 = arith.constant 0 : index
    %c162 = arith.constant 162 : index
    %249 = vector.load %arg12[%c0_121, %c162] : memref<16x768xf32, #tpu.memory_space<vmem>>, vector<8x512xf32>
    %c14_i32_122 = arith.constant 14 : i32
    %250 = vector.broadcast %c14_i32_122 : i32 to vector<1x512xi32>
    %251 = arith.cmpi slt, %12, %250 : vector<1x512xi32>
    %c14_i32_123 = arith.constant 14 : i32
    %252 = vector.broadcast %c14_i32_123 : i32 to vector<1x512xi32>
    %253 = arith.cmpi slt, %8, %252 : vector<1x512xi32>
    %254 = arith.andi %251, %253 : vector<1x512xi1>
    %cst_124 = arith.constant 1.000000e+00 : f32
    %cst_125 = arith.constant 0.000000e+00 : f32
    %255 = vector.broadcast %cst_124 : f32 to vector<1x512xf32>
    %256 = vector.broadcast %cst_125 : f32 to vector<1x512xf32>
    %257 = arith.select %254, %255, %256 : vector<1x512xi1>, vector<1x512xf32>
    %258 = vector.broadcast %257 : vector<1x512xf32> to vector<8x512xf32>
    %259 = arith.mulf %249, %258 : vector<8x512xf32>
    %c64 = arith.constant 64 : index
    %c0_126 = arith.constant 0 : index
    %260 = vector.load %arg13[%c64, %c0_126] : memref<144x512xf32, #tpu.memory_space<vmem>>, vector<8x512xf32>
    tpu.vector_store %arg13[%c64, %c0_126], %259 {strides = array<i32>} : memref<144x512xf32, #tpu.memory_space<vmem>>, vector<8x512xf32>,
    %c0_127 = arith.constant 0 : index
    %c0_128 = arith.constant 0 : index
    %261 = vector.load %arg2[%c0_127, %c0_128] : memref<16x72xf32, #tpu.memory_space<vmem>>, vector<16x72xf32>
    %c0_129 = arith.constant 0 : index
    %c0_130 = arith.constant 0 : index
    %262 = vector.load %arg13[%c0_129, %c0_130] : memref<144x512xf32, #tpu.memory_space<vmem>>, vector<72x512xf32>
    %cst_131 = arith.constant dense<0.000000e+00> : vector<16x512xf32>
    %263 = tpu.matmul %261, %262, %cst_131 {dimension_numbers = #tpu.dot_dimension_numbers<[1], [0], [0], [1], [0, 0, 1, 1], [], []>} : vector<16x72xf32>, vector<72x512xf32>, vector<16x512xf32> -> vector<16x512xf32>
    %cst_132 = arith.constant dense<0.000000e+00> : vector<16xf32>
    %264 = vector.multi_reduction <add>, %263, %cst_132 [1] : vector<16x512xf32> to vector<16xf32>
    %265 = vector.shape_cast %264 : vector<16xf32> to vector<16x1xf32>
    %cst_133 = arith.constant 7.812500e-03 : f32
    %266 = vector.broadcast %cst_133 : f32 to vector<16x1xf32>
    %267 = arith.mulf %265, %266 : vector<16x1xf32>
    %268 = arith.mulf %263, %263 : vector<16x512xf32>
    %cst_134 = arith.constant dense<0.000000e+00> : vector<16xf32>
    %269 = vector.multi_reduction <add>, %268, %cst_134 [1] : vector<16x512xf32> to vector<16xf32>
    %270 = vector.shape_cast %269 : vector<16xf32> to vector<16x1xf32>
    %cst_135 = arith.constant 7.812500e-03 : f32
    %271 = vector.broadcast %cst_135 : f32 to vector<16x1xf32>
    %272 = arith.mulf %270, %271 : vector<16x1xf32>
    %273 = arith.mulf %267, %267 : vector<16x1xf32>
    %274 = arith.subf %272, %273 : vector<16x1xf32>
    %cst_136 = arith.constant 9.99999974E-6 : f32
    %275 = vector.broadcast %cst_136 : f32 to vector<16x1xf32>
    %276 = arith.addf %274, %275 : vector<16x1xf32>
    %277 = math.rsqrt %276 : vector<16x1xf32>
    %c0_137 = arith.constant 0 : index
    %c0_138 = arith.constant 0 : index
    %278 = vector.load %arg6[%c0_137, %c0_138] : memref<16x1xf32, #tpu.memory_space<vmem>>, vector<16x1xf32>
    %279 = arith.mulf %277, %278 : vector<16x1xf32>
    %c0_139 = arith.constant 0 : index
    %c0_140 = arith.constant 0 : index
    %280 = vector.load %arg7[%c0_139, %c0_140] : memref<16x1xf32, #tpu.memory_space<vmem>>, vector<16x1xf32>
    %c0_141 = arith.constant 0 : index
    %c128_142 = arith.constant 128 : index
    %281 = vector.load %arg12[%c0_141, %c128_142] : memref<16x768xf32, #tpu.memory_space<vmem>>, vector<16x512xf32>
    tpu.vector_store %arg12[%c0_141, %c128_142], %263 {strides = array<i32>} : memref<16x768xf32, #tpu.memory_space<vmem>>, vector<16x512xf32>,
    %c0_143 = arith.constant 0 : index
    %c130_144 = arith.constant 130 : index
    %282 = vector.load %arg12[%c0_143, %c130_144] : memref<16x768xf32, #tpu.memory_space<vmem>>, vector<16x512xf32>
    %283 = arith.addf %263, %282 : vector<16x512xf32>
    %c0_145 = arith.constant 0 : index
    %c160_146 = arith.constant 160 : index
    %284 = vector.load %arg12[%c0_145, %c160_146] : memref<16x768xf32, #tpu.memory_space<vmem>>, vector<16x512xf32>
    %285 = arith.addf %283, %284 : vector<16x512xf32>
    %c0_147 = arith.constant 0 : index
    %c162_148 = arith.constant 162 : index
    %286 = vector.load %arg12[%c0_147, %c162_148] : memref<16x768xf32, #tpu.memory_space<vmem>>, vector<16x512xf32>
    %287 = arith.addf %285, %286 : vector<16x512xf32>
    %cst_149 = arith.constant 2.500000e-01 : f32
    %288 = vector.broadcast %cst_149 : f32 to vector<16x512xf32>
    %289 = arith.mulf %287, %288 : vector<16x512xf32>
    %290 = vector.broadcast %267 : vector<16x1xf32> to vector<16x512xf32>
    %291 = arith.subf %289, %290 : vector<16x512xf32>
    %292 = vector.broadcast %279 : vector<16x1xf32> to vector<16x512xf32>
    %293 = arith.mulf %291, %292 : vector<16x512xf32>
    %294 = vector.broadcast %280 : vector<16x1xf32> to vector<16x512xf32>
    %295 = arith.addf %293, %294 : vector<16x512xf32>
    %cst_150 = arith.constant 0.000000e+00 : f32
    %296 = vector.broadcast %cst_150 : f32 to vector<16x512xf32>
    %297 = arith.maximumf %295, %296 : vector<16x512xf32>
    %c3_i32 = arith.constant 3 : i32
    %298 = vector.broadcast %c3_i32 : i32 to vector<1x512xi32>
    %299 = arith.andi %12, %298 : vector<1x512xi32>
    %c0_i32_151 = arith.constant 0 : i32
    %300 = vector.broadcast %c0_i32_151 : i32 to vector<1x512xi32>
    %301 = arith.cmpi eq, %299, %300 : vector<1x512xi32>
    %c3_i32_152 = arith.constant 3 : i32
    %302 = vector.broadcast %c3_i32_152 : i32 to vector<1x512xi32>
    %303 = arith.andi %8, %302 : vector<1x512xi32>
    %c0_i32_153 = arith.constant 0 : i32
    %304 = vector.broadcast %c0_i32_153 : i32 to vector<1x512xi32>
    %305 = arith.cmpi eq, %303, %304 : vector<1x512xi32>
    %306 = arith.andi %301, %305 : vector<1x512xi1>
    %cst_154 = arith.constant 1.000000e+00 : f32
    %cst_155 = arith.constant 0.000000e+00 : f32
    %307 = vector.broadcast %cst_154 : f32 to vector<1x512xf32>
    %308 = vector.broadcast %cst_155 : f32 to vector<1x512xf32>
    %309 = arith.select %306, %307, %308 : vector<1x512xi1>, vector<1x512xf32>
    %310 = vector.broadcast %309 : vector<1x512xf32> to vector<16x512xf32>
    %311 = arith.mulf %297, %310 : vector<16x512xf32>
    %c0_156 = arith.constant 0 : index
    %c128_157 = arith.constant 128 : index
    %312 = vector.load %arg12[%c0_156, %c128_157] : memref<16x768xf32, #tpu.memory_space<vmem>>, vector<16x512xf32>
    tpu.vector_store %arg12[%c0_156, %c128_157], %311 {strides = array<i32>} : memref<16x768xf32, #tpu.memory_space<vmem>>, vector<16x512xf32>,
    %c0_158 = arith.constant 0 : index
    %c60 = arith.constant 60 : index
    %313 = vector.load %arg12[%c0_158, %c60] : memref<16x768xf32, #tpu.memory_space<vmem>>, vector<16x512xf32>
    %c4_i32_159 = arith.constant 4 : i32
    %314 = vector.broadcast %c4_i32_159 : i32 to vector<1x512xi32>
    %315 = arith.cmpi sge, %12, %314 : vector<1x512xi32>
    %c4_i32_160 = arith.constant 4 : i32
    %316 = vector.broadcast %c4_i32_160 : i32 to vector<1x512xi32>
    %317 = arith.cmpi sge, %8, %316 : vector<1x512xi32>
    %318 = arith.andi %315, %317 : vector<1x512xi1>
    %cst_161 = arith.constant 1.000000e+00 : f32
    %cst_162 = arith.constant 0.000000e+00 : f32
    %319 = vector.broadcast %cst_161 : f32 to vector<1x512xf32>
    %320 = vector.broadcast %cst_162 : f32 to vector<1x512xf32>
    %321 = arith.select %318, %319, %320 : vector<1x512xi1>, vector<1x512xf32>
    %322 = vector.broadcast %321 : vector<1x512xf32> to vector<16x512xf32>
    %323 = arith.mulf %313, %322 : vector<16x512xf32>
    %c0_163 = arith.constant 0 : index
    %c0_164 = arith.constant 0 : index
    %324 = vector.load %arg13[%c0_163, %c0_164] : memref<144x512xf32, #tpu.memory_space<vmem>>, vector<16x512xf32>
    tpu.vector_store %arg13[%c0_163, %c0_164], %323 {strides = array<i32>} : memref<144x512xf32, #tpu.memory_space<vmem>>, vector<16x512xf32>,
    %c0_165 = arith.constant 0 : index
    %c64_166 = arith.constant 64 : index
    %325 = vector.load %arg12[%c0_165, %c64_166] : memref<16x768xf32, #tpu.memory_space<vmem>>, vector<16x512xf32>
    %c4_i32_167 = arith.constant 4 : i32
    %326 = vector.broadcast %c4_i32_167 : i32 to vector<1x512xi32>
    %327 = arith.cmpi sge, %12, %326 : vector<1x512xi32>
    %cst_168 = arith.constant 1.000000e+00 : f32
    %cst_169 = arith.constant 0.000000e+00 : f32
    %328 = vector.broadcast %cst_168 : f32 to vector<1x512xf32>
    %329 = vector.broadcast %cst_169 : f32 to vector<1x512xf32>
    %330 = arith.select %327, %328, %329 : vector<1x512xi1>, vector<1x512xf32>
    %331 = vector.broadcast %330 : vector<1x512xf32> to vector<16x512xf32>
    %332 = arith.mulf %325, %331 : vector<16x512xf32>
    %c16_170 = arith.constant 16 : index
    %c0_171 = arith.constant 0 : index
    %333 = vector.load %arg13[%c16_170, %c0_171] : memref<144x512xf32, #tpu.memory_space<vmem>>, vector<16x512xf32>
    tpu.vector_store %arg13[%c16_170, %c0_171], %332 {strides = array<i32>} : memref<144x512xf32, #tpu.memory_space<vmem>>, vector<16x512xf32>,
    %c0_172 = arith.constant 0 : index
    %c68 = arith.constant 68 : index
    %334 = vector.load %arg12[%c0_172, %c68] : memref<16x768xf32, #tpu.memory_space<vmem>>, vector<16x512xf32>
    %c4_i32_173 = arith.constant 4 : i32
    %335 = vector.broadcast %c4_i32_173 : i32 to vector<1x512xi32>
    %336 = arith.cmpi sge, %12, %335 : vector<1x512xi32>
    %c12_i32 = arith.constant 12 : i32
    %337 = vector.broadcast %c12_i32 : i32 to vector<1x512xi32>
    %338 = arith.cmpi slt, %8, %337 : vector<1x512xi32>
    %339 = arith.andi %336, %338 : vector<1x512xi1>
    %cst_174 = arith.constant 1.000000e+00 : f32
    %cst_175 = arith.constant 0.000000e+00 : f32
    %340 = vector.broadcast %cst_174 : f32 to vector<1x512xf32>
    %341 = vector.broadcast %cst_175 : f32 to vector<1x512xf32>
    %342 = arith.select %339, %340, %341 : vector<1x512xi1>, vector<1x512xf32>
    %343 = vector.broadcast %342 : vector<1x512xf32> to vector<16x512xf32>
    %344 = arith.mulf %334, %343 : vector<16x512xf32>
    %c32_176 = arith.constant 32 : index
    %c0_177 = arith.constant 0 : index
    %345 = vector.load %arg13[%c32_176, %c0_177] : memref<144x512xf32, #tpu.memory_space<vmem>>, vector<16x512xf32>
    tpu.vector_store %arg13[%c32_176, %c0_177], %344 {strides = array<i32>} : memref<144x512xf32, #tpu.memory_space<vmem>>, vector<16x512xf32>,
    %c0_178 = arith.constant 0 : index
    %c124 = arith.constant 124 : index
    %346 = vector.load %arg12[%c0_178, %c124] : memref<16x768xf32, #tpu.memory_space<vmem>>, vector<16x512xf32>
    %c4_i32_179 = arith.constant 4 : i32
    %347 = vector.broadcast %c4_i32_179 : i32 to vector<1x512xi32>
    %348 = arith.cmpi sge, %8, %347 : vector<1x512xi32>
    %cst_180 = arith.constant 1.000000e+00 : f32
    %cst_181 = arith.constant 0.000000e+00 : f32
    %349 = vector.broadcast %cst_180 : f32 to vector<1x512xf32>
    %350 = vector.broadcast %cst_181 : f32 to vector<1x512xf32>
    %351 = arith.select %348, %349, %350 : vector<1x512xi1>, vector<1x512xf32>
    %352 = vector.broadcast %351 : vector<1x512xf32> to vector<16x512xf32>
    %353 = arith.mulf %346, %352 : vector<16x512xf32>
    %c48_182 = arith.constant 48 : index
    %c0_183 = arith.constant 0 : index
    %354 = vector.load %arg13[%c48_182, %c0_183] : memref<144x512xf32, #tpu.memory_space<vmem>>, vector<16x512xf32>
    tpu.vector_store %arg13[%c48_182, %c0_183], %353 {strides = array<i32>} : memref<144x512xf32, #tpu.memory_space<vmem>>, vector<16x512xf32>,
    %c0_184 = arith.constant 0 : index
    %c128_185 = arith.constant 128 : index
    %355 = vector.load %arg12[%c0_184, %c128_185] : memref<16x768xf32, #tpu.memory_space<vmem>>, vector<16x512xf32>
    %c64_186 = arith.constant 64 : index
    %c0_187 = arith.constant 0 : index
    %356 = vector.load %arg13[%c64_186, %c0_187] : memref<144x512xf32, #tpu.memory_space<vmem>>, vector<16x512xf32>
    tpu.vector_store %arg13[%c64_186, %c0_187], %355 {strides = array<i32>} : memref<144x512xf32, #tpu.memory_space<vmem>>, vector<16x512xf32>,
    %c0_188 = arith.constant 0 : index
    %c132 = arith.constant 132 : index
    %357 = vector.load %arg12[%c0_188, %c132] : memref<16x768xf32, #tpu.memory_space<vmem>>, vector<16x512xf32>
    %c12_i32_189 = arith.constant 12 : i32
    %358 = vector.broadcast %c12_i32_189 : i32 to vector<1x512xi32>
    %359 = arith.cmpi slt, %8, %358 : vector<1x512xi32>
    %cst_190 = arith.constant 1.000000e+00 : f32
    %cst_191 = arith.constant 0.000000e+00 : f32
    %360 = vector.broadcast %cst_190 : f32 to vector<1x512xf32>
    %361 = vector.broadcast %cst_191 : f32 to vector<1x512xf32>
    %362 = arith.select %359, %360, %361 : vector<1x512xi1>, vector<1x512xf32>
    %363 = vector.broadcast %362 : vector<1x512xf32> to vector<16x512xf32>
    %364 = arith.mulf %357, %363 : vector<16x512xf32>
    %c80 = arith.constant 80 : index
    %c0_192 = arith.constant 0 : index
    %365 = vector.load %arg13[%c80, %c0_192] : memref<144x512xf32, #tpu.memory_space<vmem>>, vector<16x512xf32>
    tpu.vector_store %arg13[%c80, %c0_192], %364 {strides = array<i32>} : memref<144x512xf32, #tpu.memory_space<vmem>>, vector<16x512xf32>,
    %c0_193 = arith.constant 0 : index
    %c188 = arith.constant 188 : index
    %366 = vector.load %arg12[%c0_193, %c188] : memref<16x768xf32, #tpu.memory_space<vmem>>, vector<16x512xf32>
    %c12_i32_194 = arith.constant 12 : i32
    %367 = vector.broadcast %c12_i32_194 : i32 to vector<1x512xi32>
    %368 = arith.cmpi slt, %12, %367 : vector<1x512xi32>
    %c4_i32_195 = arith.constant 4 : i32
    %369 = vector.broadcast %c4_i32_195 : i32 to vector<1x512xi32>
    %370 = arith.cmpi sge, %8, %369 : vector<1x512xi32>
    %371 = arith.andi %368, %370 : vector<1x512xi1>
    %cst_196 = arith.constant 1.000000e+00 : f32
    %cst_197 = arith.constant 0.000000e+00 : f32
    %372 = vector.broadcast %cst_196 : f32 to vector<1x512xf32>
    %373 = vector.broadcast %cst_197 : f32 to vector<1x512xf32>
    %374 = arith.select %371, %372, %373 : vector<1x512xi1>, vector<1x512xf32>
    %375 = vector.broadcast %374 : vector<1x512xf32> to vector<16x512xf32>
    %376 = arith.mulf %366, %375 : vector<16x512xf32>
    %c96_198 = arith.constant 96 : index
    %c0_199 = arith.constant 0 : index
    %377 = vector.load %arg13[%c96_198, %c0_199] : memref<144x512xf32, #tpu.memory_space<vmem>>, vector<16x512xf32>
    tpu.vector_store %arg13[%c96_198, %c0_199], %376 {strides = array<i32>} : memref<144x512xf32, #tpu.memory_space<vmem>>, vector<16x512xf32>,
    %c0_200 = arith.constant 0 : index
    %c192 = arith.constant 192 : index
    %378 = vector.load %arg12[%c0_200, %c192] : memref<16x768xf32, #tpu.memory_space<vmem>>, vector<16x512xf32>
    %c12_i32_201 = arith.constant 12 : i32
    %379 = vector.broadcast %c12_i32_201 : i32 to vector<1x512xi32>
    %380 = arith.cmpi slt, %12, %379 : vector<1x512xi32>
    %cst_202 = arith.constant 1.000000e+00 : f32
    %cst_203 = arith.constant 0.000000e+00 : f32
    %381 = vector.broadcast %cst_202 : f32 to vector<1x512xf32>
    %382 = vector.broadcast %cst_203 : f32 to vector<1x512xf32>
    %383 = arith.select %380, %381, %382 : vector<1x512xi1>, vector<1x512xf32>
    %384 = vector.broadcast %383 : vector<1x512xf32> to vector<16x512xf32>
    %385 = arith.mulf %378, %384 : vector<16x512xf32>
    %c112_204 = arith.constant 112 : index
    %c0_205 = arith.constant 0 : index
    %386 = vector.load %arg13[%c112_204, %c0_205] : memref<144x512xf32, #tpu.memory_space<vmem>>, vector<16x512xf32>
    tpu.vector_store %arg13[%c112_204, %c0_205], %385 {strides = array<i32>} : memref<144x512xf32, #tpu.memory_space<vmem>>, vector<16x512xf32>,
    %c0_206 = arith.constant 0 : index
    %c196 = arith.constant 196 : index
    %387 = vector.load %arg12[%c0_206, %c196] : memref<16x768xf32, #tpu.memory_space<vmem>>, vector<16x512xf32>
    %c12_i32_207 = arith.constant 12 : i32
    %388 = vector.broadcast %c12_i32_207 : i32 to vector<1x512xi32>
    %389 = arith.cmpi slt, %12, %388 : vector<1x512xi32>
    %c12_i32_208 = arith.constant 12 : i32
    %390 = vector.broadcast %c12_i32_208 : i32 to vector<1x512xi32>
    %391 = arith.cmpi slt, %8, %390 : vector<1x512xi32>
    %392 = arith.andi %389, %391 : vector<1x512xi1>
    %cst_209 = arith.constant 1.000000e+00 : f32
    %cst_210 = arith.constant 0.000000e+00 : f32
    %393 = vector.broadcast %cst_209 : f32 to vector<1x512xf32>
    %394 = vector.broadcast %cst_210 : f32 to vector<1x512xf32>
    %395 = arith.select %392, %393, %394 : vector<1x512xi1>, vector<1x512xf32>
    %396 = vector.broadcast %395 : vector<1x512xf32> to vector<16x512xf32>
    %397 = arith.mulf %387, %396 : vector<16x512xf32>
    %c128_211 = arith.constant 128 : index
    %c0_212 = arith.constant 0 : index
    %398 = vector.load %arg13[%c128_211, %c0_212] : memref<144x512xf32, #tpu.memory_space<vmem>>, vector<16x512xf32>
    tpu.vector_store %arg13[%c128_211, %c0_212], %397 {strides = array<i32>} : memref<144x512xf32, #tpu.memory_space<vmem>>, vector<16x512xf32>,
    %c0_213 = arith.constant 0 : index
    %c0_214 = arith.constant 0 : index
    %399 = vector.load %arg3[%c0_213, %c0_214] : memref<32x144xf32, #tpu.memory_space<vmem>>, vector<32x144xf32>
    %c0_215 = arith.constant 0 : index
    %c0_216 = arith.constant 0 : index
    %400 = vector.load %arg13[%c0_215, %c0_216] : memref<144x512xf32, #tpu.memory_space<vmem>>, vector<144x512xf32>
    %cst_217 = arith.constant dense<0.000000e+00> : vector<32x512xf32>
    %401 = tpu.matmul %399, %400, %cst_217 {dimension_numbers = #tpu.dot_dimension_numbers<[1], [0], [0], [1], [0, 0, 1, 1], [], []>} : vector<32x144xf32>, vector<144x512xf32>, vector<32x512xf32> -> vector<32x512xf32>
    %cst_218 = arith.constant dense<0.000000e+00> : vector<32xf32>
    %402 = vector.multi_reduction <add>, %401, %cst_218 [1] : vector<32x512xf32> to vector<32xf32>
    %403 = vector.shape_cast %402 : vector<32xf32> to vector<32x1xf32>
    %cst_219 = arith.constant 3.125000e-02 : f32
    %404 = vector.broadcast %cst_219 : f32 to vector<32x1xf32>
    %405 = arith.mulf %403, %404 : vector<32x1xf32>
    %406 = arith.mulf %401, %401 : vector<32x512xf32>
    %cst_220 = arith.constant dense<0.000000e+00> : vector<32xf32>
    %407 = vector.multi_reduction <add>, %406, %cst_220 [1] : vector<32x512xf32> to vector<32xf32>
    %408 = vector.shape_cast %407 : vector<32xf32> to vector<32x1xf32>
    %cst_221 = arith.constant 3.125000e-02 : f32
    %409 = vector.broadcast %cst_221 : f32 to vector<32x1xf32>
    %410 = arith.mulf %408, %409 : vector<32x1xf32>
    %411 = arith.mulf %405, %405 : vector<32x1xf32>
    %412 = arith.subf %410, %411 : vector<32x1xf32>
    %cst_222 = arith.constant 9.99999974E-6 : f32
    %413 = vector.broadcast %cst_222 : f32 to vector<32x1xf32>
    %414 = arith.addf %412, %413 : vector<32x1xf32>
    %415 = math.rsqrt %414 : vector<32x1xf32>
    %c0_223 = arith.constant 0 : index
    %c0_224 = arith.constant 0 : index
    %416 = vector.load %arg8[%c0_223, %c0_224] : memref<32x1xf32, #tpu.memory_space<vmem>>, vector<32x1xf32>
    %417 = arith.mulf %415, %416 : vector<32x1xf32>
    %c0_225 = arith.constant 0 : index
    %c0_226 = arith.constant 0 : index
    %418 = vector.load %arg9[%c0_225, %c0_226] : memref<32x1xf32, #tpu.memory_space<vmem>>, vector<32x1xf32>
    %c0_227 = arith.constant 0 : index
    %c0_228 = arith.constant 0 : index
    %419 = vector.load %arg10[%c0_227, %c0_228] : memref<512x8xf32, #tpu.memory_space<vmem>>, vector<512x8xf32>
    %cst_229 = arith.constant dense<0.000000e+00> : vector<32x8xf32>
    %420 = tpu.matmul %401, %419, %cst_229 {dimension_numbers = #tpu.dot_dimension_numbers<[1], [0], [0], [1], [0, 0, 1, 1], [], []>} : vector<32x512xf32>, vector<512x8xf32>, vector<32x8xf32> -> vector<32x8xf32>
    %421 = vector.broadcast %405 : vector<32x1xf32> to vector<32x8xf32>
    %422 = arith.subf %420, %421 : vector<32x8xf32>
    %423 = vector.broadcast %417 : vector<32x1xf32> to vector<32x8xf32>
    %424 = arith.mulf %422, %423 : vector<32x8xf32>
    %425 = vector.broadcast %418 : vector<32x1xf32> to vector<32x8xf32>
    %426 = arith.addf %424, %425 : vector<32x8xf32>
    %cst_230 = arith.constant 0.000000e+00 : f32
    %427 = vector.broadcast %cst_230 : f32 to vector<32x8xf32>
    %428 = arith.maximumf %426, %427 : vector<32x8xf32>
    %429 = vector.extract_strided_slice %428 {offsets = [0, 0], sizes = [32, 4], strides = [1, 1]} : vector<32x8xf32> to vector<32x4xf32>
    %c0_231 = arith.constant 0 : index
    %c0_232 = arith.constant 0 : index
    %430 = vector.load %arg11[%c0_231, %c0_232] : memref<64x4xf32, #tpu.memory_space<vmem>>, vector<32x4xf32>
    tpu.vector_store %arg11[%c0_231, %c0_232], %429 {strides = array<i32>} : memref<64x4xf32, #tpu.memory_space<vmem>>, vector<32x4xf32>,
    %431 = vector.extract_strided_slice %428 {offsets = [0, 4], sizes = [32, 4], strides = [1, 1]} : vector<32x8xf32> to vector<32x4xf32>
    %c32_233 = arith.constant 32 : index
    %c0_234 = arith.constant 0 : index
    %432 = vector.load %arg11[%c32_233, %c0_234] : memref<64x4xf32, #tpu.memory_space<vmem>>, vector<32x4xf32>
    tpu.vector_store %arg11[%c32_233, %c0_234], %431 {strides = array<i32>} : memref<64x4xf32, #tpu.memory_space<vmem>>, vector<32x4xf32>,
    return
  }
}

</mosaic_0001>

<bundles_post_ra>
// kernel: _forward.1
= control target key start
LH: loop header
LB: loop body
LE: loop exit
PB: predicated region body
PF: predicated region fallthrough
CT: control target
= control target key end

     0   :  { %v4161_v0 = vmov 2   ;;  %v4162_v1 = vmov 1   ;;  %v43_v3 = vlaneseq  ;;  %v4163_v4 = vmov 1966171168   ;;  %s4170_s20 = smov 112   ;;  %s4171_s21 = smov 1   ;;  %s6764_s1 = inlined_call_operand.vmem [shape: f32[8,9], index: 1, kind: input, shape index: {}]   ;;  %s6765_s0 = inlined_call_operand.vmem [shape: f32[1,512], index: 0, kind: input, shape index: {}]   ;;  %s6766_s4 = inlined_call_operand.vmem [shape: f32[8,1], index: 4, kind: input, shape index: {}]   ;;  %s6767_s5 = inlined_call_operand.vmem [shape: f32[8,1], index: 5, kind: input, shape index: {}]   ;;  %s6768_s7 = inlined_call_operand.vmem [shape: f32[16,1], index: 7, kind: input, shape index: {}]   ;;  %s6769_s2 = inlined_call_operand.vmem [shape: f32[16,72], index: 2, kind: input, shape index: {}]   ;;  %s6770_s6 = inlined_call_operand.vmem [shape: f32[16,1], index: 6, kind: input, shape index: {}]   ;;  %s6771_s3 = inlined_call_operand.vmem [shape: f32[32,144], index: 3, kind: input, shape index: {}]   ;;  %s6772_s10 = inlined_call_operand.vmem [shape: f32[512,8], index: 10, kind: input, shape index: {}]   ;;  %s6773_s9 = inlined_call_operand.vmem [shape: f32[32,1], index: 9, kind: input, shape index: {}]   ;;  %s6774_s8 = inlined_call_operand.vmem [shape: f32[32,1], index: 8, kind: input, shape index: {}]   ;;  %s6775_s11 = inlined_call_operand.vmem [shape: f32[64,4], index: 11, kind: output, shape index: {}]  }
   0x1   :  { %3951 = vset.pattern.permute.xlu1 %v4161_v0  ;;  %3950 = vset.pattern.permute.xlu0 %v4162_v1  ;;  %v4258_v2 = vld [vmem:[%s6764_s1] sm:$0xff]  ;;  %v93_v5 = vunpack.c.l.s4 %v4163_v4  ;;  %v4164_v6 = vmov 0.0   ;;  %v4165_v15 = vmov 4   ;;  %v4166_v16 = vmov 3   ;;  %s4172_s22 = smov 113   ;;  %s4174_s23 = smov 15  }
   0x2   :  { %320 = vperm.xlu1 %3951, %v4258_v2   ;;  %203 = vperm.xlu0 %3950, %v4258_v2   ;;  %38 = vst [vmem:[#allocation2] sm:$0xff] %v4164_v6  ;;  %40 = vst [vmem:[#allocation2 + $0x28] sm:$0xff] %v4164_v6  ;;  %v51_v7 = vand.u32 127, %v43_v3  ;;  %v4264_v8 = vshrl.u32 %v43_v3, 7  ;;  %vm45_vm0 = vcmp.lt.s32.totalorder %v43_v3, 512  ;;  %v4167_v35 = vmov 5  }
   0x3   :  { %1903 = vmatprep.mubr.f32.mxu0 %v4164_v6  ;;  %1980 = vmatprep.mubr.f32.mxu1 %v4164_v6  ;;  %v94_v9 = vunpack.c.0.s8 %v93_v5  ;;  %v42_v10 = vld [vmem:[%s6765_s0] sm:$0xf]  ;;  %v4168_v36 = vmov 6   ;;  %s4169_s0 = smov 127   ;;  %s4175_s24 = smov 16   ;;  %v4177_v1 = vmov 7  }
   0x4   :  { %v52_v11 = vadd.s32 128, %v51_v7  ;;  %v53_v12 = vadd.s32 256, %v51_v7  ;;  %v54_v13 = vadd.s32 384, %v51_v7  ;;  %v4271_v14 = vand.u32 15, %v51_v7  ;;  %s4176_s25 = smov 17   ;;  %s4178_s26 = smov 111  }
   0x5   :  { %48 = vst.msk [vmem:[#allocation2 + $0x8] ss:$8 sm:$0xf] %vm45_vm0, %v42_v10  ;;  %v4274_v17 = vsub.s32 %v94_v9, %v4264_v8  ;;  %v59_v18 = vshra.s32 %v51_v7, 4  ;;  %s4180_s27 = smov 110   ;;  %s4181_s28 = smov 95  }
   0x6   :  { %3953 = vset.pattern.permute.xlu1 %v4165_v15  ;;  %3952 = vset.pattern.permute.xlu0 %v4166_v16  ;;  %v4278_v19 = vand.u32 15, %v52_v11  ;;  %v4280_v20 = vand.u32 15, %v53_v12  ;;  %v4282_v21 = vand.u32 15, %v54_v13  ;;  %vm74_vm1 = vcmp.ge.s32.totalorder %v4271_v14, 1  ;;  %s4182_s29 = smov 126   ;;  %s4183_s30 = smov 96  }
   0x7   :  { %493 = vperm.xlu1 %3953, %v4258_v2   ;;  %428 = vperm.xlu0 %3952, %v4258_v2   ;;  %v387_v22 = vsel %vm74_vm1, 1.0, %v4164_v6  ;;  %v60_v23 = vshra.s32 %v52_v11, 4  ;;  %v61_v24 = vshra.s32 %v53_v12, 4  ;;  %v62_v25 = vshra.s32 %v54_v13, 4  ;;  %s4184_s12 = smov 94   ;;  %s4185_s13 = smov 34  }
   0x8   :  { %vm75_vm2 = vcmp.ge.s32.totalorder %v4278_v19, 1  ;;  %vm76_vm3 = vcmp.ge.s32.totalorder %v4280_v20, 1  ;;  %vm77_vm4 = vcmp.ge.s32.totalorder %v4282_v21, 1  ;;  %v4291_v26 = vand.u32 15, %v59_v18  ;;  %s4186_s14 = smov 32   ;;  %s4187_s15 = smov 30  }
   0x9   :  { %v388_v27 = vsel %vm75_vm2, 1.0, %v4164_v6  ;;  %v389_v28 = vsel %vm76_vm3, 1.0, %v4164_v6  ;;  %v390_v29 = vsel %vm77_vm4, 1.0, %v4164_v6  ;;  %v4302_v30 = vand.u32 15, %v60_v23  ;;  %s4188_s16 = smov 2  }
   0xa   :  { %v395_v31 = vcombine.low %v387_v22, %v388_v27  ;;  %v396_v32 = vcombine.low %v389_v28, %v390_v29  ;;  %v4304_v33 = vand.u32 15, %v61_v24  ;;  %v4306_v34 = vand.u32 15, %v62_v25 }
   0xb   :  { %3954 = vset.pattern.permute.xlu0 %v4167_v35  ;;  %3955 = vset.pattern.permute.xlu1 %v4168_v36  ;;  %vm70_vm5 = vcmp.ge.s32.totalorder %v4291_v26, 1  ;;  %vm71_vm6 = vcmp.ge.s32.totalorder %v4302_v30, 1  ;;  %vm270_vm7 = vcmp.lt.s32.totalorder %v4271_v14, 15  ;;  %vm271_vm8 = vcmp.lt.s32.totalorder %v4278_v19, 15 }
   0xc   :  { %v403_v37 = vrot.slane %v395_v31, %v4274_v17  ;;  %v410_v38 = vrot.slane %v396_v32, %v4274_v17  ;;  %vm72_vm9 = vcmp.ge.s32.totalorder %v4304_v33, 1  ;;  %vm73_vm10 = vcmp.ge.s32.totalorder %v4306_v34, 1  ;;  %vm4320_vm11 = vmand %vm70_vm5, %vm270_vm7 }
   0xd   :  { %v161_v40 = vsel %vm70_vm5, 1.0, %v4164_v6  ;;  %v162_v41 = vsel %vm71_vm6, 1.0, %v4164_v6  ;;  %v163_v42 = vsel %vm72_vm9, 1.0, %v4164_v6  ;;  %v164_v43 = vsel %vm73_vm10, 1.0, %v4164_v6  ;;  %vm4340_vm12 = vmand %vm71_vm6, %vm271_vm8 }
   0xe   :  { %v411_v45 = vcombine.low %v403_v37, %v410_v38  ;;  %v169_v46 = vcombine.low %v161_v40, %v162_v41  ;;  %v170_v47 = vcombine.low %v163_v42, %v164_v43  ;;  %vm6776_vm13 = vcmp.lt.s32.totalorder %v4280_v20, 15  ;;  %vm4349_vm14 = vmand %vm70_vm5, %vm74_vm1 }
   0xf   :  { %vm6777_vm15 = vcmp.lt.s32.totalorder %v4282_v21, 15  ;;  %v549_v49 = vsel %vm270_vm7, 1.0, %v4164_v6  ;;  %v550_v50 = vsel %vm271_vm8, 1.0, %v4164_v6  ;;  %v551_v51 = vsel %vm6776_vm13, 1.0, %v4164_v6  ;;  %vm276_vm0 = vmand %vm72_vm9, %vm6776_vm13 }
  0x10   :  { %v418_v52 = vrot.slane %v411_v45, %v4274_v17  ;;  %v177_v53 = vrot.slane %v169_v46, %v4274_v17  ;;  %v184_v54 = vrot.slane %v170_v47, %v4274_v17  ;;  %v552_v55 = vsel %vm6777_vm15, 1.0, %v4164_v6  ;;  %vm277_vm5 = vmand %vm73_vm10, %vm6777_vm15 }
  0x11   :  { %v557_v56 = vcombine.low %v549_v49, %v550_v50  ;;  %v558_v57 = vcombine.low %v551_v51, %v552_v55  ;;  %v278_v58 = vsel %vm4320_vm11, 1.0, %v4164_v6  ;;  %v279_v59 = vsel %vm4340_vm12, 1.0, %v4164_v6  ;;  %vm4387_vm13 = vmand %vm71_vm6, %vm75_vm2 }
  0x12   :  { %419 = vrot.lane.b32.xlu1 %v418_v52, %s4169_s0  ;;  %v185_v61 = vcombine.low %v177_v53, %v184_v54  ;;  %v280_v62 = vsel %vm276_vm0, 1.0, %v4164_v6  ;;  %v281_v63 = vsel %vm277_vm5, 1.0, %v4164_v6  ;;  %v286_v0 = vcombine.low %v278_v58, %v279_v59  ;;  %vm4398_vm11 = vmand %vm72_vm9, %vm76_vm3 }
  0x13   :  { %v565_v3 = vrot.slane %v557_v56, %v4274_v17  ;;  %v572_v4 = vrot.slane %v558_v57, %v4274_v17  ;;  %v287_v5 = vcombine.low %v280_v62, %v281_v63  ;;  %vm658_vm6 = vcmp.lt.s32.totalorder %v4291_v26, 15  ;;  %vm4409_vm12 = vmand %vm73_vm10, %vm77_vm4 }
  0x14   :  { %v192_v9 = vrot.slane %v185_v61, %v4274_v17  ;;  %v294_v10 = vrot.slane %v286_v0, %v4274_v17  ;;  %vm659_vm9 = vcmp.lt.s32.totalorder %v4302_v30, 15  ;;  %vm660_vm0 = vcmp.lt.s32.totalorder %v4304_v33, 15  ;;  %vm662_vm5 = vmand %vm658_vm6, %vm74_vm1 }
  0x15   :  { %v573_v11 = vcombine.low %v565_v3, %v572_v4  ;;  %v301_v12 = vrot.slane %v287_v5, %v4274_v17  ;;  %vm661_vm10 = vcmp.lt.s32.totalorder %v4306_v34, 15  ;;  %vm663_vm15 = vmand %vm659_vm9, %vm75_vm2  ;;  %v666_v13 = vsel %vm662_vm5, 1.0, %v4164_v6 }
  0x16   :  { %193 = vrot.lane.b32.xlu0 %v192_v9, %s4170_s20  ;;  %vm664_vm1 = vmand %vm660_vm0, %vm76_vm3  ;;  %v667_v15 = vsel %vm663_vm15, 1.0, %v4164_v6  ;;  %v775_v16 = vsel %vm658_vm6, 1.0, %v4164_v6  ;;  %v776_v18 = vsel %vm659_vm9, 1.0, %v4164_v6  ;;  %v777_v22 = vsel %vm660_vm0, 1.0, %v4164_v6 }
  0x17   :  { %v580_v23 = vrot.slane %v573_v11, %v4274_v17  ;;  %v302_v24 = vcombine.low %v294_v10, %v301_v12  ;;  %vm665_vm2 = vmand %vm661_vm10, %vm77_vm4  ;;  %v668_v25 = vsel %vm664_vm1, 1.0, %v4164_v6  ;;  %v674_v27 = vcombine.low %v666_v13, %v667_v15 }
  0x18   :  { %v669_v28 = vsel %vm665_vm2, 1.0, %v4164_v6  ;;  %v778_v29 = vsel %vm661_vm10, 1.0, %v4164_v6  ;;  %v783_v31 = vcombine.low %v775_v16, %v776_v18  ;;  %vm884_vm3 = vmand %vm658_vm6, %vm270_vm7  ;;  %v82_v32 = vsel %vm4349_vm14, 1.0, %v4164_v6  ;;  %v384_v18 = vld [vmem:[#allocation2] ss:$8 sm:$0xf] }
  0x19   :  { %581 = vrot.lane.b32.xlu1 %v580_v23, %s4171_s21  ;;  %v309_v35 = vrot.slane %v302_v24, %v4274_v17  ;;  %v675_v36 = vcombine.low %v668_v25, %v669_v28  ;;  %v682_v37 = vrot.slane %v674_v27, %v4274_v17  ;;  %v784_v38 = vcombine.low %v777_v22, %v778_v29  ;;  %vm885_vm4 = vmand %vm659_vm9, %vm271_vm8  ;;  %v385_v22 = vld [vmem:[#allocation2] ss:$8 sm:$0x10] }
  0x1a   :  { %591 = vperm.xlu0 %3954, %v4258_v2   ;;  %v791_v39 = vrot.slane %v783_v31, %v4274_v17  ;;  %vm6827_vm7 = vcmp.lt.s32.totalorder %v4280_v20, 15  ;;  %v888_v40 = vsel %vm884_vm3, 1.0, %v4164_v6  ;;  %v889_v41 = vsel %vm885_vm4, 1.0, %v4164_v6 }
  0x1b   :  { %vm886_vm14 = vmand %vm660_vm0, %vm6827_vm7  ;;  %v83_v42 = vsel %vm4387_vm13, 1.0, %v4164_v6  ;;  %v689_v43 = vrot.slane %v675_v36, %v4274_v17  ;;  %v798_v44 = vrot.slane %v784_v38, %v4274_v17  ;;  %vm6828_vm8 = vcmp.lt.s32.totalorder %v4282_v21, 15  ;;  %v547_v36 = vld [vmem:[#allocation2 + $0x8] ss:$8 sm:$0x10] }
  0x1c   :  { %vm887_vm15 = vmand %vm661_vm10, %vm6828_vm8  ;;  %v890_v45 = vsel %vm886_vm14, 1.0, %v4164_v6  ;;  %v896_v46 = vcombine.low %v888_v40, %v889_v41  ;;  %v84_v48 = vsel %vm4398_vm11, 1.0, %v4164_v6  ;;  %v85_v49 = vsel %vm4409_vm12, 1.0, %v4164_v6 }
  0x1d   :  { %v891_v47 = vsel %vm887_vm15, 1.0, %v4164_v6  ;;  %v90_v50 = vcombine.low %v82_v32, %v83_v42  ;;  %310 = vrot.lane.b32.xlu1 %v309_v35, %s4172_s22  ;;  %v690_v51 = vcombine.low %v682_v37, %v689_v43  ;;  %v799_v52 = vcombine.low %v791_v39, %v798_v44  ;;  %v546_v37 = vld [vmem:[#allocation2 + $0x8] ss:$8 sm:$0xf]  ;;  %s4191_s22 = smov 60  }
  0x1e   :  { %v897_v53 = vcombine.low %v890_v45, %v891_v47  ;;  %v904_v54 = vrot.slane %v896_v46, %v4274_v17  ;;  %v91_v55 = vcombine.low %v84_v48, %v85_v49  ;;  %v4173_v57 = vmov 0  }
  0x1f   :  { %v98_v56 = vrot.slane %v90_v50, %v4274_v17  ;;  %4064 = vset.pattern.permute.xlu0 %v4173_v57  ;;  %v697_v58 = vrot.slane %v690_v51, %v4274_v17  ;;  %v806_v59 = vrot.slane %v799_v52, %v4274_v17  ;;  %v4179_v3 = vmov 8   ;;  %v158_v50 = vld [vmem:[#allocation2] ss:$8 sm:$0xf] }
  0x20   :  { %v911_v60 = vrot.slane %v897_v53, %v4274_v17  ;;  %v105_v6 = vrot.slane %v91_v55, %v4274_v17  ;;  %v4506_v4 = vsub.s32 1, %v4264_v8  ;;  %v4509_v5 = vsub.s32 0, %v4264_v8  ;;  %v159_v52 = vld [vmem:[#allocation2] ss:$8 sm:$0x10] }
  0x21   :  { %698 = vrot.lane.b32.xlu1 %v697_v58, %s4174_s23  ;;  %807 = vrot.lane.b32.xlu0 %v806_v59, %s4175_s24  ;;  %v4516_v11 = vsub.s32 3, %v4264_v8  ;;  %v4519_v12 = vsub.s32 2, %v4264_v8  ;;  %vm252_vm13 = vcmask 1039360   ;;  %v386_v27 = vor.u32 %v385_v22, %v384_v18  ;;  %s4192_s23 = smov 4   ;;  %s4193_s24 = smov 124  }
  0x22   :  { %v912_v61 = vcombine.low %v904_v54, %v911_v60  ;;  %v106_v62 = vcombine.low %v98_v56, %v105_v6  ;;  %vm584_vm11 = vcmask 7168   ;;  %v548_v40 = vor.u32 %v547_v36, %v546_v37 }
  0x23   :  { %v4533_v45 = vsub.s32 4, %v4264_v8  ;;  %vm196_vm6 = vcmask 916480   ;;  %vm6778_vm12 = vcmask 130048   ;;  %vm313_vm9 = vcmask 924672  }
  0x24   :  { %v919_v63 = vrot.slane %v912_v61, %v4274_v17  ;;  %v113_v0 = vrot.slane %v106_v62, %v4274_v17  ;;  %v491_v17 = vld [vmem:[#allocation2 + $0x8] ss:$8 sm:$0xf]  ;;  %vm701_vm0 = vcmask 121856   ;;  %vm6781_vm5 = vcmask 138240  }
  0x25   :  { %708 = vperm.xlu1 %3955, %v4258_v2   ;;  %v504_v9 = vrot.slane %v491_v17, %v4506_v4  ;;  %v500_v10 = vrot.slane %v491_v17, %v4509_v5  ;;  %v512_v23 = vrot.slane %v491_v17, %v4516_v11  ;;  %v508_v24 = vrot.slane %v491_v17, %v4519_v12 }
  0x26   :  { %920 = vrot.lane.b32.xlu0 %v919_v63, %s4176_s25  ;;  %vm6782_vm10 = vcmask 908288   ;;  %vm6780_vm1 = vcmask 1031168   ;;  %vm6785_vm2 = vcmask 900096   ;;  %vm6779_vm3 = vcmask 785408  }
  0x27   :  { %vm6784_vm4 = vcmask 777216   ;;  %vm6783_vm7 = vcmask 769024  }
  0x29   :  { %3956 = vset.pattern.permute.xlu1 %v4177_v1  ;;  %v773_v1 = vld [vmem:[#allocation2 + $0x8] ss:$8 sm:$0x10] }
  0x2a   :  { %114 = vrot.lane.b32.xlu0 %v113_v0, %s4178_s26  ;;  %817 = vperm.xlu1 %3956, %v4258_v2  }
  0x2e   :  { %3957 = vset.pattern.permute.xlu1 %v4179_v3  ;;  %v772_v3 = vld [vmem:[#allocation2 + $0x8] ss:$8 sm:$0xf] }
  0x2f   :  { %930 = vperm.xlu1 %3957, %v4258_v2   ;;  %v774_v18 = vor.u32 %v773_v1, %v772_v3 }
  0x33   :  { %3958 = vset.pattern.permute.xlu1 %v4173_v57  ;;  %v160_v57 = vor.u32 %v159_v52, %v158_v50  ;;  %v655_v52 = vld [vmem:[#allocation2 + $0x8] ss:$8 sm:$0xf] }
  0x34   :  { %124 = vperm.xlu1 %3958, %v4258_v2  }
  0x7d   :  { %v4511_v7 = vpop.permute.xlu1 %320  ;;  %v4521_v2 = vpop.permute.xlu0 %203 }
  0x82   :  { %v494_v13 = vpop.permute.xlu1 %493  ;;  %v429_v28 = vpop.permute.xlu0 %428 }
  0x83   :  { %v518_v15 = vmul.f32 %v504_v9, %v494_v13  ;;  %v517_v16 = vmul.f32 %v500_v10, %v494_v13  ;;  %v520_v31 = vmul.f32 %v512_v23, %v494_v13  ;;  %v519_v32 = vmul.f32 %v508_v24, %v494_v13  ;;  %v268_v24 = vld [vmem:[#allocation2] ss:$8 sm:$0x10] }
  0x85   :  { %527 = vrot.lane.b32.xlu0 %v518_v15, %s4178_s26  ;;  %525 = vrot.lane.b32.xlu1 %v517_v16, %s4178_s26  ;;  %v267_v15 = vld [vmem:[#allocation2] ss:$8 sm:$0xf] }
  0x86   :  { %v420_v25 = vpop.permute.xlu1 %419 }
  0x87   :  { %v421_v29 = vrot.slane %v420_v25, 7 }
  0x88   :  { %v194_v43 = vpop.permute.xlu0 %193 }
  0x89   :  { %v422_v35 = vsel %vm252_vm13, %v421_v29, %v420_v25  ;;  %531 = vrot.lane.b32.xlu0 %v520_v31, %s4178_s26  ;;  %529 = vrot.lane.b32.xlu1 %v519_v32, %s4178_s26  ;;  %v195_v53 = vrot.slane %v194_v43, 7  ;;  %v269_v32 = vor.u32 %v268_v24, %v267_v15 }
  0x8a   :  { %v424_v38 = vmul.f32 %v422_v35, %v386_v27 }
  0x8b   :  { %v582_v39 = vpop.permute.xlu1 %581  ;;  %v197_v59 = vsel %vm196_vm6, %v195_v53, %v194_v43 }
  0x8c   :  { %v439_v41 = vrot.slane %v424_v38, %v4506_v4  ;;  %v435_v42 = vrot.slane %v424_v38, %v4509_v5  ;;  %v583_v44 = vrot.slane %v582_v39, 7  ;;  %v447_v48 = vrot.slane %v424_v38, %v4516_v11 }
  0x8d   :  { %v443_v49 = vrot.slane %v424_v38, %v4519_v12  ;;  %v451_v8 = vrot.slane %v424_v38, %v4533_v45  ;;  %v4545_v62 = vmul.f32 %v197_v59, %v160_v57 }
  0x8e   :  { %v458_v46 = vmul.f32 %v439_v41, %v429_v28  ;;  %v457_v47 = vmul.f32 %v435_v42, %v429_v28  ;;  %v585_v51 = vsel %vm584_vm11, %v583_v44, %v582_v39  ;;  %v460_v55 = vmul.f32 %v447_v48, %v429_v28 }
  0x8f   :  { %v587_v54 = vmul.f32 %v585_v51, %v548_v40  ;;  %v459_v56 = vmul.f32 %v443_v49, %v429_v28  ;;  %v461_v6 = vmul.f32 %v451_v8, %v429_v28  ;;  %v311_v17 = vpop.permute.xlu1 %310  ;;  %v214_v23 = vrot.slane %v4545_v62, %v4506_v4  ;;  %v656_v49 = vld [vmem:[#allocation2 + $0x8] ss:$8 sm:$0x10] }
  0x90   :  { %469 = vrot.lane.b32.xlu1 %v458_v46, %s4170_s20  ;;  %467 = vrot.lane.b32.xlu0 %v457_v47, %s4170_s20  ;;  %v312_v25 = vrot.slane %v311_v17, 7  ;;  %v222_v37 = vrot.slane %v4545_v62, %v4516_v11  ;;  %v210_v41 = vrot.slane %v4545_v62, %v4509_v5  ;;  %v218_v48 = vrot.slane %v4545_v62, %v4519_v12 }
  0x91   :  { %v598_v58 = vrot.slane %v587_v54, %v4509_v5  ;;  %v602_v61 = vrot.slane %v587_v54, %v4506_v4  ;;  %v606_v0 = vrot.slane %v587_v54, %v4519_v12  ;;  %v610_v13 = vrot.slane %v587_v54, %v4516_v11 }
  0x92   :  { %v614_v31 = vrot.slane %v587_v54, %v4533_v45  ;;  %v233_v36 = vmul.f32 %v214_v23, %v4521_v2  ;;  %v314_v38 = vsel %vm313_vm9, %v312_v25, %v311_v17  ;;  %v235_v43 = vmul.f32 %v222_v37, %v4521_v2  ;;  %v882_v17 = vld [vmem:[#allocation2 + $0x8] ss:$8 sm:$0x10] }
  0x93   :  { %v699_v28 = vpop.permute.xlu1 %698  ;;  %v4568_v42 = vmul.f32 %v314_v38, %v269_v32  ;;  %v232_v47 = vmul.f32 %v210_v41, %v4521_v2  ;;  %v234_v54 = vmul.f32 %v218_v48, %v4521_v2  ;;  %vm1404_vm9 = vcmp.lt.s32.totalorder %v4280_v20, 14 }
  0x94   :  { %473 = vrot.lane.b32.xlu1 %v460_v55, %s4170_s20  ;;  %471 = vrot.lane.b32.xlu0 %v459_v56, %s4170_s20  ;;  %v700_v53 = vrot.slane %v699_v28, 7  ;;  %v226_v55 = vrot.slane %v4545_v62, %v4533_v45  ;;  %v657_v56 = vor.u32 %v656_v49, %v655_v52 }
  0x95   :  { %v592_v60 = vpop.permute.xlu0 %591  ;;  %v327_v51 = vrot.slane %v4568_v42, %v4509_v5  ;;  %v335_v57 = vrot.slane %v4568_v42, %v4519_v12  ;;  %v343_v62 = vrot.slane %v4568_v42, %v4533_v45  ;;  %v331_v25 = vrot.slane %v4568_v42, %v4506_v4 }
  0x96   :  { %v620_v63 = vmul.f32 %v598_v58, %v592_v60  ;;  %v621_v9 = vmul.f32 %v602_v61, %v592_v60  ;;  %v622_v16 = vmul.f32 %v606_v0, %v592_v60  ;;  %v623_v29 = vmul.f32 %v610_v13, %v592_v60  ;;  %v881_v13 = vld [vmem:[#allocation2 + $0x8] ss:$8 sm:$0xf] }
  0x97   :  { %v624_v40 = vmul.f32 %v614_v31, %v592_v60  ;;  %v349_v8 = vmul.f32 %v327_v51, %v4511_v7  ;;  %v702_v58 = vsel %vm701_vm0, %v700_v53, %v699_v28  ;;  %v236_v59 = vmul.f32 %v226_v55, %v4521_v2 }
  0x98   :  { %475 = vrot.lane.b32.xlu0 %v461_v6, %s4170_s20  ;;  %630 = vrot.lane.b32.xlu1 %v620_v63, %s4180_s27  ;;  %v704_v6 = vmul.f32 %v702_v58, %v657_v56  ;;  %v351_v61 = vmul.f32 %v335_v57, %v4511_v7  ;;  %v353_v2 = vmul.f32 %v343_v62, %v4511_v7  ;;  %vm1606_vm0 = vcmp.lt.s32.totalorder %v4304_v33, 14 }
  0x99   :  { %v808_v10 = vpop.permute.xlu0 %807  ;;  %v350_v31 = vmul.f32 %v331_v25, %v4511_v7  ;;  %v339_v32 = vrot.slane %v4568_v42, %v4516_v11 }
  0x9a   :  { %v809_v22 = vrot.slane %v808_v10, 7  ;;  %v715_v1 = vrot.slane %v704_v6, %v4509_v5  ;;  %v727_v28 = vrot.slane %v704_v6, %v4516_v11  ;;  %v731_v37 = vrot.slane %v704_v6, %v4533_v45 }
  0x9b   :  { %v719_v48 = vrot.slane %v704_v6, %v4506_v4 }
  0x9c   :  { %632 = vrot.lane.b32.xlu0 %v621_v9, %s4180_s27  ;;  %634 = vrot.lane.b32.xlu1 %v622_v16, %s4180_s27  ;;  %v811_v27 = vsel %vm6778_vm12, %v809_v22, %v808_v10  ;;  %v883_v22 = vor.u32 %v882_v17, %v881_v13  ;;  %vm1405_vm12 = vcmp.lt.s32.totalorder %v4282_v21, 14 }
  0x9d   :  { %v4557_v35 = vmul.f32 %v811_v27, %v774_v18  ;;  %v921_v3 = vpop.permute.xlu0 %920  ;;  %v723_v18 = vrot.slane %v704_v6, %v4519_v12 }
  0x9e   :  { %v922_v15 = vrot.slane %v921_v3, 7 }
  0x9f   :  { %v828_v44 = vrot.slane %v4557_v35, %v4506_v4  ;;  %v824_v60 = vrot.slane %v4557_v35, %v4509_v5  ;;  %v832_v0 = vrot.slane %v4557_v35, %v4519_v12  ;;  %v836_v10 = vrot.slane %v4557_v35, %v4516_v11 }
  0xa0   :  { %636 = vrot.lane.b32.xlu0 %v623_v29, %s4180_s27  ;;  %244 = vrot.lane.b32.xlu1 %v233_v36, %s4169_s0  ;;  %v4564_v39 = vpop.permute.xlu1 %708  ;;  %v924_v24 = vsel %vm6781_vm5, %v922_v15, %v921_v3 }
  0xa1   :  { %v737_v16 = vmul.f32 %v715_v1, %v4564_v39  ;;  %v739_v27 = vmul.f32 %v723_v18, %v4564_v39  ;;  %v926_v29 = vmul.f32 %v924_v24, %v883_v22  ;;  %v740_v36 = vmul.f32 %v727_v28, %v4564_v39  ;;  %v67_v18 = vld [vmem:[#allocation2] ss:$8 sm:$0xf] }
  0xa2   :  { %v68_v22 = vld [vmem:[#allocation2] ss:$8 sm:$0x10] }
  0xa3   :  { %v937_v38 = vrot.slane %v926_v29, %v4509_v5  ;;  %v945_v49 = vrot.slane %v926_v29, %v4519_v12  ;;  %v949_v51 = vrot.slane %v926_v29, %v4516_v11  ;;  %v953_v52 = vrot.slane %v926_v29, %v4533_v45 }
  0xa4   :  { %638 = vrot.lane.b32.xlu0 %v624_v40, %s4180_s27  ;;  %248 = vrot.lane.b32.xlu1 %v235_v43, %s4169_s0  ;;  %v352_v40 = vmul.f32 %v339_v32, %v4511_v7  ;;  %v840_v43 = vrot.slane %v4557_v35, %v4533_v45  ;;  %v738_v7 = vmul.f32 %v719_v48, %v4564_v39 }
  0xa5   :  { %v4575_v46 = vpop.permute.xlu1 %817  ;;  %v941_v35 = vrot.slane %v926_v29, %v4506_v4 }
  0xa6   :  { %v847_v50 = vmul.f32 %v828_v44, %v4575_v46  ;;  %v846_v63 = vmul.f32 %v824_v60, %v4575_v46  ;;  %v848_v9 = vmul.f32 %v832_v0, %v4575_v46  ;;  %v849_v23 = vmul.f32 %v836_v10, %v4575_v46 }
  0xa7   :  { %v741_v44 = vmul.f32 %v731_v37, %v4564_v39  ;;  %v115_v39 = vpop.permute.xlu0 %114 }
  0xa8   :  { %242 = vrot.lane.b32.xlu0 %v232_v47, %s4169_s0  ;;  %858 = vrot.lane.b32.xlu1 %v847_v50, %s4181_s28  ;;  %v850_v47 = vmul.f32 %v840_v43, %v4575_v46 }
  0xaa   :  { %v931_v41 = vpop.permute.xlu1 %930 }
  0xab   :  { %v959_v42 = vmul.f32 %v937_v38, %v931_v41  ;;  %v961_v50 = vmul.f32 %v945_v49, %v931_v41  ;;  %v960_v46 = vmul.f32 %v941_v35, %v931_v41  ;;  %v962_v53 = vmul.f32 %v949_v51, %v931_v41 }
  0xac   :  { %246 = vrot.lane.b32.xlu0 %v234_v54, %s4169_s0  ;;  %359 = vrot.lane.b32.xlu1 %v349_v8, %s4182_s29  ;;  %v963_v54 = vmul.f32 %v953_v52, %v931_v41 }
  0xaf   :  { %v125_v55 = vpop.permute.xlu1 %124 }
  0xb0   :  { %250 = vrot.lane.b32.xlu0 %v236_v59, %s4169_s0  ;;  %363 = vrot.lane.b32.xlu1 %v351_v61, %s4182_s29 }
  0xb4   :  { %856 = vrot.lane.b32.xlu0 %v846_v63, %s4181_s28  ;;  %367 = vrot.lane.b32.xlu1 %v353_v2, %s4182_s29 }
  0xb8   :  { %860 = vrot.lane.b32.xlu0 %v848_v9, %s4181_s28  ;;  %747 = vrot.lane.b32.xlu1 %v737_v16, %s4183_s30 }
  0xbc   :  { %862 = vrot.lane.b32.xlu0 %v849_v23, %s4181_s28  ;;  %751 = vrot.lane.b32.xlu1 %v739_v27, %s4183_s30  ;;  %v116_v23 = vrot.slane %v115_v39, 7  ;;  %v69_v27 = vor.u32 %v68_v22, %v67_v18 }
  0xbe   :  { %v118_v28 = vsel %vm6782_vm10, %v116_v23, %v115_v39 }
  0xbf   :  { %v120_v32 = vmul.f32 %v118_v28, %v69_v27 }
  0xc0   :  { %361 = vrot.lane.b32.xlu0 %v350_v31, %s4182_s29  ;;  %753 = vrot.lane.b32.xlu1 %v740_v36, %s4183_s30 }
  0xc1   :  { %v131_v38 = vrot.slane %v120_v32, %v4509_v5  ;;  %v135_v41 = vrot.slane %v120_v32, %v4506_v4  ;;  %v139_v48 = vrot.slane %v120_v32, %v4519_v12  ;;  %v143_v49 = vrot.slane %v120_v32, %v4516_v11 }
  0xc3   :  { %v156_v39 = vmul.f32 %v143_v49, %v125_v55 }
  0xc4   :  { %365 = vrot.lane.b32.xlu0 %v352_v40, %s4182_s29  ;;  %755 = vrot.lane.b32.xlu1 %v741_v44, %s4183_s30  ;;  %v147_v40 = vrot.slane %v120_v32, %v4533_v45 }
  0xc6   :  { %v157_v35 = vmul.f32 %v147_v40, %v125_v55 }
  0xc8   :  { %864 = vrot.lane.b32.xlu0 %v850_v47, %s4181_s28  ;;  %969 = vrot.lane.b32.xlu1 %v959_v42, %s4184_s12  ;;  %v153_v47 = vmul.f32 %v131_v38, %v125_v55 }
  0xcc   :  { %749 = vrot.lane.b32.xlu0 %v738_v7, %s4183_s30  ;;  %973 = vrot.lane.b32.xlu1 %v961_v50, %s4184_s12  ;;  %v154_v50 = vmul.f32 %v135_v41, %v125_v55 }
  0xd0   :  { %971 = vrot.lane.b32.xlu0 %v960_v46, %s4184_s12  ;;  %975 = vrot.lane.b32.xlu1 %v962_v53, %s4184_s12 }
  0xd4   :  { %977 = vrot.lane.b32.xlu0 %v963_v54, %s4184_s12  ;;  %v155_v54 = vmul.f32 %v139_v48, %v125_v55 }
  0xf7   :  { %v4651_v56 = vpop.permute.xlu0 %527  ;;  %v4653_v8 = vpop.permute.xlu1 %525 }
  0xfb   :  { %v4655_v57 = vpop.permute.xlu0 %531  ;;  %v4657_v58 = vpop.permute.xlu1 %529 }
 0x102   :  { %v4659_v59 = vpop.permute.xlu1 %469  ;;  %v468_v60 = vpop.permute.xlu0 %467 }
 0x106   :  { %v4661_v6 = vpop.permute.xlu1 %473  ;;  %v4663_v61 = vpop.permute.xlu0 %471 }
 0x107   :  { %v479_v40 = vsel %vm196_vm6, %v4663_v61, %v4661_v6 }
 0x10a   :  { %v4665_v62 = vpop.permute.xlu0 %475  ;;  %v4667_v63 = vpop.permute.xlu1 %630 }
 0x10b   :  { %v480_v41 = vsel %vm196_vm6, %v4661_v6, %v4665_v62 }
 0x10e   :  { %v4669_v0 = vpop.permute.xlu0 %632  ;;  %v4671_v2 = vpop.permute.xlu1 %634 }
 0x112   :  { %v4673_v1 = vpop.permute.xlu0 %636  ;;  %v245_v3 = vpop.permute.xlu1 %244 }
 0x116   :  { %v4675_v17 = vpop.permute.xlu0 %638  ;;  %v249_v9 = vpop.permute.xlu1 %248 }
 0x11a   :  { %v243_v10 = vpop.permute.xlu0 %242  ;;  %v4677_v13 = vpop.permute.xlu1 %858 }
 0x11b   :  { %v253_v44 = vsel %vm252_vm13, %v243_v10, %v245_v3 }
 0x11c   :  { %v262_v5 = vadd.f32 %v253_v44, %v153_v47 }
 0x11e   :  { %v247_v15 = vpop.permute.xlu0 %246  ;;  %v360_v16 = vpop.permute.xlu1 %359 }
 0x11f   :  { %v254_v7 = vsel %vm252_vm13, %v245_v3, %v247_v15  ;;  %v255_v45 = vsel %vm252_vm13, %v247_v15, %v249_v9  ;;  %v477_v3 = vsel %vm196_vm6, %v468_v60, %v4659_v59  ;;  %v478_v60 = vsel %vm196_vm6, %v4659_v59, %v4663_v61 }
 0x120   :  { %v263_v11 = vadd.f32 %v254_v7, %v154_v50  ;;  %v264_v22 = vadd.f32 %v255_v45, %v155_v54  ;;  %v534_v59 = vsel %vm6782_vm10, %v4651_v56, %v4657_v58  ;;  %v535_v61 = vsel %vm6782_vm10, %v4657_v58, %v4655_v57 }
 0x121   :  { %v642_v50 = vsel %vm6785_vm2, %v4669_v0, %v4671_v2 }
 0x122   :  { %v251_v24 = vpop.permute.xlu0 %250  ;;  %v364_v25 = vpop.permute.xlu1 %363 }
 0x123   :  { %v256_v51 = vsel %vm252_vm13, %v249_v9, %v251_v24  ;;  %v266_v46 = vadd.f32 %v251_v24, %v157_v35 }
 0x124   :  { %v265_v15 = vadd.f32 %v256_v51, %v156_v39  ;;  %v644_v39 = vsel %vm6785_vm2, %v4673_v1, %v4675_v17 }
 0x126   :  { %v4680_v29 = vpop.permute.xlu0 %856  ;;  %v368_v31 = vpop.permute.xlu1 %367 }
 0x127   :  { %v383_v18 = vadd.f32 %v368_v31, %v266_v46 }
 0x12a   :  { %v4682_v36 = vpop.permute.xlu0 %860  ;;  %v4684_v37 = vpop.permute.xlu1 %747 }
 0x12e   :  { %v4689_v43 = vpop.permute.xlu0 %862  ;;  %v4692_v42 = vpop.permute.xlu1 %751 }
 0x132   :  { %v362_v4 = vpop.permute.xlu0 %361  ;;  %v4699_v52 = vpop.permute.xlu1 %753 }
 0x133   :  { %v370_v53 = vsel %vm6780_vm1, %v360_v16, %v362_v4  ;;  %v371_v12 = vsel %vm6780_vm1, %v362_v4, %v364_v25 }
 0x134   :  { %v379_v10 = vadd.f32 %v370_v53, %v262_v5  ;;  %v380_v23 = vadd.f32 %v371_v12, %v263_v11  ;;  %v643_v53 = vsel %vm6785_vm2, %v4671_v2, %v4673_v1  ;;  %v868_v2 = vsel %vm6784_vm4, %v4677_v13, %v4682_v36 }
 0x135   :  { %v760_v1 = vsel %vm6779_vm3, %v4692_v42, %v4699_v52 }
 0x136   :  { %v486_v27 = vadd.f32 %v477_v3, %v379_v10  ;;  %v366_v9 = vpop.permute.xlu0 %365  ;;  %v756_v24 = vpop.permute.xlu1 %755 }
 0x137   :  { %v372_v28 = vsel %vm6780_vm1, %v364_v25, %v366_v9  ;;  %v373_v16 = vsel %vm6780_vm1, %v366_v9, %v368_v31  ;;  %v490_v25 = vadd.f32 %v4665_v62, %v383_v18  ;;  %v487_v31 = vadd.f32 %v478_v60, %v380_v23 }
 0x138   :  { %v541_v32 = vadd.f32 %v4653_v8, %v486_v27  ;;  %v381_v38 = vadd.f32 %v372_v28, %v264_v22  ;;  %v382_v55 = vadd.f32 %v373_v16, %v265_v15  ;;  %v533_v62 = vsel %vm6782_vm10, %v4653_v8, %v4651_v56 }
 0x139   :  { %v545_v45 = vadd.f32 %v4655_v57, %v490_v25  ;;  %v542_v58 = vadd.f32 %v533_v62, %v487_v31  ;;  %v641_v8 = vsel %vm6785_vm2, %v4667_v63, %v4669_v0  ;;  %v761_v10 = vsel %vm6779_vm3, %v4699_v52, %v756_v24 }
 0x13a   :  { %v488_v44 = vadd.f32 %v479_v40, %v381_v38  ;;  %v489_v47 = vadd.f32 %v480_v41, %v382_v55  ;;  %v650_v48 = vadd.f32 %v4667_v63, %v541_v32  ;;  %v865_v49 = vpop.permute.xlu0 %864  ;;  %v970_v7 = vpop.permute.xlu1 %969  ;;  %v869_v52 = vsel %vm6784_vm4, %v4682_v36, %v4689_v43 }
 0x13b   :  { %v654_v63 = vadd.f32 %v644_v39, %v545_v45  ;;  %v651_v0 = vadd.f32 %v641_v8, %v542_v58  ;;  %v870_v17 = vsel %vm6784_vm4, %v4689_v43, %v865_v49  ;;  %vm1402_vm1 = vcmp.lt.s32.totalorder %v4271_v14, 14 }
 0x13c   :  { %v544_v35 = vadd.f32 %v535_v61, %v489_v47  ;;  %v767_v6 = vadd.f32 %v4684_v37, %v650_v48  ;;  %v543_v5 = vadd.f32 %v534_v59, %v488_v44  ;;  %vm1403_vm10 = vcmp.lt.s32.totalorder %v4278_v19, 14 }
 0x13d   :  { %v771_v23 = vadd.f32 %v761_v10, %v654_v63  ;;  %v4810_v10 = vld [vmem:[#allocation2] sm:$0xff]  ;;  %v1186_v63 = vand.u32 1, %v4302_v30  ;;  %vm1271_vm2 = vcmp.ge.s32.totalorder %v4278_v19, 2 }
 0x13e   :  { %v876_v4 = vadd.f32 %v4680_v29, %v767_v6  ;;  %v750_v51 = vpop.permute.xlu0 %749  ;;  %v652_v46 = vadd.f32 %v642_v50, %v543_v5  ;;  %v974_v57 = vpop.permute.xlu1 %973  ;;  %v653_v11 = vadd.f32 %v643_v53, %v544_v35 }
 0x13f   :  { %v759_v56 = vsel %vm6779_vm3, %v750_v51, %v4692_v42  ;;  %v758_v3 = vsel %vm6779_vm3, %v4684_v37, %v750_v51  ;;  %v880_v24 = vadd.f32 %v870_v17, %v771_v23  ;;  %v867_v42 = vsel %vm6784_vm4, %v4680_v29, %v4677_v13  ;;  %vm1736_vm3 = vmand %vm1606_vm0, %vm1404_vm9 }
 0x140   :  { %v4742_v12 = vadd.f32 %v970_v7, %v876_v4  ;;  %v769_v54 = vadd.f32 %v759_v56, %v652_v46  ;;  %v768_v27 = vadd.f32 %v758_v3, %v651_v0  ;;  %v770_v37 = vadd.f32 %v760_v1, %v653_v11 }
 0x141   :  { %v1185_v3 = vand.u32 1, %v4291_v26  ;;  %v1193_v0 = vand.u32 1, %v4271_v14  ;;  %vm1190_vm8 = vcmp.eq.s32.totalorder %v1186_v63, 0  ;;  %vm1270_vm4 = vcmp.ge.s32.totalorder %v4271_v14, 2 }
 0x142   :  { %v972_v18 = vpop.permute.xlu0 %971  ;;  %999 = vrot.lane.b32.xlu1 %v4742_v12, %s4176_s25  ;;  %v878_v22 = vadd.f32 %v868_v2, %v769_v54  ;;  %v976_v28 = vpop.permute.xlu1 %975  ;;  %v1023_v55 = vmul.f32 %v4742_v12, %v4742_v12  ;;  %v877_v60 = vadd.f32 %v867_v42, %v768_v27  ;;  %v879_v40 = vadd.f32 %v869_v52, %v770_v37 }
 0x143   :  { %v981_v15 = vsel %vm6783_vm7, %v972_v18, %v974_v57  ;;  %v982_v41 = vsel %vm6783_vm7, %v974_v57, %v976_v28  ;;  %v980_v25 = vsel %vm6783_vm7, %v970_v7, %v972_v18  ;;  %v1194_v18 = vand.u32 1, %v4278_v19 }
 0x144   :  { %v4762_v9 = vadd.f32 %v981_v15, %v878_v22  ;;  %v4782_v13 = vadd.f32 %v980_v25, %v877_v60  ;;  %v4786_v36 = vadd.f32 %v982_v41, %v879_v40  ;;  %vm1189_vm14 = vcmp.eq.s32.totalorder %v1185_v3, 0 }
 0x145   :  { %vm1197_vm15 = vcmp.eq.s32.totalorder %v1193_v0, 0  ;;  %vm1198_vm13 = vcmp.eq.s32.totalorder %v1194_v18, 0  ;;  %v1740_v15 = vsel %vm1736_vm3, 1.0, %v4810_v10  ;;  %v1675_v37 = vsel %vm1606_vm0, 1.0, %v4810_v10 }
 0x146   :  { %v978_v16 = vpop.permute.xlu0 %977  ;;  %1003 = vrot.lane.b32.xlu1 %v4762_v9, %s4176_s25  ;;  %v1025_v29 = vmul.f32 %v4762_v9, %v4762_v9  ;;  %v1026_v43 = vmul.f32 %v4786_v36, %v4786_v36  ;;  %v1024_v31 = vmul.f32 %v4782_v13, %v4782_v13  ;;  %vm1201_vm11 = vmand %vm1189_vm14, %vm1197_vm15  ;;  %vm1607_vm14 = vcmp.lt.s32.totalorder %v4306_v34, 14 }
 0x147   :  { %v983_v32 = vsel %vm6783_vm7, %v976_v28, %v978_v16  ;;  %vm1202_vm6 = vmand %vm1190_vm8, %vm1198_vm13  ;;  %v1205_v22 = vsel %vm1201_vm11, 1.0, %v4810_v10  ;;  %vm1272_vm15 = vcmp.ge.s32.totalorder %v4280_v20, 2  ;;  %vm1273_vm13 = vcmp.ge.s32.totalorder %v4282_v21, 2 }
 0x148   :  { %v4773_v38 = vadd.f32 %v983_v32, %v880_v24  ;;  %v1206_v1 = vsel %vm1202_vm6, 1.0, %v4810_v10  ;;  %vm1737_vm8 = vmand %vm1607_vm14, %vm1405_vm12  ;;  %v1676_v24 = vsel %vm1607_vm14, 1.0, %v4810_v10  ;;  %v1545_v32 = vsel %vm1404_vm9, 1.0, %v4810_v10 }
 0x149   :  { %v3959_v17 = vpack.i.bf16 %v1206_v1, %v1205_v22  ;;  %v1741_v23 = vsel %vm1737_vm8, 1.0, %v4810_v10  ;;  %vm1610_vm3 = vmand %vm1606_vm0, %vm1272_vm15  ;;  %v3984_v28 = vpack.i.bf16 %v1676_v24, %v1675_v37  ;;  %vm1605_vm7 = vcmp.lt.s32.totalorder %v4302_v30, 14 }
 0x14a   :  { %1007 = vrot.lane.b32.xlu0 %v4773_v38, %s4176_s25  ;;  %1033 = vrot.lane.b32.xlu1 %v1023_v55, %s4176_s25  ;;  %v1027_v44 = vmul.f32 %v4773_v38, %v4773_v38  ;;  %v3974_v27 = vpack.i.bf16 %v1741_v23, %v1740_v15  ;;  %vm1611_vm11 = vmand %vm1607_vm14, %vm1273_vm13  ;;  %v1614_v16 = vsel %vm1610_vm3, 1.0, %v4810_v10  ;;  %v1546_v55 = vsel %vm1405_vm12, 1.0, %v4810_v10 }
 0x14b   :  { %v1615_v42 = vsel %vm1611_vm11, 1.0, %v4810_v10  ;;  %v4004_v60 = vpack.i.bf16 %v1546_v55, %v1545_v32  ;;  %v1674_v0 = vsel %vm1605_vm7, 1.0, %v4810_v10  ;;  %v1543_v37 = vsel %vm1402_vm1, 1.0, %v4810_v10 }
 0x14c   :  { %v3994_v52 = vpack.i.bf16 %v1615_v42, %v1614_v16  ;;  %v1544_v24 = vsel %vm1403_vm10, 1.0, %v4810_v10 }
 0x14d   :  { %v3999_v55 = vpack.i.bf16 %v1544_v24, %v1543_v37 }
 0x14e   :  { %1001 = vrot.lane.b32.xlu0 %v4782_v13, %s4176_s25  ;;  %1037 = vrot.lane.b32.xlu1 %v1025_v29, %s4176_s25 }
 0x152   :  { %1005 = vrot.lane.b32.xlu0 %v4786_v36, %s4176_s25  ;;  %1039 = vrot.lane.b32.xlu1 %v1026_v43, %s4176_s25 }
 0x156   :  { %1035 = vrot.lane.b32.xlu0 %v1024_v31, %s4176_s25 }
 0x15a   :  { %1041 = vrot.lane.b32.xlu0 %v1027_v44, %s4176_s25 }
 0x1b4   :  { %v1000_v47 = vpop.permute.xlu1 %999 }
 0x1b8   :  { %v1004_v48 = vpop.permute.xlu1 %1003 }
 0x1bc   :  { %v1008_v49 = vpop.permute.xlu0 %1007  ;;  %v1034_v59 = vpop.permute.xlu1 %1033 }
 0x1c0   :  { %v1002_v61 = vpop.permute.xlu0 %1001  ;;  %v1038_v6 = vpop.permute.xlu1 %1037 }
 0x1c1   :  { %v1009_v7 = vsel %vm6781_vm5, %v1000_v47, %v1002_v61  ;;  %v1010_v35 = vsel %vm6781_vm5, %v1002_v61, %v1004_v48  ;;  %v1187_v47 = vand.u32 1, %v4304_v33 }
 0x1c2   :  { %v1017_v5 = vadd.f32 %v1010_v35, %v1009_v7 }
 0x1c3   :  { %vm4881_vm6 = vcmp.eq.s32.totalorder %v1187_v47, 0 }
 0x1c4   :  { %v1006_v62 = vpop.permute.xlu0 %1005  ;;  %v1040_v51 = vpop.permute.xlu1 %1039 }
 0x1c5   :  { %v1011_v50 = vsel %vm6781_vm5, %v1004_v48, %v1006_v62  ;;  %v1012_v4 = vsel %vm6781_vm5, %v1006_v62, %v1008_v49  ;;  %v1045_v57 = vsel %vm6781_vm5, %v1038_v6, %v1040_v51  ;;  %v1195_v48 = vand.u32 1, %v4280_v20 }
 0x1c6   :  { %v1018_v45 = vadd.f32 %v1017_v5, %v1011_v50  ;;  %v1188_v49 = vand.u32 1, %v4306_v34  ;;  %v1475_v62 = vsel %vm1272_vm15, 1.0, %v4810_v10 }
 0x1c7   :  { %vm4885_vm0 = vcmp.eq.s32.totalorder %v1195_v48, 0 }
 0x1c8   :  { %v1036_v58 = vpop.permute.xlu0 %1035  ;;  %v1019_v46 = vadd.f32 %v1018_v45, %v1012_v4  ;;  %vm4892_vm14 = vcmp.eq.s32.totalorder %v1188_v49, 0  ;;  %vm1203_vm3 = vmand %vm4881_vm6, %vm4885_vm0 }
 0x1c9   :  { %v1043_v53 = vsel %vm6781_vm5, %v1034_v59, %v1036_v58  ;;  %v1044_v56 = vsel %vm6781_vm5, %v1036_v58, %v1038_v6  ;;  %v1196_v59 = vand.u32 1, %v4282_v21  ;;  %v1063_v58 = vld [vmem:[%s6767_s5] sm:$0xff]  ;;  %vm1735_vm0 = vmand %vm1605_vm7, %vm1403_vm10  ;;  %s4189_s5 = smov 98  }
 0x1ca   :  { %v1051_v8 = vadd.f32 %v1044_v56, %v1043_v53  ;;  %1020 = vadd.xlane.f32.xlu1 %v1019_v46  ;;  %v1207_v46 = vsel %vm1203_vm3, 1.0, %v4810_v10 }
 0x1cb   :  { %vm4896_vm8 = vcmp.eq.s32.totalorder %v1196_v59, 0 }
 0x1cc   :  { %v1042_v54 = vpop.permute.xlu0 %1041  ;;  %v1052_v11 = vadd.f32 %v1051_v8, %v1045_v57  ;;  %vm1204_vm11 = vmand %vm4892_vm14, %vm4896_vm8  ;;  %vm1268_vm14 = vcmp.ge.s32.totalorder %v4304_v33, 2  ;;  %vm1269_vm8 = vcmp.ge.s32.totalorder %v4306_v34, 2 }
 0x1cd   :  { %v1046_v39 = vsel %vm6781_vm5, %v1040_v51, %v1042_v54  ;;  %vm1604_vm5 = vcmp.lt.s32.totalorder %v4291_v26, 14  ;;  %v1208_v53 = vsel %vm1204_vm11, 1.0, %v4810_v10  ;;  %vm1408_vm3 = vmand %vm1268_vm14, %vm1404_vm9  ;;  %v1739_v54 = vsel %vm1735_vm0, 1.0, %v4810_v10 }
 0x1ce   :  { %v1053_v2 = vadd.f32 %v1052_v11, %v1046_v39  ;;  %vm4928_vm6 = vmand %vm1604_vm5, %vm1402_vm1  ;;  %v3964_v8 = vpack.i.bf16 %v1208_v53, %v1207_v46  ;;  %v1412_v11 = vsel %vm1408_vm3, 1.0, %v4810_v10  ;;  %v1673_v63 = vsel %vm1604_vm5, 1.0, %v4810_v10 }
 0x1cf   :  { %v1738_v57 = vsel %vm4928_vm6, 1.0, %v4810_v10  ;;  %vm1409_vm11 = vmand %vm1269_vm8, %vm1405_vm12  ;;  %v3979_v18 = vpack.i.bf16 %v1674_v0, %v1673_v63  ;;  %vm1266_vm6 = vcmp.ge.s32.totalorder %v4291_v26, 2  ;;  %vm1267_vm0 = vcmp.ge.s32.totalorder %v4302_v30, 2 }
 0x1d0   :  { %1054 = vadd.xlane.f32.xlu0 %v1053_v2  ;;  %v1413_v39 = vsel %vm1409_vm11, 1.0, %v4810_v10  ;;  %v3969_v3 = vpack.i.bf16 %v1739_v54, %v1738_v57  ;;  %vm1608_vm12 = vmand %vm1604_vm5, %vm1270_vm4  ;;  %v4981_v15 = vsel %vm1267_vm0, 1.0, %v4810_v10  ;;  %v5001_v16 = vsel %vm1268_vm14, 1.0, %v4810_v10 }
 0x1d1   :  { %v4024_v2 = vpack.i.bf16 %v1413_v39, %v1412_v11  ;;  %vm1609_vm9 = vmand %vm1605_vm7, %vm1271_vm2  ;;  %v1612_v22 = vsel %vm1608_vm12, 1.0, %v4810_v10  ;;  %v5006_v42 = vsel %vm1269_vm8, 1.0, %v4810_v10  ;;  %vm6847_vm12 = vcmask 769024  }
 0x1d2   :  { %v1613_v1 = vsel %vm1609_vm9, 1.0, %v4810_v10  ;;  %vm4994_vm5 = vmand %vm1266_vm6, %vm1402_vm1 }
 0x1d3   :  { %vm1274_vm7 = vmand %vm1266_vm6, %vm1270_vm4  ;;  %v1410_v48 = vsel %vm4994_vm5, 1.0, %v4810_v10 }
 0x1d4   :  { %vm1275_vm1 = vmand %vm1267_vm0, %vm1271_vm2  ;;  %v1278_v32 = vsel %vm1274_vm7, 1.0, %v4810_v10 }
 0x1d5   :  { %vm1407_vm3 = vmand %vm1267_vm0, %vm1403_vm10 }
 0x1d6   :  { %vm1276_vm11 = vmand %vm1268_vm14, %vm1272_vm15  ;;  %v1411_v49 = vsel %vm1407_vm3, 1.0, %v4810_v10 }
 0x1d7   :  { %vm1277_vm10 = vmand %vm1269_vm8, %vm1273_vm13  ;;  %v4019_v59 = vpack.i.bf16 %v1411_v49, %v1410_v48 }
 0x1d8   :  { %vm6848_vm9 = vmmov %vm6847_vm12 }
 0x1db   :  { %1086 = vrot.lane.b32.xlu1 %v4810_v10, %s4180_s27 }
 0x1df   :  { %1080 = vrot.lane.b32.xlu1 %v1010_v35, %s4180_s27 }
 0x1e3   :  { %1082 = vrot.lane.b32.xlu1 %v1011_v50, %s4180_s27 }
 0x1e6   :  { %1110 = vrot.lane.b32.xlu0 %v4810_v10, %s4181_s28 }
 0x1e7   :  { %1102 = vrot.lane.b32.xlu1 %v1009_v7, %s4181_s28 }
 0x1ea   :  { %1078 = vrot.lane.b32.xlu0 %v1009_v7, %s4180_s27 }
 0x1eb   :  { %1106 = vrot.lane.b32.xlu1 %v1011_v50, %s4181_s28 }
 0x1ee   :  { %1084 = vrot.lane.b32.xlu0 %v1012_v4, %s4180_s27 }
 0x1ef   :  { %1128 = vrot.lane.b32.xlu1 %v1010_v35, %s4184_s12 }
 0x1f2   :  { %1104 = vrot.lane.b32.xlu0 %v1010_v35, %s4181_s28  ;;  %v1061_v35 = vld [vmem:[%s6766_s4] sm:$0xff] }
 0x1f3   :  { %1132 = vrot.lane.b32.xlu1 %v1012_v4, %s4184_s12 }
 0x1f6   :  { %1108 = vrot.lane.b32.xlu0 %v1012_v4, %s4181_s28 }
 0x1fa   :  { %1126 = vrot.lane.b32.xlu0 %v1009_v7, %s4184_s12 }
 0x1fe   :  { %1130 = vrot.lane.b32.xlu0 %v1011_v50, %s4184_s12  ;;  %v1476_v50 = vsel %vm1273_vm13, 1.0, %v4810_v10  ;;  %vm6844_vm13 = vcmask 777216  }
 0x1ff   :  { %v4014_v4 = vpack.i.bf16 %v1476_v50, %v1475_v62  ;;  %vm6845_vm14 = vmmov %vm6844_vm13 }
 0x200   :  { %vm6846_vm8 = vmmov %vm6844_vm13 }
 0x201   :  { %vm6851_vm5 = vmmov %vm6846_vm8 }
 0x202   :  { %1134 = vrot.lane.b32.xlu0 %v4810_v10, %s4184_s12 }
 0x206   :  { %3960 = vrot.lane.b32.xlu0 %v3959_v17, %s4178_s26  ;;  %v4976_v17 = vsel %vm1266_vm6, 1.0, %v4810_v10  ;;  %vm6849_vm6 = vmmov %vm6848_vm9 }
 0x207   :  { %v4029_v23 = vpack.i.bf16 %v4981_v15, %v4976_v17  ;;  %vm6852_vm7 = vmmov %vm6849_vm6 }
 0x20a   :  { %3975 = vrot.lane.b32.xlu0 %v3974_v27, %s4185_s13  ;;  %v3989_v27 = vpack.i.bf16 %v1613_v1, %v1612_v22 }
 0x20e   :  { %3985 = vrot.lane.b32.xlu0 %v3984_v28, %s4186_s14 }
 0x212   :  { %3995 = vrot.lane.b32.xlu0 %v3994_v52, %s4187_s15  ;;  %v4034_v52 = vpack.i.bf16 %v5006_v42, %v5001_v16 }
 0x216   :  { %4005 = vrot.lane.b32.xlu0 %v4004_v60, %s4188_s16  ;;  %v1279_v60 = vsel %vm1275_vm1, 1.0, %v4810_v10  ;;  %vm6853_vm1 = vcmask 908288  }
 0x217   :  { %vm6854_vm3 = vmmov %vm6853_vm1 }
 0x21a   :  { %4015 = vrot.lane.b32.xlu0 %v4014_v4, %s4182_s29 }
 0x21e   :  { %4025 = vrot.lane.b32.xlu0 %v4024_v2, %s4189_s5 }
 0x253   :  { %v1021_v40 = vpop.xlane.xlu1 %1020 }
 0x254   :  { %v4873_v41 = vmul.f32 0.001953125, %v1021_v40  ;;  %v1473_v40 = vsel %vm1270_vm4, 1.0, %v4810_v10 }
 0x256   :  { %v1057_v43 = vmul.f32 %v4873_v41, %v4873_v41 }
 0x257   :  { %v1087_v7 = vpop.permute.xlu1 %1086 }
 0x259   :  { %v1055_v25 = vpop.xlane.xlu0 %1054 }
 0x25a   :  { %v1056_v29 = vmul.f32 0.001953125, %v1055_v25  ;;  %v1474_v25 = vsel %vm1271_vm2, 1.0, %v4810_v10  ;;  %vm6841_vm2 = vcmask 900096  }
 0x25b   :  { %v1081_v6 = vpop.permute.xlu1 %1080  ;;  %vm6842_vm4 = vmmov %vm6841_vm2 }
 0x25c   :  { %v1058_v31 = vsub.f32 %v1056_v29, %v1057_v43  ;;  %v5029_v29 = vpack.i.bf16 %v1279_v60, %v1278_v32  ;;  %v1280_v43 = vsel %vm1276_vm11, 1.0, %v4810_v10  ;;  %vm6843_vm15 = vmmov %vm6841_vm2 }
 0x25d   :  { %v1111_v61 = vpop.permute.xlu0 %1110  ;;  %vm6850_vm0 = vmmov %vm6841_vm2 }
 0x25e   :  { %v1059_v44 = vadd.f32 1e-05, %v1058_v31  ;;  %v1281_v31 = vsel %vm1277_vm10, 1.0, %v4810_v10  ;;  %vm6855_vm11 = vmmov %vm6853_vm1  ;;  %vm6788_vm10 = vcmask 277504  }
 0x25f   :  { %v5042_v47 = vpack.i.bf16 %v1281_v31, %v1280_v43  ;;  %v1083_v62 = vpop.permute.xlu1 %1082 }
 0x260   :  { %4145 = vrsqrt.f32 %v1059_v44  ;;  %v4009_v44 = vpack.i.bf16 %v1474_v25, %v1473_v40  ;;  %v1089_v56 = vsel %vm6842_vm4, %v1081_v6, %v1083_v62 }
 0x26d   :  { %v4146_v45 = vpop.eup %4145 }
 0x26e   :  { %v1062_v51 = vmul.f32 %v4146_v45, %v1061_v35  ;;  %v1079_v35 = vpop.permute.xlu0 %1078  ;;  %v1103_v45 = vpop.permute.xlu1 %1102 }
 0x26f   :  { %v1088_v53 = vsel %vm6841_vm2, %v1079_v35, %v1081_v6  ;;  %v1097_v63 = vadd.f32 %v1079_v35, %v4742_v12  ;;  %vm6856_vm2 = vcmask 138240  }
 0x270   :  { %1162 = vperm.xlu1 %3958, %v1062_v51   ;;  %v1098_v11 = vadd.f32 %v1088_v53, %v4782_v13  ;;  %vm6857_vm4 = vmmov %vm6856_vm2 }
 0x271   :  { %v1121_v60 = vadd.f32 %v1103_v45, %v1097_v63 }
 0x272   :  { %v1085_v5 = vpop.permute.xlu0 %1084  ;;  %v1107_v51 = vpop.permute.xlu1 %1106 }
 0x273   :  { %v1091_v13 = vsel %vm6850_vm0, %v1085_v5, %v1087_v7  ;;  %vm1426_vm0 = vcmask 801792  }
 0x274   :  { %1172 = vperm.xlu1 %3958, %v1063_v58  }
 0x276   :  { %v1105_v50 = vpop.permute.xlu0 %1104  ;;  %v1129_v46 = vpop.permute.xlu1 %1128 }
 0x277   :  { %v1112_v54 = vsel %vm6844_vm13, %v1103_v45, %v1105_v50  ;;  %v1113_v39 = vsel %vm6845_vm14, %v1105_v50, %v1107_v51  ;;  %vm1384_vm13 = vcmask 261120   ;;  %vm1455_vm14 = vcmask 244736  }
 0x278   :  { %3965 = vrot.lane.b32.xlu1 %v3964_v8, %s4178_s26  ;;  %v1090_v8 = vsel %vm6843_vm15, %v1083_v62, %v1085_v5  ;;  %v1122_v1 = vadd.f32 %v1112_v54, %v1098_v11  ;;  %vm6858_vm15 = vmmov %vm6856_vm2 }
 0x279   :  { %v1100_v0 = vadd.f32 %v1090_v8, %v4786_v36  ;;  %v1101_v36 = vadd.f32 %v1091_v13, %v4773_v38 }
 0x27a   :  { %v1109_v4 = vpop.permute.xlu0 %1108 }
 0x27b   :  { %v1114_v2 = vsel %vm6846_vm8, %v1107_v51, %v1109_v4  ;;  %vm6859_vm8 = vmmov %vm6856_vm2 }
 0x27c   :  { %3970 = vrot.lane.b32.xlu1 %v3969_v3, %s4185_s13  ;;  %v1099_v3 = vadd.f32 %v1089_v56, %v4762_v9  ;;  %v1124_v28 = vadd.f32 %v1114_v2, %v1100_v0  ;;  %v1115_v9 = vsel %vm6851_vm5, %v1109_v4, %v1111_v61  ;;  %vm6862_vm5 = vcmask 785408  }
 0x27d   :  { %v1125_v31 = vadd.f32 %v1115_v9, %v1101_v36 }
 0x27e   :  { %v1127_v58 = vpop.permute.xlu0 %1126  ;;  %v1123_v24 = vadd.f32 %v1113_v39, %v1099_v3 }
 0x27f   :  { %v1136_v22 = vsel %vm6847_vm12, %v1127_v58, %v1129_v46  ;;  %v1145_v25 = vadd.f32 %v1127_v58, %v1121_v60  ;;  %vm1517_vm12 = vcmask 15360  }
 0x280   :  { %3980 = vrot.lane.b32.xlu1 %v3979_v18, %s4186_s14  ;;  %v1133_v18 = vpop.permute.xlu1 %1132  ;;  %v1146_v32 = vadd.f32 %v1136_v22, %v1122_v1 }
 0x281   :  { %v1150_v35 = vmul.f32 0.25, %v1145_v25 }
 0x282   :  { %v1131_v57 = vpop.permute.xlu0 %1130 }
 0x283   :  { %v1138_v37 = vsel %vm6849_vm6, %v1131_v57, %v1133_v18  ;;  %v1155_v51 = vsub.f32 %v1150_v35, %v4873_v41 }
 0x284   :  { %3990 = vrot.lane.b32.xlu1 %v3989_v27, %s4187_s15  ;;  %v1137_v27 = vsel %vm6848_vm9, %v1129_v46, %v1131_v57  ;;  %v1148_v40 = vadd.f32 %v1138_v37, %v1124_v28  ;;  %vm6860_vm9 = vcmask 1031168  }
 0x285   :  { %v1147_v12 = vadd.f32 %v1137_v27, %v1123_v24  ;;  %vm6861_vm6 = vmmov %vm6860_vm9 }
 0x286   :  { %v1153_v49 = vmul.f32 0.25, %v1148_v40 }
 0x287   :  { %v1152_v48 = vmul.f32 0.25, %v1147_v12 }
 0x288   :  { %4000 = vrot.lane.b32.xlu1 %v3999_v55, %s4188_s16  ;;  %v1135_v55 = vpop.permute.xlu0 %1134  ;;  %v1158_v61 = vsub.f32 %v1153_v49, %v4873_v41 }
 0x289   :  { %v1139_v43 = vsel %vm6852_vm7, %v1133_v18, %v1135_v55  ;;  %v1157_v62 = vsub.f32 %v1152_v48, %v4873_v41  ;;  %vm6863_vm7 = vmmov %vm6862_vm5 }
 0x28c   :  { %4010 = vrot.lane.b32.xlu1 %v4009_v44, %s4182_s29  ;;  %v1151_v44 = vmul.f32 0.25, %v1146_v32  ;;  %v3961_v7 = vpop.permute.xlu0 %3960 }
 0x28d   :  { %v3963_v50 = vunpack.i.h.bf16 %v3961_v7  ;;  %v3962_v45 = vunpack.i.l.bf16 %v3961_v7 }
 0x28e   :  { %v1156_v5 = vsub.f32 %v1151_v44, %v4873_v41 }
 0x28f   :  { %v1221_v57 = vsel %vm6853_vm1, %v3962_v45, %v3963_v50  ;;  %vm6864_vm1 = vmmov %vm6861_vm6 }
 0x290   :  { %4020 = vrot.lane.b32.xlu1 %v4019_v59, %s4189_s5  ;;  %v1149_v59 = vadd.f32 %v1139_v43, %v1125_v31 }
 0x292   :  { %v1154_v38 = vmul.f32 0.25, %v1149_v59 }
 0x294   :  { %v1159_v39 = vsub.f32 %v1154_v38, %v4873_v41  ;;  %v5076_v41 = vpop.permute.xlu0 %3975 }
 0x295   :  { %v3978_v48 = vunpack.i.h.bf16 %v5076_v41 }
 0x297   :  { %v1766_v15 = vmul.f32 %v4810_v10, %v3978_v48 }
 0x298   :  { %v5085_v43 = vpop.permute.xlu0 %3985 }
 0x299   :  { %v3988_v44 = vunpack.i.h.bf16 %v5085_v43 }
 0x29b   :  { %v1701_v17 = vmul.f32 %v4810_v10, %v3988_v44 }
 0x29c   :  { %v5100_v49 = vpop.permute.xlu0 %3995 }
 0x2eb   :  { %v1163_v6 = vpop.permute.xlu1 %1162 }
 0x2ec   :  { %v1166_v4 = vmul.f32 %v1163_v6, %v1156_v5  ;;  %v1167_v58 = vmul.f32 %v1163_v6, %v1157_v62  ;;  %v1168_v46 = vmul.f32 %v1163_v6, %v1158_v61  ;;  %v1165_v8 = vmul.f32 %v1163_v6, %v1155_v51 }
 0x2ed   :  { %v1169_v0 = vmul.f32 %v1163_v6, %v1159_v39  ;;  %v3977_v39 = vunpack.i.l.bf16 %v5076_v41 }
 0x2ef   :  { %v1173_v53 = vpop.permute.xlu1 %1172 }
 0x2f0   :  { %v1176_v56 = vadd.f32 %v1173_v53, %v1166_v4  ;;  %v1177_v54 = vadd.f32 %v1173_v53, %v1167_v58  ;;  %v1178_v11 = vadd.f32 %v1173_v53, %v1168_v46  ;;  %v1175_v3 = vadd.f32 %v1173_v53, %v1165_v8 }
 0x2f1   :  { %v1179_v13 = vadd.f32 %v1173_v53, %v1169_v0 }
 0x2f2   :  { %v1181_v2 = vmax.f32 %v1176_v56, 0.0  ;;  %v1182_v27 = vmax.f32 %v1177_v54, 0.0  ;;  %v1183_v37 = vmax.f32 %v1178_v11, 0.0  ;;  %v1180_v32 = vmax.f32 %v1175_v3, 0.0 }
 0x2f3   :  { %v3966_v63 = vpop.permute.xlu1 %3965  ;;  %v1184_v12 = vmax.f32 %v1179_v13, 0.0 }
 0x2f4   :  { %v3968_v18 = vunpack.i.h.bf16 %v3966_v63  ;;  %v3967_v22 = vunpack.i.l.bf16 %v3966_v63  ;;  %v1230_v1 = vmul.f32 %v1221_v57, %v1181_v2  ;;  %v1229_v40 = vmul.f32 %v3962_v45, %v1180_v32 }
 0x2f6   :  { %v1222_v24 = vsel %vm6854_vm3, %v3963_v50, %v3967_v22  ;;  %v1223_v28 = vsel %vm6855_vm11, %v3967_v22, %v3968_v18  ;;  %1241 = vrot.lane.b32.xlu0 %v1230_v1, %s4176_s25  ;;  %v1233_v25 = vmul.f32 %v3968_v18, %v1184_v12  ;;  %v3987_v1 = vunpack.i.l.bf16 %v5085_v43 }
 0x2f7   :  { %v1231_v55 = vmul.f32 %v1222_v24, %v1182_v27  ;;  %v1232_v60 = vmul.f32 %v1223_v28, %v1183_v37  ;;  %v5078_v9 = vpop.permute.xlu1 %3970  ;;  %vm6865_vm3 = vcmask 769024  }
 0x2f8   :  { %v3973_v46 = vunpack.i.h.bf16 %v5078_v9  ;;  %v3972_v53 = vunpack.i.l.bf16 %v5078_v9  ;;  %vm6866_vm11 = vmmov %vm6865_vm3 }
 0x2f9   :  { %1243 = vrot.lane.b32.xlu1 %v1231_v55, %s4176_s25 }
 0x2fa   :  { %1245 = vrot.lane.b32.xlu0 %v1232_v60, %s4176_s25  ;;  %v1754_v2 = vsel %vm6788_vm10, %v3972_v53, %v3973_v46  ;;  %v1755_v22 = vsel %vm6788_vm10, %v3973_v46, %v3977_v39 }
 0x2fb   :  { %v5082_v36 = vpop.permute.xlu1 %3980 }
 0x2fc   :  { %v3983_v27 = vunpack.i.h.bf16 %v5082_v36  ;;  %v3982_v37 = vunpack.i.l.bf16 %v5082_v36  ;;  %v3997_v36 = vunpack.i.l.bf16 %v5100_v49 }
 0x2fd   :  { %1239 = vrot.lane.b32.xlu1 %v1229_v40, %s4176_s25 }
 0x2fe   :  { %1247 = vrot.lane.b32.xlu0 %v1233_v25, %s4176_s25  ;;  %v1690_v28 = vsel %vm1384_vm13, %v3983_v27, %v3987_v1  ;;  %v1689_v32 = vsel %vm1384_vm13, %v3982_v37, %v3983_v27  ;;  %s4194_s25 = smov 68  }
 0x2ff   :  { %v5088_v31 = vpop.permute.xlu1 %3990 }
 0x300   :  { %v3993_v55 = vunpack.i.h.bf16 %v5088_v31  ;;  %v3992_v60 = vunpack.i.l.bf16 %v5088_v31 }
 0x301   :  { %4030 = vrot.lane.b32.xlu1 %v4029_v23, %s4183_s30  ;;  %v3998_v23 = vunpack.i.h.bf16 %v5100_v49 }
 0x302   :  { %4035 = vrot.lane.b32.xlu0 %v4034_v52, %s4183_s30  ;;  %v5118_v52 = vpop.permute.xlu0 %4005  ;;  %v1628_v25 = vsel %vm1455_vm14, %v3992_v60, %v3993_v55 }
 0x303   :  { %v5102_v59 = vpop.permute.xlu1 %4000 }
 0x305   :  { %4040 = vrot.lane.b32.xlu1 %v5029_v29, %s4184_s12  ;;  %v1640_v29 = vmul.f32 %v4810_v10, %v3998_v23 }
 0x306   :  { %4045 = vrot.lane.b32.xlu0 %v5042_v47, %s4184_s12  ;;  %v4008_v47 = vunpack.i.h.bf16 %v5118_v52  ;;  %v5142_v61 = vpop.permute.xlu0 %4015 }
 0x307   :  { %v5115_v16 = vpop.permute.xlu1 %4010 }
 0x308   :  { %v4012_v42 = vunpack.i.l.bf16 %v5115_v16  ;;  %v1571_v6 = vmul.f32 %v4810_v10, %v4008_v47  ;;  %v4013_v43 = vunpack.i.h.bf16 %v5115_v16 }
 0x309   :  { %1715 = vrot.lane.b32.xlu1 %v1701_v17, %s4183_s30 }
 0x30a   :  { %1780 = vrot.lane.b32.xlu0 %v1766_v15, %s4184_s12  ;;  %v1497_v7 = vmul.f32 %v4810_v10, %v4012_v42  ;;  %v5144_v45 = vpop.permute.xlu0 %4025  ;;  %v1489_v49 = vsel %vm6861_vm6, %v4012_v42, %v4013_v43  ;;  %vm6793_vm6 = vcmp.ge.s32.totalorder %v4282_v21, 4 }
 0x30b   :  { %v5129_v35 = vpop.permute.xlu1 %4020  ;;  %v4027_v42 = vunpack.i.l.bf16 %v5144_v45 }
 0x30c   :  { %v4022_v5 = vunpack.i.l.bf16 %v5129_v35 }
 0x30d   :  { %1507 = vrot.lane.b32.xlu1 %v1497_v7, %s4188_s16  ;;  %v1629_v7 = vsel %vm1455_vm14, %v3993_v55, %v3997_v36 }
 0x30e   :  { %1654 = vrot.lane.b32.xlu0 %v1640_v29, %s4189_s5  ;;  %v1435_v62 = vmul.f32 %v4810_v10, %v4022_v5  ;;  %v1756_v29 = vsel %vm6788_vm10, %v3977_v39, %v3978_v48  ;;  %v1630_v39 = vsel %vm1455_vm14, %v3997_v36, %v3998_v23  ;;  %v4023_v23 = vunpack.i.h.bf16 %v5129_v35 }
 0x30f   :  { %v4018_v35 = vunpack.i.h.bf16 %v5142_v61 }
 0x312   :  { %1585 = vrot.lane.b32.xlu0 %v1571_v6, %s4182_s29  ;;  %v4003_v6 = vunpack.i.h.bf16 %v5102_v59 }
 0x316   :  { %1445 = vrot.lane.b32.xlu0 %v1435_v62, %s4187_s15  ;;  %v4002_v62 = vunpack.i.l.bf16 %v5102_v59  ;;  %v1691_v59 = vsel %vm1384_vm13, %v3987_v1, %v3988_v44 }
 0x318   :  { %v1559_v41 = vsel %vm1517_vm12, %v4002_v62, %v4003_v6 }
 0x368   :  { %v1242_v4 = vpop.permute.xlu0 %1241 }
 0x36b   :  { %v1244_v50 = vpop.permute.xlu1 %1243 }
 0x36c   :  { %v5155_v8 = vsel %vm6856_vm2, %v1242_v4, %v1244_v50  ;;  %v1246_v54 = vpop.permute.xlu0 %1245  ;;  %vm6867_vm2 = vmmov %vm6862_vm5 }
 0x36d   :  { %v1763_v63 = vmul.f32 %v1754_v2, %v5155_v8  ;;  %v5168_v0 = vsel %vm6857_vm4, %v1244_v50, %v1246_v54  ;;  %v1698_v9 = vmul.f32 %v1689_v32, %v5155_v8  ;;  %v1637_v15 = vmul.f32 %v1628_v25, %v5155_v8  ;;  %vm6868_vm4 = vmmov %vm6865_vm3 }
 0x36e   :  { %v1764_v13 = vmul.f32 %v1755_v22, %v5168_v0  ;;  %v1699_v12 = vmul.f32 %v1690_v28, %v5168_v0  ;;  %v1638_v50 = vmul.f32 %v1629_v7, %v5168_v0  ;;  %v1568_v48 = vmul.f32 %v1559_v41, %v5155_v8 }
 0x36f   :  { %v1240_v38 = vpop.permute.xlu1 %1239  ;;  %v4017_v2 = vunpack.i.l.bf16 %v5142_v61 }
 0x370   :  { %v5171_v18 = vsel %vm6858_vm15, %v1240_v38, %v1242_v4  ;;  %v1248_v40 = vpop.permute.xlu0 %1247  ;;  %v4007_v4 = vunpack.i.l.bf16 %v5118_v52  ;;  %v1428_v52 = vsel %vm1426_vm0, %v4023_v23, %v4027_v42  ;;  %vm6787_vm15 = vcmp.lt.s32.totalorder %v4304_v33, 12 }
 0x371   :  { %v1762_v24 = vmul.f32 %v3972_v53, %v5171_v18  ;;  %v1697_v17 = vmul.f32 %v3982_v37, %v5171_v18  ;;  %v5196_v31 = vsel %vm6859_vm8, %v1246_v54, %v1248_v40  ;;  %v1636_v46 = vmul.f32 %v3992_v60, %v5171_v18 }
 0x372   :  { %v1765_v38 = vmul.f32 %v1756_v29, %v5196_v31  ;;  %v1560_v53 = vsel %vm1517_vm12, %v4003_v6, %v4007_v4  ;;  %v1567_v44 = vmul.f32 %v4002_v62, %v5171_v18  ;;  %v1490_v22 = vsel %vm6860_vm9, %v4013_v43, %v4017_v2 }
 0x373   :  { %v5146_v51 = vpop.permute.xlu1 %4030  ;;  %v1569_v54 = vmul.f32 %v1560_v53, %v5168_v0  ;;  %v1499_v1 = vmul.f32 %v1490_v22, %v5155_v8  ;;  %v1498_v27 = vmul.f32 %v1489_v49, %v5171_v18  ;;  %v1561_v16 = vsel %vm1517_vm12, %v4007_v4, %v4008_v47 }
 0x374   :  { %v4032_v58 = vunpack.i.l.bf16 %v5146_v51  ;;  %v4033_v37 = vunpack.i.h.bf16 %v5146_v51  ;;  %v1570_v32 = vmul.f32 %v1561_v16, %v5196_v31  ;;  %v1437_v60 = vmul.f32 %v1428_v52, %v5155_v8 }
 0x375   :  { %v1501_v40 = vmul.f32 %v4018_v35, %v5196_v31  ;;  %v1491_v25 = vsel %vm6864_vm1, %v4017_v2, %v4018_v35  ;;  %vm6786_vm8 = vcmp.lt.s32.totalorder %v4306_v34, 12  ;;  %vm2315_vm9 = vcmp.ge.s32.totalorder %v4280_v20, 4 }
 0x376   :  { %v1364_v56 = vmul.f32 %v4810_v10, %v4032_v58  ;;  %v2948_v53 = vsel %vm6787_vm15, 1.0, %v4810_v10  ;;  %vm6792_vm1 = vcmp.lt.s32.totalorder %v4280_v20, 12  ;;  %v2628_v52 = vsel %vm2315_vm9, 1.0, %v4810_v10 }
 0x377   :  { %v5157_v57 = vpop.permute.xlu1 %4040 }
 0x378   :  { %v4042_v11 = vunpack.i.l.bf16 %v5157_v57  ;;  %1374 = vrot.lane.b32.xlu1 %v1364_v56, %s4186_s14  ;;  %v1700_v56 = vmul.f32 %v1691_v59, %v5196_v31  ;;  %v4059_v59 = vpack.i.bf16 %v4810_v10, %v4810_v10 }
 0x37a   :  { %v1302_v3 = vmul.f32 %v4810_v10, %v4042_v11 }
 0x37c   :  { %1312 = vrot.lane.b32.xlu0 %v1302_v3, %s4185_s13  ;;  %1774 = vrot.lane.b32.xlu1 %v1763_v63, %s4184_s12  ;;  %v1639_v3 = vmul.f32 %v1630_v39, %v5196_v31  ;;  %v4036_v63 = vpop.permute.xlu0 %4035  ;;  %v2038_v39 = vld [vmem:[%s6768_s7 + $0x8] sm:$0xff] }
 0x380   :  { %1776 = vrot.lane.b32.xlu0 %v1764_v13, %s4184_s12  ;;  %1772 = vrot.lane.b32.xlu1 %v1762_v24, %s4184_s12  ;;  %v4037_v13 = vunpack.i.l.bf16 %v4036_v63  ;;  %v1427_v24 = vsel %vm1426_vm0, %v4022_v5, %v4023_v23  ;;  %v1356_v5 = vsel %vm6863_vm7, %v4032_v58, %v4033_v37  ;;  %vm5329_vm7 = vmand %vm6786_vm8, %vm6793_vm6 }
 0x381   :  { %v1436_v28 = vmul.f32 %v1427_v24, %v5171_v18  ;;  %v1365_v36 = vmul.f32 %v1356_v5, %v5171_v18 }
 0x382   :  { %v1357_v55 = vsel %vm6862_vm5, %v4033_v37, %v4037_v13  ;;  %vm5321_vm5 = vmand %vm6787_vm15, %vm2315_vm9  ;;  %vm6794_vm15 = vcmp.lt.s32.totalorder %v4278_v19, 12  ;;  %v2744_v37 = vsel %vm6792_vm1, 1.0, %v4810_v10 }
 0x383   :  { %v1366_v47 = vmul.f32 %v1357_v55, %v5155_v8 }
 0x384   :  { %1709 = vrot.lane.b32.xlu0 %v1698_v9, %s4183_s30  ;;  %1711 = vrot.lane.b32.xlu1 %v1699_v12, %s4183_s30  ;;  %v4043_v9 = vunpack.i.h.bf16 %v5157_v57  ;;  %v4046_v12 = vpop.permute.xlu0 %4045 }
 0x385   :  { %v4047_v51 = vunpack.i.l.bf16 %v4046_v12  ;;  %v4048_v62 = vunpack.i.h.bf16 %v4046_v12 }
 0x386   :  { %v1294_v61 = vsel %vm6865_vm3, %v4042_v11, %v4043_v9  ;;  %vm6790_vm3 = vcmp.lt.s32.totalorder %v4291_v26, 12 }
 0x387   :  { %v1303_v58 = vmul.f32 %v1294_v61, %v5171_v18  ;;  %v1295_v7 = vsel %vm6866_vm11, %v4043_v9, %v4047_v51  ;;  %v1306_v4 = vmul.f32 %v4048_v62, %v5196_v31  ;;  %vm6789_vm11 = vcmp.lt.s32.totalorder %v4302_v30, 12 }
 0x388   :  { %1707 = vrot.lane.b32.xlu0 %v1697_v17, %s4183_s30  ;;  %1648 = vrot.lane.b32.xlu1 %v1637_v15, %s4189_s5  ;;  %v4028_v17 = vunpack.i.h.bf16 %v5144_v45  ;;  %v1500_v15 = vmul.f32 %v1491_v25, %v5168_v0  ;;  %v4038_v45 = vunpack.i.h.bf16 %v4036_v63  ;;  %v1304_v11 = vmul.f32 %v1295_v7, %v5155_v8  ;;  %v1781_v12 = vpop.permute.xlu0 %1780 }
 0x389   :  { %v2851_v63 = vsel %vm5329_vm7, 1.0, %v4810_v10  ;;  %v2946_v22 = vsel %vm6790_vm3, 1.0, %v4810_v10  ;;  %v2947_v49 = vsel %vm6789_vm11, 1.0, %v4810_v10  ;;  %vm2520_vm7 = vcmp.lt.s32.totalorder %v4271_v14, 12 }
 0x38a   :  { %v1429_v29 = vsel %vm1426_vm0, %v4027_v42, %v4028_v17  ;;  %v1368_v6 = vmul.f32 %v4038_v45, %v5196_v31  ;;  %v4065_v23 = vpack.i.bf16 %v2947_v49, %v2946_v22  ;;  %v2742_v24 = vsel %vm2520_vm7, 1.0, %v4810_v10 }
 0x38b   :  { %v1438_v57 = vmul.f32 %v1429_v29, %v5168_v0 }
 0x38c   :  { %1650 = vrot.lane.b32.xlu0 %v1638_v50, %s4189_s5  ;;  %1778 = vrot.lane.b32.xlu1 %v1765_v38, %s4184_s12  ;;  %v1439_v50 = vmul.f32 %v4028_v17, %v5196_v31  ;;  %v1358_v38 = vsel %vm6867_vm2, %v4037_v13, %v4038_v45  ;;  %vm2313_vm2 = vcmp.ge.s32.totalorder %v4271_v14, 4 }
 0x38d   :  { %v1367_v41 = vmul.f32 %v1358_v38, %v5168_v0 }
 0x390   :  { %1579 = vrot.lane.b32.xlu0 %v1568_v48, %s4182_s29  ;;  %1646 = vrot.lane.b32.xlu1 %v1636_v46, %s4189_s5  ;;  %v1296_v48 = vsel %vm6868_vm4, %v4047_v51, %v4048_v62  ;;  %vm2314_vm4 = vcmp.ge.s32.totalorder %v4278_v19, 4 }
 0x391   :  { %v1305_v46 = vmul.f32 %v1296_v48, %v5168_v0  ;;  %vm2845_vm10 = vmand %vm6789_vm11, %vm2314_vm4  ;;  %vm2312_vm11 = vcmp.ge.s32.totalorder %v4306_v34, 4 }
 0x392   :  { %v2849_v13 = vsel %vm2845_vm10, 1.0, %v4810_v10 }
 0x394   :  { %1713 = vrot.lane.b32.xlu0 %v1700_v56, %s4183_s30  ;;  %1581 = vrot.lane.b32.xlu1 %v1569_v54, %s4182_s29  ;;  %v2949_v56 = vsel %vm6786_vm8, 1.0, %v4810_v10  ;;  %v2037_v54 = vld [vmem:[%s6768_s7] sm:$0xff]  ;;  %vm2844_vm8 = vmand %vm6790_vm3, %vm2313_vm2  ;;  %s4190_s7 = smov 64  }
 0x398   :  { %1577 = vrot.lane.b32.xlu0 %v1567_v44, %s4182_s29  ;;  %1652 = vrot.lane.b32.xlu1 %v1639_v3, %s4189_s5  ;;  %v4070_v44 = vpack.i.bf16 %v2949_v56, %v2948_v53  ;;  %v2850_v3 = vsel %vm5321_vm5, 1.0, %v4810_v10  ;;  %vm6791_vm5 = vcmp.lt.s32.totalorder %v4282_v21, 12 }
 0x399   :  { %v2745_v16 = vsel %vm6791_vm5, 1.0, %v4810_v10  ;;  %vm2527_vm3 = vmand %vm2312_vm11, %vm6791_vm5  ;;  %vm6875_vm5 = vcmask 785408  }
 0x39a   :  { %v2531_v5 = vsel %vm2527_vm3, 1.0, %v4810_v10  ;;  %vm6873_vm3 = vcmask 769024  }
 0x39c   :  { %1511 = vrot.lane.b32.xlu0 %v1499_v1, %s4188_s16  ;;  %1509 = vrot.lane.b32.xlu1 %v1498_v27, %s4188_s16  ;;  %v2848_v1 = vsel %vm2844_vm8, 1.0, %v4810_v10  ;;  %v4080_v27 = vpack.i.bf16 %v2851_v63, %v2850_v3  ;;  %vm2311_vm8 = vcmp.ge.s32.totalorder %v4304_v33, 4 }
 0x39d   :  { %v4075_v42 = vpack.i.bf16 %v2849_v13, %v2848_v1  ;;  %vm2526_vm10 = vmand %vm2311_vm8, %vm6792_vm1 }
 0x39e   :  { %v2530_v35 = vsel %vm2526_vm10, 1.0, %v4810_v10  ;;  %vm6874_vm10 = vmmov %vm6873_vm3 }
 0x39f   :  { %v4110_v9 = vpack.i.bf16 %v2531_v5, %v2530_v35  ;;  %vm6876_vm1 = vmmov %vm6875_vm5 }
 0x3a0   :  { %1447 = vrot.lane.b32.xlu0 %v1436_v28, %s4187_s15  ;;  %1583 = vrot.lane.b32.xlu1 %v1570_v32, %s4182_s29  ;;  %v2743_v28 = vsel %vm6794_vm15, 1.0, %v4810_v10  ;;  %v4090_v32 = vpack.i.bf16 %v2745_v16, %v2744_v37 }
 0x3a1   :  { %v4085_v55 = vpack.i.bf16 %v2743_v28, %v2742_v24 }
 0x3a4   :  { %1378 = vrot.lane.b32.xlu0 %v1366_v47, %s4186_s14  ;;  %1449 = vrot.lane.b32.xlu1 %v1437_v60, %s4187_s15  ;;  %v2629_v47 = vsel %vm6793_vm6, 1.0, %v4810_v10  ;;  %vm6877_vm6 = vmmov %vm6873_vm3 }
 0x3a5   :  { %v4100_v60 = vpack.i.bf16 %v2629_v47, %v2628_v52 }
 0x3a8   :  { %1515 = vrot.lane.b32.xlu0 %v1501_v40, %s4188_s16  ;;  %1376 = vrot.lane.b32.xlu1 %v1365_v36, %s4186_s14  ;;  %v1655_v40 = vpop.permute.xlu0 %1654  ;;  %v1716_v36 = vpop.permute.xlu1 %1715 }
 0x3ac   :  { %1314 = vrot.lane.b32.xlu0 %v1303_v58, %s4185_s13  ;;  %1513 = vrot.lane.b32.xlu1 %v1500_v15, %s4188_s16  ;;  %v1586_v25 = vpop.permute.xlu0 %1585  ;;  %v1508_v17 = vpop.permute.xlu1 %1507 }
 0x3b0   :  { %1451 = vrot.lane.b32.xlu0 %v1438_v57, %s4187_s15  ;;  %1316 = vrot.lane.b32.xlu1 %v1304_v11, %s4185_s13  ;;  %v5401_v61 = vpop.permute.xlu0 %1445 }
 0x3b4   :  { %1382 = vrot.lane.b32.xlu0 %v1368_v6, %s4186_s14  ;;  %1453 = vrot.lane.b32.xlu1 %v1439_v50, %s4187_s15 }
 0x3b8   :  { %1320 = vrot.lane.b32.xlu0 %v1306_v4, %s4185_s13  ;;  %1380 = vrot.lane.b32.xlu1 %v1367_v41, %s4186_s14 }
 0x3bc   :  { %1318 = vrot.lane.b32.xlu1 %v1305_v46, %s4185_s13  ;;  %4050 = vrot.lane.b32.xlu0 %v4059_v59, %s4182_s29 }
 0x3c0   :  { %4060 = vrot.lane.b32.xlu1 %v4059_v59, %s4184_s12  ;;  %4055 = vrot.lane.b32.xlu0 %v4059_v59, %s4183_s30 }
 0x3c4   :  { %2235 = vperm.xlu1 %3958, %v2037_v54   ;;  %2240 = vperm.xlu0 %4064, %v2038_v39  }
 0x3c8   :  { %4071 = vrot.lane.b32.xlu0 %v4070_v44, %s4190_s7  ;;  %4066 = vrot.lane.b32.xlu1 %v4065_v23, %s4190_s7 }
 0x3cc   :  { %4081 = vrot.lane.b32.xlu0 %v4080_v27, %s4191_s22  ;;  %4076 = vrot.lane.b32.xlu1 %v4075_v42, %s4191_s22 }
 0x3d0   :  { %4091 = vrot.lane.b32.xlu0 %v4090_v32, %s4192_s23  ;;  %4086 = vrot.lane.b32.xlu1 %v4085_v55, %s4192_s23 }
 0x3d4   :  { %4101 = vrot.lane.b32.xlu0 %v4100_v60, %s4193_s24 }
 0x3d8   :  { %4111 = vrot.lane.b32.xlu0 %v4110_v9, %s4194_s25 }
 0x3ea   :  { %v5403_v51 = vpop.permute.xlu1 %1374 }
 0x3ee   :  { %v5405_v58 = vpop.permute.xlu0 %1312  ;;  %v1775_v15 = vpop.permute.xlu1 %1774 }
 0x3f2   :  { %v1777_v10 = vpop.permute.xlu0 %1776  ;;  %v1773_v29 = vpop.permute.xlu1 %1772 }
 0x3f3   :  { %v1783_v7 = vsel %vm6873_vm3, %v1775_v15, %v1777_v10  ;;  %v1782_v45 = vsel %vm6874_vm10, %v1773_v29, %v1775_v15  ;;  %vm6879_vm10 = vmmov %vm6875_vm5 }
 0x3f4   :  { %1853 = vmatprep.subr.mxu0 %v1783_v7 }
 0x3f5   :  { %1854 = vmatpush1.msra.mxu0 %v1782_v45  ;;  %v1795_v45 = vld [vmem:[%s6769_s2 + $0x8] sm:$0xff] }
 0x3f6   :  { %v1710_v57 = vpop.permute.xlu0 %1709  ;;  %v1712_v11 = vpop.permute.xlu1 %1711 }
 0x3f7   :  { %v1718_v6 = vsel %vm6875_vm5, %v1710_v57, %v1712_v11 }
 0x3f8   :  { %1855 = vmatprep.subr.mxu0 %v1718_v6 }
 0x3fa   :  { %v1708_v62 = vpop.permute.xlu0 %1707  ;;  %v1649_v50 = vpop.permute.xlu1 %1648 }
 0x3fb   :  { %v1717_v38 = vsel %vm6876_vm1, %v1708_v62, %v1710_v57  ;;  %vm6878_vm1 = vcmask 1031168  }
 0x3fc   :  { %1856 = vmatpush1.msra.mxu0 %v1717_v38 }
 0x3fe   :  { %v1651_v4 = vpop.permute.xlu0 %1650  ;;  %v1779_v41 = vpop.permute.xlu1 %1778 }
 0x3ff   :  { %v1657_v48 = vsel %vm1426_vm0, %v1649_v50, %v1651_v4  ;;  %v1785_v46 = vsel %vm6877_vm6, %v1779_v41, %v1781_v12  ;;  %v1784_v59 = vsel %vm6873_vm3, %v1777_v10, %v1779_v41  ;;  %vm6880_vm6 = vmmov %vm6878_vm1  ;;  %v5445_v10 = vld [vmem:[#allocation2] sm:$0xff] }
 0x400   :  { %1857 = vmatprep.subr.mxu0 %v1657_v48  ;;  %1930 = vmatprep.subr.mxu1 %v1785_v46  ;;  %vm6881_vm3 = vmmov %vm6878_vm1  ;;  %v2627_v41 = vsel %vm2314_vm4, 1.0, %v5445_v10 }
 0x401   :  { %1931 = vmatpush1.msra.mxu1 %v1784_v59 }
 0x402   :  { %v1580_v53 = vpop.permute.xlu0 %1579  ;;  %v1647_v56 = vpop.permute.xlu1 %1646 }
 0x403   :  { %v1656_v54 = vsel %vm1426_vm0, %v1647_v56, %v1649_v50 }
 0x404   :  { %1858 = vmatpush1.msra.mxu0 %v1656_v54 }
 0x406   :  { %v1714_v39 = vpop.permute.xlu0 %1713  ;;  %v1582_v2 = vpop.permute.xlu1 %1581 }
 0x407   :  { %v1588_v43 = vsel %vm6878_vm1, %v1580_v53, %v1582_v2  ;;  %v1720_v44 = vsel %vm6875_vm5, %v1714_v39, %v1716_v36  ;;  %v1719_v3 = vsel %vm6879_vm10, %v1712_v11, %v1714_v39  ;;  %vm1832_vm5 = vcmask 588800  }
 0x408   :  { %1859 = vmatprep.subr.mxu0 %v1588_v43  ;;  %1932 = vmatprep.subr.mxu1 %v1720_v44 }
 0x409   :  { %1933 = vmatpush1.msra.mxu1 %v1719_v3 }
 0x40a   :  { %v1578_v63 = vpop.permute.xlu0 %1577  ;;  %v1653_v22 = vpop.permute.xlu1 %1652 }
 0x40b   :  { %v1587_v49 = vsel %vm6880_vm6, %v1578_v63, %v1580_v53  ;;  %v1659_v23 = vsel %vm1426_vm0, %v1653_v22, %v1655_v40  ;;  %v1658_v1 = vsel %vm1426_vm0, %v1651_v4, %v1653_v22  ;;  %vm6882_vm0 = vmmov %vm6878_vm1  ;;  %vm6883_vm1 = vcmask 277504  }
 0x40c   :  { %1860 = vmatpush1.msra.mxu0 %v1587_v49  ;;  %1934 = vmatprep.subr.mxu1 %v1659_v23  ;;  %vm6884_vm10 = vmmov %vm6883_vm1  ;;  %v2626_v4 = vsel %vm2313_vm2, 1.0, %v5445_v10 }
 0x40d   :  { %1861 = vmatprep.subr.mxu0 %v5155_v8  ;;  %1935 = vmatpush1.msra.mxu1 %v1658_v1  ;;  %vm6886_vm6 = vmmov %vm6883_vm1  ;;  %v4095_v48 = vpack.i.bf16 %v2627_v41, %v2626_v4 }
 0x40e   :  { %v1512_v27 = vpop.permute.xlu0 %1511  ;;  %1862 = vmatpush1.msra.mxu0 %v5171_v18  ;;  %v1510_v37 = vpop.permute.xlu1 %1509 }
 0x40f   :  { %v1519_v13 = vsel %vm1517_vm12, %v1510_v37, %v1512_v27  ;;  %v1518_v16 = vsel %vm1517_vm12, %v1508_v17, %v1510_v37  ;;  %v1794_v17 = vld [vmem:[%s6769_s2] sm:$0xff]  ;;  %4096 = vrot.lane.b32.xlu1 %v4095_v48, %s4193_s24 }
 0x410   :  { %1863 = vmatprep.subr.mxu0 %v1519_v13 }
 0x411   :  { %1864 = vmatpush1.msra.mxu0 %v1518_v16 }
 0x412   :  { %v1448_v42 = vpop.permute.xlu0 %1447  ;;  %v1584_v24 = vpop.permute.xlu1 %1583 }
 0x413   :  { %v1590_v28 = vsel %vm6881_vm3, %v1584_v24, %v1586_v25  ;;  %v1589_v32 = vsel %vm6882_vm0, %v1582_v2, %v1584_v24  ;;  %v1456_v52 = vsel %vm1455_vm14, %v5401_v61, %v1448_v42 }
 0x414   :  { %1936 = vmatprep.subr.mxu1 %v1590_v28 }
 0x415   :  { %1937 = vmatpush1.msra.mxu1 %v1589_v32 }
 0x416   :  { %v1379_v8 = vpop.permute.xlu0 %1378  ;;  %1938 = vmatprep.subr.mxu1 %v5196_v31  ;;  %v1450_v55 = vpop.permute.xlu1 %1449 }
 0x417   :  { %1939 = vmatpush1.msra.mxu1 %v5168_v0  ;;  %v1457_v18 = vsel %vm1455_vm14, %v1448_v42, %v1450_v55 }
 0x418   :  { %1865 = vmatprep.subr.mxu0 %v1457_v18 }
 0x419   :  { %1866 = vmatpush1.msra.mxu0 %v1456_v52 }
 0x41a   :  { %v1516_v47 = vpop.permute.xlu0 %1515  ;;  %v1377_v60 = vpop.permute.xlu1 %1376 }
 0x41b   :  { %v1386_v35 = vsel %vm1384_vm13, %v1377_v60, %v1379_v8  ;;  %v1385_v5 = vsel %vm1384_vm13, %v5403_v51, %v1377_v60 }
 0x41c   :  { %1867 = vmatprep.subr.mxu0 %v1386_v35 }
 0x41d   :  { %1868 = vmatpush1.msra.mxu0 %v1385_v5 }
 0x41e   :  { %v1315_v31 = vpop.permute.xlu0 %1314  ;;  %v1514_v9 = vpop.permute.xlu1 %1513 }
 0x41f   :  { %v1521_v0 = vsel %vm1517_vm12, %v1514_v9, %v1516_v47  ;;  %v1520_v12 = vsel %vm1517_vm12, %v1512_v27, %v1514_v9  ;;  %v1323_v61 = vsel %vm6884_vm10, %v5405_v58, %v1315_v31  ;;  %vm6885_vm12 = vmmov %vm6883_vm1 }
 0x420   :  { %1940 = vmatprep.subr.mxu1 %v1521_v0 }
 0x421   :  { %1941 = vmatpush1.msra.mxu1 %v1520_v12 }
 0x422   :  { %v1452_v40 = vpop.permute.xlu0 %1451  ;;  %v1317_v36 = vpop.permute.xlu1 %1316 }
 0x423   :  { %v1324_v25 = vsel %vm6883_vm1, %v1315_v31, %v1317_v36  ;;  %v1458_v7 = vsel %vm1455_vm14, %v1450_v55, %v1452_v40  ;;  %vm2319_vm1 = vmand %vm2311_vm8, %vm2315_vm9 }
 0x424   :  { %1869 = vmatprep.subr.mxu0 %v1324_v25 }
 0x425   :  { %1870 = vmatpush1.msra.mxu0 %v1323_v61 }
 0x426   :  { %v1454_v51 = vpop.permute.xlu1 %1453  ;;  %3816 = vmatmul.mubr.msk.f32.vlgmr.msra.gmra.mxu0 %vm1832_vm5, %v1794_v17  ;;  %v1383_v29 = vpop.permute.xlu0 %1382 }
 0x427   :  { %v1459_v15 = vsel %vm1455_vm14, %v1452_v40, %v1454_v51  ;;  %1909 = vmatprep.mubr.f32.mxu0 %v5445_v10  ;;  %vm2310_vm14 = vcmp.ge.s32.totalorder %v4302_v30, 4  ;;  %v2423_v51 = vsel %vm2311_vm8, 1.0, %v5445_v10 }
 0x428   :  { %1942 = vmatprep.subr.mxu1 %v1459_v15  ;;  %vm2525_vm0 = vmand %vm2310_vm14, %vm6794_vm15  ;;  %v2422_v54 = vsel %vm2310_vm14, 1.0, %v5445_v10  ;;  %v2424_v15 = vsel %vm2312_vm11, 1.0, %v5445_v10  ;;  %vm6891_vm15 = vcmp.lt.s32.totalorder %v4306_v34, 12 }
 0x429   :  { %1943 = vmatpush1.msra.mxu1 %v1458_v7  ;;  %v2529_v59 = vsel %vm2525_vm0, 1.0, %v5445_v10  ;;  %v2323_v7 = vsel %vm2319_vm1, 1.0, %v5445_v10  ;;  %vm6890_vm0 = vcmp.lt.s32.totalorder %v4282_v21, 12 }
 0x42a   :  { %v1381_v58 = vpop.permute.xlu1 %1380  ;;  %3817 = vmatmul.mubr.msk.f32.gmra.mxu0 %vm1832_vm5, %v1795_v45  ;;  %v1321_v6 = vpop.permute.xlu0 %1320  ;;  %vm3047_vm9 = vmand %vm6891_vm15, %vm6890_vm0 }
 0x42b   :  { %v1388_v57 = vsel %vm1384_vm13, %v1381_v58, %v1383_v29  ;;  %v1387_v11 = vsel %vm1384_vm13, %v1379_v8, %v1381_v58  ;;  %vm2309_vm13 = vcmp.ge.s32.totalorder %v4291_v26, 4  ;;  %v4120_v29 = vpack.i.bf16 %v2424_v15, %v2423_v51 }
 0x42c   :  { %1944 = vmatprep.subr.mxu1 %v1388_v57  ;;  %vm2524_vm3 = vmand %vm2309_vm13, %vm2520_vm7  ;;  %v2421_v56 = vsel %vm2309_vm13, 1.0, %v5445_v10 }
 0x42d   :  { %1945 = vmatpush1.msra.mxu1 %v1387_v11  ;;  %v2528_v46 = vsel %vm2524_vm3, 1.0, %v5445_v10  ;;  %v4115_v39 = vpack.i.bf16 %v2422_v54, %v2421_v56  ;;  %vm2317_vm15 = vmand %vm2309_vm13, %vm2313_vm2  ;;  %vm6892_vm2 = vcmp.lt.s32.totalorder %v4291_v26, 12  ;;  %vm6895_vm13 = vcmp.lt.s32.totalorder %v4302_v30, 12 }
 0x42e   :  { %v1319_v62 = vpop.permute.xlu1 %1318  ;;  %v4105_v53 = vpack.i.bf16 %v2529_v59, %v2528_v46  ;;  %v5553_v9 = vpop.permute.xlu0 %4050  ;;  %vm3044_vm8 = vmand %vm6892_vm2, %vm2520_vm7  ;;  %vm6915_vm7 = vcmask 1031168  }
 0x42f   :  { %v1326_v50 = vsel %vm6885_vm12, %v1319_v62, %v1321_v6  ;;  %v1325_v38 = vsel %vm6886_vm6, %v1317_v36, %v1319_v62  ;;  %vm6888_vm12 = vcmp.lt.s32.totalorder %v4280_v20, 12  ;;  %vm6889_vm6 = vcmp.lt.s32.totalorder %v4304_v33, 12  ;;  %vm6916_vm1 = vmmov %vm6915_vm7 }
 0x430   :  { %1946 = vmatprep.subr.mxu1 %v1326_v50  ;;  %4106 = vrot.lane.b32.xlu1 %v4105_v53, %s4194_s25  ;;  %vm3046_vm3 = vmand %vm6889_vm6, %vm6888_vm12  ;;  %v3051_v62 = vsel %vm3047_vm9, 1.0, %v5445_v10  ;;  %vm6921_vm12 = vcmask 785408   ;;  %vm6925_vm9 = vcmask 769024  }
 0x431   :  { %1947 = vmatpush1.msra.mxu1 %v1325_v38  ;;  %v3050_v6 = vsel %vm3046_vm3, 1.0, %v5445_v10  ;;  %vm6922_vm6 = vmmov %vm6921_vm12 }
 0x432   :  { %3818 = vmatmul.mubr.msk.f32.vlgmr.msra.gmra.mxu1 %vm1832_vm5, %v1794_v17  ;;  %v5555_v0 = vpop.permute.xlu1 %4060  ;;  %v5558_v40 = vpop.permute.xlu0 %4055  ;;  %v4140_v38 = vpack.i.bf16 %v3051_v62, %v3050_v6  ;;  %vm6923_vm3 = vmmov %vm6922_vm6 }
 0x433   :  { %1986 = vmatprep.mubr.f32.mxu1 %v5445_v10  ;;  %vm6924_vm0 = vmmov %vm6923_vm3 }
 0x434   :  { %4116 = vrot.lane.b32.xlu1 %v4115_v39, %s4190_s7  ;;  %vm6928_vm2 = vmmov %vm6925_vm9 }
 0x436   :  { %3819 = vmatmul.mubr.msk.f32.gmra.mxu1 %vm1832_vm5, %v1795_v45  ;;  %vm6887_vm5 = vcmp.ge.s32.totalorder %v4282_v21, 4 }
 0x437   :  { %vm2320_vm10 = vmand %vm2312_vm11, %vm6887_vm5 }
 0x438   :  { %v2324_v45 = vsel %vm2320_vm10, 1.0, %v5445_v10  ;;  %vm2318_vm11 = vmand %vm2310_vm14, %vm2314_vm4  ;;  %vm6894_vm4 = vcmp.lt.s32.totalorder %v4278_v19, 12 }
 0x439   :  { %v4130_v11 = vpack.i.bf16 %v2324_v45, %v2323_v7  ;;  %vm3045_vm14 = vmand %vm6895_vm13, %vm6894_vm4  ;;  %vm2437_vm13 = vcmask 523264  }
 0x43a   :  { %vm6917_vm5 = vmmov %vm6916_vm1 }
 0x43b   :  { %vm6918_vm10 = vmmov %vm6916_vm1 }
 0x43c   :  { %vm6930_vm4 = vmmov %vm6916_vm1 }
 0x43f   :  { %v5561_v25 = vpop.permute.xlu1 %2235  ;;  %v5563_v17 = vpop.permute.xlu0 %2240 }
 0x443   :  { %v5565_v61 = vpop.permute.xlu1 %4066  ;;  %v5591_v58 = vpop.permute.xlu0 %4071 }
 0x444   :  { %v6800_v50 = vunpack.i.h.bf16 %v5591_v58 }
 0x446   :  { %v2979_v46 = vmul.f32 %v5445_v10, %v6800_v50 }
 0x447   :  { %v5593_v57 = vpop.permute.xlu1 %4076  ;;  %v5600_v4 = vpop.permute.xlu0 %4081 }
 0x448   :  { %v6799_v48 = vunpack.i.h.bf16 %v5600_v4 }
 0x44a   :  { %v2881_v54 = vmul.f32 %v5445_v10, %v6799_v48 }
 0x44b   :  { %v5602_v41 = vpop.permute.xlu1 %4086  ;;  %v5611_v59 = vpop.permute.xlu0 %4091 }
 0x44c   :  { %v6798_v56 = vunpack.i.h.bf16 %v5611_v59 }
 0x44e   :  { %v2775_v39 = vmul.f32 %v5445_v10, %v6798_v56 }
 0x481   :  { %v5613_v53 = vpop.permute.xlu1 %4096 }
 0x4e6   :  { %v5487_v2 = vpop.f32.mrf.mxu0 }
 0x4e7   :  { %v2005_v23 = vmul.f32 %v5487_v2, %v5487_v2 }
 0x4e8   :  { %v5489_v43 = vpop.f32.mrf.mxu0 }
 0x4e9   :  { %v1993_v44 = vadd.f32 %v5489_v43, %v5487_v2  ;;  %v2006_v1 = vmul.f32 %v5489_v43, %v5489_v43 }
 0x4ea   :  { %v5531_v28 = vpop.f32.mrf.mxu0 }
 0x4eb   :  { %v2013_v27 = vadd.f32 %v2006_v1, %v2005_v23  ;;  %v2009_v8 = vmul.f32 %v5531_v28, %v5531_v28  ;;  %v6797_v23 = vunpack.i.l.bf16 %v5613_v53 }
 0x4ec   :  { %v5539_v32 = vpop.f32.mrf.mxu0 }
 0x4ed   :  { %v2010_v55 = vmul.f32 %v5539_v32, %v5539_v32  ;;  %v1998_v31 = vadd.f32 %v5539_v32, %v5531_v28 }
 0x4ef   :  { %v2018_v52 = vadd.f32 %v2010_v55, %v2009_v8 }
 0x4f2   :  { %v5493_v3 = vpop.f32.mrf.mxu1 }
 0x4f3   :  { %v1994_v63 = vadd.f32 %v1993_v44, %v5493_v3  ;;  %2071 = vrot.lane.b32.xlu1 %v5493_v3, %s4182_s29  ;;  %v2007_v37 = vmul.f32 %v5493_v3, %v5493_v3  ;;  %v2321_v44 = vsel %vm2317_vm15, 1.0, %v5445_v10  ;;  %vm6926_vm15 = vmmov %vm6925_vm9 }
 0x4f4   :  { %v5498_v22 = vpop.f32.mrf.mxu1 }
 0x4f5   :  { %v1995_v49 = vadd.f32 %v1994_v63, %v5498_v22  ;;  %v2008_v13 = vmul.f32 %v5498_v22, %v5498_v22  ;;  %v2014_v16 = vadd.f32 %v2013_v27, %v2007_v37  ;;  %v2322_v63 = vsel %vm2318_vm11, 1.0, %v5445_v10  ;;  %vm6927_vm11 = vmmov %vm6925_vm9 }
 0x4f6   :  { %v5527_v24 = vpop.f32.mrf.mxu1  ;;  %v4125_v1 = vpack.i.bf16 %v2322_v63, %v2321_v44  ;;  %v3048_v27 = vsel %vm3044_vm8, 1.0, %v5445_v10  ;;  %v3049_v37 = vsel %vm3045_vm14, 1.0, %v5445_v10  ;;  %vm6929_vm8 = vmmov %vm6916_vm1 }
 0x4f7   :  { %1996 = vadd.xlane.f32.xlu0 %v1995_v49  ;;  %2067 = vrot.lane.b32.xlu1 %v5487_v2, %s4182_s29  ;;  %v2015_v42 = vadd.f32 %v2014_v16, %v2008_v13  ;;  %v2011_v18 = vmul.f32 %v5527_v24, %v5527_v24  ;;  %v1999_v12 = vadd.f32 %v1998_v31, %v5527_v24  ;;  %v5642_v49 = vpop.permute.xlu1 %4106  ;;  %vm6931_vm14 = vmmov %vm6916_vm1 }
 0x4f8   :  { %v5547_v47 = vpop.f32.mrf.mxu1  ;;  %6893 = vst [vmem:[#allocation4_spill] sm:$0xff] %v5642_v49  ;;  %v6796_v13 = vunpack.i.l.bf16 %v5642_v49  ;;  %v2651_v16 = vmul.f32 %v5445_v10, %v6797_v23  ;;  %v4135_v8 = vpack.i.bf16 %v3049_v37, %v3048_v27 }
 0x4f9   :  { %v2012_v60 = vmul.f32 %v5547_v47, %v5547_v47  ;;  %v2019_v35 = vadd.f32 %v2018_v52, %v2011_v18  ;;  %v2000_v36 = vadd.f32 %v1999_v12, %v5547_v47 }
 0x4fa   :  { %v2552_v18 = vmul.f32 %v5445_v10, %v6796_v13 }
 0x4fb   :  { %2159 = vrot.lane.b32.xlu1 %v5493_v3, %s4184_s12  ;;  %v2020_v5 = vadd.f32 %v2019_v35, %v2012_v60  ;;  %v5678_v60 = vpop.permute.xlu0 %4101 }
 0x4ff   :  { %v5680_v35 = vpop.permute.xlu0 %4111 }
 0x500   :  { %6897 = vst [vmem:[#allocation6_spill] sm:$0xff] %v5680_v35 }
 0x50d   :  { %2115 = vrot.lane.b32.xlu0 %v5493_v3, %s4183_s30 }
 0x511   :  { %2111 = vrot.lane.b32.xlu0 %v5487_v2, %s4183_s30 }
 0x515   :  { %2155 = vrot.lane.b32.xlu0 %v5487_v2, %s4184_s12 }
 0x519   :  { %2069 = vrot.lane.b32.xlu0 %v5489_v43, %s4182_s29 }
 0x51d   :  { %2073 = vrot.lane.b32.xlu0 %v5498_v22, %s4182_s29 }
 0x51f   :  { %2016 = vadd.xlane.f32.xlu1 %v2015_v42  ;;  %v5658_v42 = vpop.permute.xlu1 %4116 }
 0x520   :  { %6896 = vst [vmem:[#allocation5_spill] sm:$0xff] %v5658_v42  ;;  %v6795_v55 = vunpack.i.l.bf16 %v5658_v42 }
 0x521   :  { %2157 = vrot.lane.b32.xlu0 %v5489_v43, %s4184_s12 }
 0x522   :  { %v2446_v52 = vmul.f32 %v5445_v10, %v6795_v55 }
 0x525   :  { %2161 = vrot.lane.b32.xlu0 %v5498_v22, %s4184_s12 }
 0x529   :  { %2125 = vrot.lane.b32.xlu0 %v5527_v24, %s4183_s30 }
 0x52d   :  { %2121 = vrot.lane.b32.xlu0 %v5531_v28, %s4183_s30 }
 0x530   :  { %2113 = vrot.lane.b32.xlu1 %v5489_v43, %s4183_s30 }
 0x534   :  { %2117 = vrot.lane.b32.xlu1 %v5498_v22, %s4183_s30 }
 0x54c   :  { %2021 = vadd.xlane.f32.xlu0 %v2020_v5 }
 0x558   :  { %2001 = vadd.xlane.f32.xlu1 %v2000_v36 }
 0x562   :  { %4121 = vrot.lane.b32.xlu0 %v4120_v29, %s4190_s7 }
 0x565   :  { %v5688_v51 = vpop.permute.xlu1 %2071 }
 0x566   :  { %4131 = vrot.lane.b32.xlu0 %v4130_v11, %s4191_s22 }
 0x569   :  { %2081 = vrot.lane.b32.xlu1 %v5527_v24, %s4182_s29  ;;  %v5692_v29 = vpop.permute.xlu1 %2067 }
 0x56a   :  { %4141 = vrot.lane.b32.xlu0 %v4140_v38, %s4194_s25 }
 0x56d   :  { %2077 = vrot.lane.b32.xlu1 %v5531_v28, %s4182_s29  ;;  %v5696_v45 = vpop.permute.xlu1 %2159 }
 0x56e   :  { %3008 = vrot.lane.b32.xlu0 %v2979_v46, %s4190_s7 }
 0x571   :  { %2169 = vrot.lane.b32.xlu1 %v5527_v24, %s4184_s12 }
 0x572   :  { %2910 = vrot.lane.b32.xlu0 %v2881_v54, %s4194_s25 }
 0x575   :  { %2165 = vrot.lane.b32.xlu1 %v5531_v28, %s4184_s12 }
 0x576   :  { %2804 = vrot.lane.b32.xlu0 %v2775_v39, %s4193_s24 }
 0x579   :  { %4126 = vrot.lane.b32.xlu1 %v4125_v1, %s4191_s22 }
 0x57a   :  { %2671 = vrot.lane.b32.xlu0 %v2651_v16, %s4192_s23 }
 0x57d   :  { %4136 = vrot.lane.b32.xlu1 %v4135_v8, %s4194_s25 }
 0x57e   :  { %2572 = vrot.lane.b32.xlu0 %v2552_v18, %s4191_s22 }
 0x580   :  { %v1997_v5 = vpop.xlane.xlu0 %1996 }
 0x581   :  { %2998 = vrot.lane.b32.xlu1 %v2979_v46, %s4190_s7 }
 0x582   :  { %2466 = vrot.lane.b32.xlu0 %v2446_v52, %s4190_s7 }
 0x584   :  { %v5682_v31 = vpop.permute.xlu0 %2115 }
 0x585   :  { %2900 = vrot.lane.b32.xlu1 %v2881_v54, %s4194_s25 }
 0x588   :  { %v5684_v12 = vpop.permute.xlu0 %2111 }
 0x589   :  { %2794 = vrot.lane.b32.xlu1 %v2775_v39, %s4193_s24 }
 0x58c   :  { %v5686_v36 = vpop.permute.xlu0 %2155 }
 0x58d   :  { %2681 = vrot.lane.b32.xlu1 %v2651_v16, %s4192_s23  ;;  %v5716_v16 = vmul.f32 0.0078125, %v1997_v5 }
 0x58f   :  { %v2025_v55 = vmul.f32 %v5716_v16, %v5716_v16 }
 0x590   :  { %v5690_v15 = vpop.permute.xlu0 %2069 }
 0x591   :  { %2582 = vrot.lane.b32.xlu1 %v2552_v18, %s4191_s22 }
 0x594   :  { %v5694_v7 = vpop.permute.xlu0 %2073 }
 0x595   :  { %2476 = vrot.lane.b32.xlu1 %v2446_v52, %s4190_s7 }
 0x598   :  { %v5698_v11 = vpop.permute.xlu0 %2157 }
 0x59c   :  { %v5700_v62 = vpop.permute.xlu0 %2161 }
 0x5a0   :  { %v5704_v46 = vpop.permute.xlu0 %2125 }
 0x5a4   :  { %v5708_v39 = vpop.permute.xlu0 %2121 }
 0x5a8   :  { %v2017_v6 = vpop.xlane.xlu1 %2016 }
 0x5a9   :  { %v2023_v8 = vmul.f32 0.0078125, %v2017_v6 }
 0x5ab   :  { %v2027_v23 = vsub.f32 %v2023_v8, %v2025_v55 }
 0x5ac   :  { %v5702_v38 = vpop.permute.xlu1 %2113 }
 0x5ad   :  { %v2029_v42 = vadd.f32 1e-05, %v2027_v23  ;;  %v2033_v23 = vld [vmem:[%s6770_s6] sm:$0xff] }
 0x5af   :  { %4147 = vrsqrt.f32 %v2029_v42 }
 0x5b0   :  { %v5706_v54 = vpop.permute.xlu1 %2117 }
 0x5d5   :  { %v2022_v63 = vpop.xlane.xlu0 %2021 }
 0x5d6   :  { %v2024_v50 = vmul.f32 0.0078125, %v2022_v63  ;;  %v2034_v63 = vld [vmem:[%s6770_s6 + $0x8] sm:$0xff] }
 0x5d9   :  { %v5712_v27 = vpop.permute.xlu0 %4121 }
 0x5da   :  { %6898 = vst [vmem:[#allocation7_spill] sm:$0xff] %v5712_v27 }
 0x5dd   :  { %v5724_v13 = vpop.permute.xlu0 %4131 }
 0x5e1   :  { %v2002_v44 = vpop.xlane.xlu1 %2001  ;;  %v5730_v27 = vpop.permute.xlu0 %4141 }
 0x5e2   :  { %v5718_v18 = vmul.f32 0.0078125, %v2002_v44  ;;  %6899 = vst [vmem:[#allocation8_spill] sm:$0xff] %v5730_v27  ;;  %v6807_v44 = vunpack.i.h.bf16 %v5730_v27 }
 0x5e4   :  { %v2026_v56 = vmul.f32 %v5718_v18, %v5718_v18 }
 0x5e5   :  { %v5710_v1 = vpop.permute.xlu1 %2081 }
 0x5e6   :  { %v2028_v5 = vsub.f32 %v2024_v50, %v2026_v56  ;;  %v5744_v50 = vmul.f32 %v5445_v10, %v6807_v44  ;;  %v4148_v56 = vpop.eup %4147 }
 0x5e7   :  { %v2035_v42 = vmul.f32 %v4148_v56, %v2033_v23 }
 0x5e8   :  { %v2030_v35 = vadd.f32 1e-05, %v2028_v5  ;;  %6901 = vst [vmem:[#allocation10_spill] sm:$0xff] %v5744_v50 }
 0x5e9   :  { %v5714_v37 = vpop.permute.xlu1 %2077 }
 0x5ea   :  { %4149 = vrsqrt.f32 %v2030_v35 }
 0x5ed   :  { %v5720_v52 = vpop.permute.xlu1 %2169 }
 0x5f1   :  { %v5728_v48 = vpop.permute.xlu1 %2165 }
 0x5f5   :  { %v5732_v6 = vpop.permute.xlu1 %4126 }
 0x5f6   :  { %6900 = vst [vmem:[#allocation9_spill] sm:$0xff] %v5732_v6  ;;  %v6808_v49 = vunpack.i.l.bf16 %v5732_v6 }
 0x5f7   :  { %v4150_v35 = vpop.eup %4149 }
 0x5f8   :  { %v2351_v55 = vmul.f32 %v5445_v10, %v6808_v49  ;;  %v2036_v8 = vmul.f32 %v4150_v35, %v2034_v63 }
 0x5f9   :  { %v5766_v5 = vpop.permute.xlu1 %4136 }
 0x5fa   :  { %2376 = vrot.lane.b32.xlu1 %v2351_v55, %s4194_s25  ;;  %2366 = vrot.lane.b32.xlu0 %v2351_v55, %s4194_s25  ;;  %6902 = vst [vmem:[#allocation11_spill] sm:$0xff] %v5766_v5  ;;  %v5768_v55 = vpop.permute.xlu0 %3008 }
 0x5fb   :  { %6903 = vst [vmem:[#allocation12_spill] sm:$0xff] %v5768_v55 }
 0x5fd   :  { %v5770_v44 = vpop.permute.xlu1 %2998 }
 0x5fe   :  { %2083 = vrot.lane.b32.xlu1 %v5547_v47, %s4182_s29  ;;  %3110 = vrot.lane.b32.xlu0 %v5744_v50, %s4191_s22  ;;  %6904 = vst [vmem:[#allocation13_spill] sm:$0xff] %v5770_v44  ;;  %v5772_v49 = vpop.permute.xlu0 %2910 }
 0x5ff   :  { %6905 = vst [vmem:[#allocation14_spill] sm:$0xff] %v5772_v49  ;;  %v4053_v49 = vunpack.i.h.bf16 %v5553_v9 }
 0x601   :  { %v5774_v56 = vpop.permute.xlu1 %2900 }
 0x602   :  { %2123 = vrot.lane.b32.xlu1 %v5539_v32, %s4183_s30  ;;  %2079 = vrot.lane.b32.xlu0 %v5539_v32, %s4182_s29  ;;  %6906 = vst [vmem:[#allocation15_spill] sm:$0xff] %v5774_v56  ;;  %v5776_v23 = vpop.permute.xlu0 %2804  ;;  %v4058_v56 = vunpack.i.h.bf16 %v5558_v40 }
 0x603   :  { %6907 = vst [vmem:[#allocation16_spill] sm:$0xff] %v5776_v23 }
 0x605   :  { %v5778_v50 = vpop.permute.xlu1 %2794 }
 0x606   :  { %2127 = vrot.lane.b32.xlu1 %v5547_v47, %s4183_s30  ;;  %2167 = vrot.lane.b32.xlu0 %v5539_v32, %s4184_s12  ;;  %6908 = vst [vmem:[#allocation17_spill] sm:$0xff] %v5778_v50  ;;  %v2087_v50 = vsel %vm6915_vm7, %v5692_v29, %v5690_v15  ;;  %v2132_v29 = vsel %vm6922_vm6, %v5702_v38, %v5682_v31  ;;  %vm6932_vm7 = vmmov %vm6916_vm1 }
 0x607   :  { %vm6939_vm6 = vmmov %vm6924_vm0 }
 0x609   :  { %v5782_v27 = vpop.permute.xlu1 %2681 }
 0x60a   :  { %2217 = vperm.xlu1 %3958, %v2035_v42   ;;  %2171 = vrot.lane.b32.xlu0 %v5547_v47, %s4184_s12  ;;  %v5780_v42 = vpop.permute.xlu0 %2671  ;;  %6910 = vst [vmem:[#allocation19_spill] sm:$0xff] %v5782_v27  ;;  %v2131_v27 = vsel %vm6921_vm12, %v5684_v12, %v5702_v38  ;;  %vm6938_vm12 = vmmov %vm6924_vm0 }
 0x60b   :  { %6909 = vst [vmem:[#allocation18_spill] sm:$0xff] %v5780_v42  ;;  %v2088_v42 = vsel %vm6916_vm1, %v5690_v15, %v5688_v51  ;;  %v2133_v15 = vsel %vm6923_vm3, %v5682_v31, %v5706_v54  ;;  %v4063_v31 = vunpack.i.h.bf16 %v5555_v0  ;;  %vm6940_vm3 = vmmov %vm6924_vm0 }
 0x60d   :  { %v5786_v63 = vpop.permute.xlu1 %2582 }
 0x60e   :  { %2222 = vperm.xlu1 %3958, %v2036_v8   ;;  %v5784_v35 = vpop.permute.xlu0 %2572  ;;  %6912 = vst [vmem:[#allocation21_spill] sm:$0xff] %v5786_v63 }
 0x60f   :  { %6911 = vst [vmem:[#allocation20_spill] sm:$0xff] %v5784_v35  ;;  %v2089_v35 = vsel %vm6917_vm5, %v5688_v51, %v5694_v7  ;;  %v2134_v51 = vsel %vm6924_vm0, %v5706_v54, %v4058_v56  ;;  %v2175_v54 = vsel %vm6925_vm9, %v5686_v36, %v5698_v11  ;;  %v4052_v36 = vunpack.i.l.bf16 %v5553_v9 }
 0x611   :  { %v5790_v55 = vpop.permute.xlu1 %2476 }
 0x612   :  { %v5788_v8 = vpop.permute.xlu0 %2466  ;;  %6914 = vst [vmem:[#allocation23_spill] sm:$0xff] %v5790_v55 }
 0x613   :  { %6913 = vst [vmem:[#allocation22_spill] sm:$0xff] %v5788_v8  ;;  %v2090_v8 = vsel %vm6918_vm10, %v5694_v7, %v4053_v49  ;;  %v2103_v49 = vadd.f32 %v2087_v50, %v5487_v2  ;;  %v2104_v7 = vadd.f32 %v2088_v42, %v5489_v43  ;;  %v2176_v2 = vsel %vm6926_vm15, %v5698_v11, %v5696_v45  ;;  %vm6937_vm10 = vmmov %vm6924_vm0 }
 0x614   :  { %v2177_v43 = vsel %vm6927_vm11, %v5696_v45, %v5700_v62  ;;  %v4069_v11 = vunpack.i.h.bf16 %v5565_v61  ;;  %vm6941_vm0 = vmmov %vm6928_vm2 }
 0x615   :  { %v2147_v12 = vadd.f32 %v2131_v27, %v2103_v49  ;;  %v2148_v23 = vadd.f32 %v2132_v29, %v2104_v7  ;;  %v2260_v7 = vand.u32 3, %v4302_v30  ;;  %vm6942_vm9 = vmmov %vm6941_vm0 }
 0x616   :  { %vm6943_vm15 = vmmov %vm6941_vm0 }
 0x617   :  { %v2192_v27 = vadd.f32 %v2176_v2, %v2148_v23  ;;  %v4073_v23 = vunpack.i.l.bf16 %v5591_v58  ;;  %vm6944_vm11 = vmmov %vm6941_vm0 }
 0x66c   :  { %v5805_v55 = vpop.permute.xlu1 %2376  ;;  %v5807_v63 = vpop.permute.xlu0 %2366 }
 0x66d   :  { %6919 = vst [vmem:[#allocation24_spill] sm:$0xff] %v5805_v55  ;;  %6920 = vst [vmem:[#allocation25_spill] sm:$0xff] %v5807_v63  ;;  %v2105_v63 = vadd.f32 %v2089_v35, %v5493_v3  ;;  %v2106_v55 = vadd.f32 %v2090_v8, %v5498_v22  ;;  %v2178_v3 = vsel %vm6928_vm2, %v5700_v62, %v4063_v31  ;;  %v4062_v35 = vunpack.i.l.bf16 %v5555_v0 }
 0x66e   :  { %v2191_v22 = vadd.f32 %v2175_v54, %v2147_v12  ;;  %v2267_v0 = vand.u32 3, %v4271_v14  ;;  %v2262_v12 = vand.u32 3, %v4306_v34  ;;  %v2268_v31 = vand.u32 3, %v4278_v19 }
 0x66f   :  { %v2149_v44 = vadd.f32 %v2133_v15, %v2105_v63  ;;  %v2150_v5 = vadd.f32 %v2134_v51, %v2106_v55  ;;  %v4057_v63 = vunpack.i.l.bf16 %v5558_v40  ;;  %v2200_v40 = vmul.f32 0.25, %v2192_v27 }
 0x670   :  { %v2084_v38 = vpop.permute.xlu1 %2083  ;;  %v5824_v6 = vpop.permute.xlu0 %3110  ;;  %v2199_v9 = vmul.f32 0.25, %v2191_v22  ;;  %vm5867_vm5 = vcmp.eq.s32.totalorder %v2267_v0, 0  ;;  %vm5887_vm2 = vcmp.eq.s32.totalorder %v2260_v7, 0  ;;  %v4079_v0 = vunpack.i.h.bf16 %v5593_v57 }
 0x671   :  { %v2193_v50 = vadd.f32 %v2177_v43, %v2149_v44  ;;  %v2194_v55 = vadd.f32 %v2178_v3, %v2150_v5  ;;  %v5848_v44 = vunpack.i.l.bf16 %v5565_v61  ;;  %v2259_v5 = vand.u32 3, %v4291_v26 }
 0x672   :  { %v2261_v61 = vand.u32 3, %v4304_v33  ;;  %v2093_v26 = vsel %vm6931_vm14, %v5710_v1, %v2084_v38  ;;  %v2094_v14 = vsel %vm6932_vm7, %v2084_v38, %v4052_v36  ;;  %vm5899_vm14 = vcmp.eq.s32.totalorder %v2262_v12, 0 }
 0x673   :  { %v2201_v8 = vmul.f32 0.25, %v2193_v50  ;;  %v2202_v29 = vmul.f32 0.25, %v2194_v55  ;;  %vm5861_vm1 = vcmp.eq.s32.totalorder %v2259_v5, 0  ;;  %v4083_v5 = vunpack.i.l.bf16 %v5600_v4 }
 0x674   :  { %v2124_v56 = vpop.permute.xlu1 %2123  ;;  %v2080_v42 = vpop.permute.xlu0 %2079 }
 0x675   :  { %v2091_v45 = vsel %vm6929_vm8, %v5714_v37, %v2080_v42  ;;  %v2092_v62 = vsel %vm6930_vm4, %v2080_v42, %v5710_v1  ;;  %v2135_v33 = vsel %vm6937_vm10, %v5708_v39, %v2124_v56  ;;  %v2136_v34 = vsel %vm6938_vm12, %v2124_v56, %v5704_v46  ;;  %vm2275_vm12 = vmand %vm5861_vm1, %vm5867_vm5 }
 0x676   :  { %v2107_v37 = vadd.f32 %v2091_v45, %v5531_v28  ;;  %v2108_v51 = vadd.f32 %v2092_v62, %v5539_v32  ;;  %v2269_v28 = vand.u32 3, %v4280_v20  ;;  %v2270_v32 = vand.u32 3, %v4282_v21 }
 0x677   :  { %v2109_v20 = vadd.f32 %v2093_v26, %v5527_v24  ;;  %v2110_v21 = vadd.f32 %v2094_v14, %v5547_v47  ;;  %vm5891_vm8 = vcmp.eq.s32.totalorder %v2268_v31, 0  ;;  %vm5895_vm4 = vcmp.eq.s32.totalorder %v2261_v61, 0 }
 0x678   :  { %v2168_v15 = vpop.permute.xlu0 %2167  ;;  %v2128_v49 = vpop.permute.xlu1 %2127  ;;  %v2151_v2 = vadd.f32 %v2135_v33, %v2107_v37  ;;  %v2152_v43 = vadd.f32 %v2136_v34, %v2108_v51  ;;  %vm5903_vm7 = vcmp.eq.s32.totalorder %v2269_v28, 0  ;;  %vm5907_vm10 = vcmp.eq.s32.totalorder %v2270_v32, 0 }
 0x679   :  { %v2137_v19 = vsel %vm6939_vm6, %v5704_v46, %v2128_v49  ;;  %v2138_v1 = vsel %vm6940_vm3, %v2128_v49, %v4057_v63  ;;  %v2179_v3 = vsel %vm6941_vm0, %v5728_v48, %v2168_v15  ;;  %v2180_v39 = vsel %vm6942_vm9, %v2168_v15, %v5720_v52  ;;  %vm2276_vm6 = vmand %vm5887_vm2, %vm5891_vm8 }
 0x67a   :  { %v2153_v27 = vadd.f32 %v2137_v19, %v2109_v20  ;;  %v2154_v50 = vadd.f32 %v2138_v1, %v2110_v21  ;;  %v2195_v42 = vadd.f32 %v2179_v3, %v2151_v2  ;;  %v5922_v45 = vsel %vm2437_vm13, %v4069_v11, %v4073_v23  ;;  %vm2277_vm3 = vmand %vm5895_vm4, %vm5903_vm7 }
 0x67b   :  { %v5926_v62 = vsel %vm2437_vm13, %v5848_v44, %v4069_v11  ;;  %v2207_v15 = vsub.f32 %v2199_v9, %v5716_v16  ;;  %v2208_v37 = vsub.f32 %v2200_v40, %v5716_v16  ;;  %v2209_v51 = vsub.f32 %v2201_v8, %v5716_v16  ;;  %vm2278_vm0 = vmand %vm5899_vm14, %vm5907_vm10 }
 0x67c   :  { %v2172_v38 = vpop.permute.xlu0 %2171  ;;  %v2210_v11 = vsub.f32 %v2202_v29, %v5716_v16  ;;  %vm2337_vm9 = vcmask 490496   ;;  %v2203_v49 = vmul.f32 0.25, %v2195_v42  ;;  %v2279_v40 = vsel %vm2275_vm12, 1.0, %v5445_v10 }
 0x67d   :  { %v2181_v22 = vsel %vm6943_vm15, %v5720_v52, %v2172_v38  ;;  %v2182_v46 = vsel %vm6944_vm11, %v2172_v38, %v4062_v35  ;;  %v2196_v35 = vadd.f32 %v2180_v39, %v2152_v43  ;;  %v2280_v16 = vsel %vm2276_vm6, 1.0, %v5445_v10 }
 0x67e   :  { %v2197_v36 = vadd.f32 %v2181_v22, %v2153_v27  ;;  %v2198_v63 = vadd.f32 %v2182_v46, %v2154_v50  ;;  %v2281_v8 = vsel %vm2277_vm3, 1.0, %v5445_v10  ;;  %v2282_v29 = vsel %vm2278_vm0, 1.0, %v5445_v10 }
 0x67f   :  { %v2204_v7 = vmul.f32 0.25, %v2196_v35  ;;  %v2211_v34 = vsub.f32 %v2203_v49, %v5718_v18  ;;  %vm2691_vm1 = vcmask 31744   ;;  %vm2642_vm5 = vcmask 1014784  }
 0x680   :  { %v2205_v61 = vmul.f32 0.25, %v2197_v36  ;;  %v2206_v26 = vmul.f32 0.25, %v2198_v63  ;;  %vm2386_vm15 = vcmask 556032   ;;  %vm6972_vm11 = vcmask 130048  }
 0x681   :  { %v2212_v19 = vsub.f32 %v2204_v7, %v5718_v18  ;;  %vm6973_vm2 = vmmov %vm6972_vm11 }
 0x682   :  { %v2213_v1 = vsub.f32 %v2205_v61, %v5718_v18  ;;  %v2214_v38 = vsub.f32 %v2206_v26, %v5718_v18  ;;  %vm6990_vm8 = vmmov %vm6973_vm2 }
 0x683   :  { %vm6991_vm4 = vmmov %vm6973_vm2 }
 0x684   :  { %vm6992_vm14 = vmmov %vm6973_vm2 }
 0x685   :  { %v2218_v14 = vpop.permute.xlu1 %2217  ;;  %vm6993_vm7 = vmmov %vm6973_vm2 }
 0x686   :  { %v2225_v12 = vmul.f32 %v2218_v14, %v2207_v15  ;;  %v2226_v31 = vmul.f32 %v2218_v14, %v2208_v37  ;;  %v2227_v9 = vmul.f32 %v2218_v14, %v2209_v51  ;;  %v2228_v28 = vmul.f32 %v2218_v14, %v2210_v11  ;;  %vm6994_vm10 = vmmov %vm6973_vm2 }
 0x687   :  { %v6001_v37 = vsel %vm2337_vm9, %v4079_v0, %v4083_v5  ;;  %v4093_v51 = vunpack.i.l.bf16 %v5611_v59  ;;  %v4089_v11 = vunpack.i.h.bf16 %v5602_v41  ;;  %v6022_v14 = vunpack.i.l.bf16 %v5593_v57 }
 0x688   :  { %v2243_v54 = vadd.f32 %v5561_v25, %v2225_v12  ;;  %v2244_v32 = vadd.f32 %v5561_v25, %v2226_v31  ;;  %v2245_v30 = vadd.f32 %v5561_v25, %v2227_v9  ;;  %v2246_v33 = vadd.f32 %v5561_v25, %v2228_v28 }
 0x689   :  { %v2223_v20 = vpop.permute.xlu1 %2222  ;;  %v6025_v12 = vsel %vm2691_vm1, %v4089_v11, %v4093_v51  ;;  %v4103_v31 = vunpack.i.l.bf16 %v5678_v60  ;;  %v4099_v9 = vunpack.i.h.bf16 %v5613_v53  ;;  %v6958_v57 = vunpack.i.h.bf16 %v5600_v4 }
 0x68a   :  { %v2251_v21 = vmax.f32 %v2243_v54, 0.0  ;;  %v2252_v2 = vmax.f32 %v2244_v32, 0.0  ;;  %v2253_v10 = vmax.f32 %v2245_v30, 0.0  ;;  %v2254_v43 = vmax.f32 %v2246_v33, 0.0  ;;  %v6959_v30 = vld [vmem:[#allocation6_spill] sm:$0xff] }
 0x68b   :  { %v2229_v3 = vmul.f32 %v2223_v20, %v2211_v34  ;;  %v2230_v39 = vmul.f32 %v2223_v20, %v2212_v19  ;;  %v2231_v22 = vmul.f32 %v2223_v20, %v2213_v1  ;;  %v2232_v46 = vmul.f32 %v2223_v20, %v2214_v38  ;;  %v6960_v34 = vld [vmem:[#allocation4_spill] sm:$0xff] }
 0x68c   :  { %v5969_v27 = vmul.f32 %v2279_v40, %v2251_v21  ;;  %v5971_v25 = vmul.f32 %v2280_v16, %v2252_v2  ;;  %v5973_v50 = vmul.f32 %v2281_v8, %v2253_v10  ;;  %v5975_v55 = vmul.f32 %v2282_v29, %v2254_v43  ;;  %v6961_v2 = vld [vmem:[#allocation7_spill] sm:$0xff] }
 0x68d   :  { %v2247_v24 = vadd.f32 %v5563_v17, %v2229_v3  ;;  %v2248_v18 = vadd.f32 %v5563_v17, %v2230_v39  ;;  %v2249_v47 = vadd.f32 %v5563_v17, %v2231_v22  ;;  %v2250_v48 = vadd.f32 %v5563_v17, %v2232_v46  ;;  %v6962_v39 = vld [vmem:[#allocation5_spill] sm:$0xff] }
 0x68e   :  { %2291 = vst [vmem:[#allocation2 + $0x8] sm:$0xff] %v5969_v27  ;;  %2292 = vst [vmem:[#allocation2 + $0x10] sm:$0xff] %v5971_v25  ;;  %v2972_v52 = vmul.f32 %v5922_v45, %v5973_v50  ;;  %v2971_v56 = vmul.f32 %v5926_v62, %v5971_v25  ;;  %v6957_v17 = vunpack.i.h.bf16 %v5591_v58  ;;  %v2874_v61 = vmul.f32 %v6001_v37, %v5973_v50 }
 0x68f   :  { %2293 = vst [vmem:[#allocation2 + $0x18] sm:$0xff] %v5973_v50  ;;  %2294 = vst [vmem:[#allocation2 + $0x20] sm:$0xff] %v5975_v55  ;;  %v2255_v42 = vmax.f32 %v2247_v24, 0.0  ;;  %v2256_v35 = vmax.f32 %v2248_v18, 0.0  ;;  %v2257_v36 = vmax.f32 %v2249_v47, 0.0  ;;  %v2258_v63 = vmax.f32 %v2250_v48, 0.0 }
 0x690   :  { %v5994_v15 = vsel %vm2437_vm13, %v4073_v23, %v6957_v17  ;;  %2994 = vrot.lane.b32.xlu1 %v2972_v52, %s4190_s7  ;;  %2992 = vrot.lane.b32.xlu0 %v2971_v56, %s4190_s7  ;;  %v2768_v28 = vmul.f32 %v6025_v12, %v5973_v50  ;;  %v6049_v32 = vunpack.i.h.bf16 %v5678_v60  ;;  %v4113_v33 = vunpack.i.l.bf16 %v6959_v30  ;;  %v6964_v56 = vld [vmem:[#allocation9_spill] sm:$0xff] }
 0x691   :  { %v6007_v49 = vmul.f32 %v2279_v40, %v2255_v42  ;;  %v6009_v58 = vmul.f32 %v2280_v16, %v2256_v35  ;;  %v6011_v23 = vmul.f32 %v2281_v8, %v2257_v36  ;;  %v6013_v7 = vmul.f32 %v2282_v29, %v2258_v63 }
 0x692   :  { %v2973_v26 = vmul.f32 %v5994_v15, %v5975_v55  ;;  %v2970_v40 = vmul.f32 %v5848_v44, %v5969_v27  ;;  %v6039_v16 = vsel %vm2337_vm9, %v6022_v14, %v4079_v0  ;;  %v6042_v8 = vsel %vm2642_vm5, %v4099_v9, %v4103_v31 }
 0x693   :  { %v2653_v29 = vmul.f32 %v6042_v8, %v5971_v25  ;;  %v2873_v54 = vmul.f32 %v6039_v16, %v5971_v25  ;;  %v6058_v0 = vsel %vm2337_vm9, %v4083_v5, %v6958_v57  ;;  %v4109_v19 = vunpack.i.h.bf16 %v6960_v34 }
 0x694   :  { %2896 = vrot.lane.b32.xlu1 %v2874_v61, %s4194_s25  ;;  %2996 = vrot.lane.b32.xlu0 %v2973_v26, %s4190_s7  ;;  %v2875_v60 = vmul.f32 %v6058_v0, %v5975_v55  ;;  %v2655_v1 = vmul.f32 %v6049_v32, %v5975_v55  ;;  %v6069_v4 = vunpack.i.l.bf16 %v5602_v41  ;;  %v2872_v38 = vmul.f32 %v6022_v14, %v5969_v27 }
 0x695   :  { %v6072_v5 = vsel %vm2386_vm15, %v4109_v19, %v4113_v33  ;;  %v6079_v21 = vunpack.i.h.bf16 %v6959_v30  ;;  %v4123_v10 = vunpack.i.l.bf16 %v6961_v2  ;;  %v4119_v22 = vunpack.i.h.bf16 %v6962_v39 }
 0x696   :  { %v2554_v20 = vmul.f32 %v6072_v5, %v5971_v25  ;;  %v6085_v41 = vsel %vm2691_vm1, %v6069_v4, %v4089_v11  ;;  %v6963_v46 = vunpack.i.h.bf16 %v5611_v59  ;;  %v6108_v52 = vunpack.i.h.bf16 %v6961_v2 }
 0x697   :  { %v2767_v43 = vmul.f32 %v6085_v41, %v5971_v25  ;;  %v2556_v3 = vmul.f32 %v6079_v21, %v5975_v55  ;;  %v6101_v18 = vsel %vm2437_vm13, %v4119_v22, %v4123_v10  ;;  %v4133_v59 = vunpack.i.l.bf16 %v5724_v13 }
 0x698   :  { %2790 = vrot.lane.b32.xlu1 %v2768_v28, %s4193_s24  ;;  %2990 = vrot.lane.b32.xlu0 %v2970_v40, %s4190_s7  ;;  %v6098_v24 = vsel %vm2691_vm1, %v4093_v51, %v6963_v46  ;;  %v2448_v48 = vmul.f32 %v6101_v18, %v5971_v25  ;;  %v4129_v42 = vunpack.i.h.bf16 %v6964_v56  ;;  %v2766_v35 = vmul.f32 %v6069_v4, %v5969_v27  ;;  %v6967_v40 = vld [vmem:[#allocation11_spill] sm:$0xff] }
 0x699   :  { %v2769_v47 = vmul.f32 %v6098_v24, %v5975_v55  ;;  %v2450_v36 = vmul.f32 %v6108_v52, %v5975_v55  ;;  %v6965_v63 = vunpack.i.l.bf16 %v5613_v53  ;;  %v6133_v26 = vunpack.i.h.bf16 %v5724_v13 }
 0x69a   :  { %v6126_v51 = vsel %vm2337_vm9, %v4129_v42, %v4133_v59  ;;  %v2645_v53 = vsel %vm2642_vm5, %v4103_v31, %v6049_v32  ;;  %v6968_v13 = vunpack.i.l.bf16 %v6960_v34  ;;  %v2976_v34 = vmul.f32 %v5926_v62, %v6009_v58 }
 0x69b   :  { %v6123_v17 = vsel %vm2642_vm5, %v6965_v63, %v4099_v9  ;;  %v2348_v61 = vmul.f32 %v6126_v51, %v5971_v25  ;;  %v6966_v9 = vld [vmem:[#allocation8_spill] sm:$0xff]  ;;  %v2350_v57 = vmul.f32 %v6133_v26, %v5975_v55  ;;  %v2440_v62 = vsel %vm2437_vm13, %v4123_v10, %v6108_v52 }
 0x69c   :  { %2675 = vrot.lane.b32.xlu1 %v2653_v29, %s4192_s23  ;;  %2894 = vrot.lane.b32.xlu0 %v2873_v54, %s4194_s25  ;;  %v2652_v11 = vmul.f32 %v6123_v17, %v5969_v27  ;;  %v4143_v28 = vunpack.i.l.bf16 %v6966_v9  ;;  %v4139_v29 = vunpack.i.h.bf16 %v6967_v40  ;;  %v2654_v54 = vmul.f32 %v2645_v53, %v5973_v50 }
 0x69d   :  { %v2544_v30 = vsel %vm2386_vm15, %v6968_v13, %v4109_v19  ;;  %v6969_v19 = vunpack.i.l.bf16 %v6962_v39  ;;  %v2975_v46 = vmul.f32 %v5848_v44, %v6007_v49  ;;  %v6970_v39 = vunpack.i.l.bf16 %v6964_v56 }
 0x69e   :  { %v2553_v31 = vmul.f32 %v2544_v30, %v5969_v27  ;;  %v2340_v44 = vsel %vm2337_vm9, %v4133_v59, %v6133_v26  ;;  %v6190_v10 = vunpack.i.l.bf16 %v6967_v40  ;;  %v2880_v56 = vmul.f32 %v6058_v0, %v6013_v7 }
 0x69f   :  { %v2438_v2 = vsel %vm2437_vm13, %v6969_v19, %v4119_v22  ;;  %v2877_v59 = vmul.f32 %v6022_v14, %v6007_v49  ;;  %v2772_v63 = vmul.f32 %v6085_v41, %v6009_v58  ;;  %v2977_v14 = vmul.f32 %v5922_v45, %v6011_v23 }
 0x6a0   :  { %2898 = vrot.lane.b32.xlu0 %v2875_v60, %s4194_s25  ;;  %2679 = vrot.lane.b32.xlu1 %v2655_v1, %s4192_s23  ;;  %v6150_v60 = vsel %vm2386_vm15, %v4139_v29, %v4143_v28  ;;  %v2771_v41 = vmul.f32 %v6069_v4, %v6007_v49  ;;  %v2773_v45 = vmul.f32 %v6025_v12, %v6011_v23 }
 0x6a1   :  { %v3074_v1 = vmul.f32 %v6150_v60, %v5973_v50  ;;  %v2558_v4 = vmul.f32 %v2544_v30, %v6007_v49  ;;  %v2660_v12 = vmul.f32 %v6049_v32, %v6013_v7  ;;  %v2454_v32 = vmul.f32 %v2440_v62, %v6011_v23  ;;  %v3137_v30 = vld [vmem:[%s6771_s3 + $0x8] sm:$0xff] }
 0x6a2   :  { %v2453_v40 = vmul.f32 %v6101_v18, %v6009_v58  ;;  %3820 = vmatprep.mubr.msk.f32.mxu0 %vm6972_vm11, %v3137_v30  ;;  %3824 = vmatprep.mubr.msk.f32.mxu1 %vm6973_vm2, %v3137_v30 }
 0x6a4   :  { %2892 = vrot.lane.b32.xlu0 %v2872_v38, %s4194_s25  ;;  %2576 = vrot.lane.b32.xlu1 %v2554_v20, %s4191_s22  ;;  %v2546_v38 = vsel %vm2386_vm15, %v4113_v33, %v6079_v21  ;;  %v2449_v33 = vmul.f32 %v2440_v62, %v5973_v50 }
 0x6a5   :  { %v2555_v20 = vmul.f32 %v2546_v38, %v5973_v50 }
 0x6a8   :  { %2788 = vrot.lane.b32.xlu0 %v2767_v43, %s4193_s24  ;;  %2580 = vrot.lane.b32.xlu1 %v2556_v3, %s4191_s22  ;;  %v2447_v43 = vmul.f32 %v2438_v2, %v5969_v27  ;;  %v2978_v3 = vmul.f32 %v5994_v15, %v6013_v7  ;;  %v2338_v15 = vsel %vm2337_vm9, %v6970_v39, %v4129_v42 }
 0x6a9   :  { %v2347_v22 = vmul.f32 %v2338_v15, %v5969_v27 }
 0x6ac   :  { %2792 = vrot.lane.b32.xlu0 %v2769_v47, %s4193_s24  ;;  %2470 = vrot.lane.b32.xlu1 %v2448_v48, %s4190_s7  ;;  %v2878_v47 = vmul.f32 %v6039_v16, %v6009_v58  ;;  %v2349_v48 = vmul.f32 %v2340_v44, %v5973_v50  ;;  %v3064_v16 = vsel %vm2386_vm15, %v6190_v10, %v4139_v29 }
 0x6ad   :  { %v3073_v42 = vmul.f32 %v3064_v16, %v5971_v25  ;;  %v2455_v29 = vmul.f32 %v6108_v52, %v6013_v7  ;;  %v3078_v13 = vmul.f32 %v3064_v16, %v6009_v58  ;;  %v2355_v52 = vmul.f32 %v6133_v26, %v6013_v7 }
 0x6ae   :  { %v3079_v26 = vmul.f32 %v6150_v60, %v6011_v23 }
 0x6b0   :  { %2786 = vrot.lane.b32.xlu0 %v2766_v35, %s4193_s24  ;;  %2474 = vrot.lane.b32.xlu1 %v2450_v36, %s4190_s7  ;;  %v6971_v35 = vunpack.i.h.bf16 %v6966_v9  ;;  %v2659_v9 = vmul.f32 %v2645_v53, %v6011_v23  ;;  %v2452_v53 = vmul.f32 %v2438_v2, %v6007_v49  ;;  %v3077_v2 = vmul.f32 %v6190_v10, %v6007_v49 }
 0x6b2   :  { %v3066_v0 = vsel %vm2386_vm15, %v4143_v28, %v6971_v35  ;;  %v2561_v28 = vmul.f32 %v6079_v21, %v6013_v7  ;;  %v2354_v21 = vmul.f32 %v2340_v44, %v6011_v23 }
 0x6b3   :  { %v3075_v36 = vmul.f32 %v3066_v0, %v5975_v55 }
 0x6b4   :  { %2673 = vrot.lane.b32.xlu0 %v2652_v11, %s4192_s23  ;;  %2370 = vrot.lane.b32.xlu1 %v2348_v61, %s4194_s25  ;;  %v2774_v11 = vmul.f32 %v6098_v24, %v6013_v7  ;;  %v2879_v61 = vmul.f32 %v6001_v37, %v6011_v23  ;;  %v2657_v24 = vmul.f32 %v6123_v17, %v6007_v49 }
 0x6b5   :  { %v2658_v37 = vmul.f32 %v6042_v8, %v6009_v58  ;;  %v2560_v17 = vmul.f32 %v2546_v38, %v6011_v23  ;;  %v2559_v8 = vmul.f32 %v6072_v5, %v6009_v58  ;;  %v2352_v5 = vmul.f32 %v2338_v15, %v6007_v49 }
 0x6b6   :  { %v3080_v38 = vmul.f32 %v3066_v0, %v6013_v7 }
 0x6b8   :  { %2677 = vrot.lane.b32.xlu0 %v2654_v54, %s4192_s23  ;;  %2374 = vrot.lane.b32.xlu1 %v2350_v57, %s4194_s25  ;;  %v2353_v54 = vmul.f32 %v6126_v51, %v6009_v58 }
 0x6bc   :  { %2574 = vrot.lane.b32.xlu0 %v2553_v31, %s4191_s22  ;;  %3096 = vrot.lane.b32.xlu1 %v3074_v1, %s4191_s22 }
 0x6c0   :  { %2578 = vrot.lane.b32.xlu0 %v2555_v20, %s4191_s22  ;;  %3002 = vrot.lane.b32.xlu1 %v2976_v34, %s4190_s7 }
 0x6c4   :  { %2468 = vrot.lane.b32.xlu0 %v2447_v43, %s4190_s7  ;;  %3006 = vrot.lane.b32.xlu1 %v2978_v3, %s4190_s7  ;;  %v3072_v43 = vmul.f32 %v6190_v10, %v5969_v27 }
 0x6c8   :  { %2472 = vrot.lane.b32.xlu0 %v2449_v33, %s4190_s7  ;;  %3000 = vrot.lane.b32.xlu1 %v2975_v46, %s4190_s7  ;;  %v6974_v46 = vld [vmem:[#allocation10_spill] sm:$0xff] }
 0x6cc   :  { %2368 = vrot.lane.b32.xlu0 %v2347_v22, %s4194_s25  ;;  %2904 = vrot.lane.b32.xlu1 %v2878_v47, %s4194_s25 }
 0x6d0   :  { %2372 = vrot.lane.b32.xlu0 %v2349_v48, %s4194_s25  ;;  %2908 = vrot.lane.b32.xlu1 %v2880_v56, %s4194_s25 }
 0x6d4   :  { %3094 = vrot.lane.b32.xlu0 %v3073_v42, %s4191_s22  ;;  %2902 = vrot.lane.b32.xlu1 %v2877_v59, %s4194_s25 }
 0x6d8   :  { %3098 = vrot.lane.b32.xlu0 %v3075_v36, %s4191_s22  ;;  %2798 = vrot.lane.b32.xlu1 %v2772_v63, %s4193_s24 }
 0x6dc   :  { %3004 = vrot.lane.b32.xlu0 %v2977_v14, %s4190_s7  ;;  %2802 = vrot.lane.b32.xlu1 %v2774_v11, %s4193_s24 }
 0x6e0   :  { %2906 = vrot.lane.b32.xlu0 %v2879_v61, %s4194_s25  ;;  %2796 = vrot.lane.b32.xlu1 %v2771_v41, %s4193_s24 }
 0x6e4   :  { %2800 = vrot.lane.b32.xlu0 %v2773_v45, %s4193_s24  ;;  %2683 = vrot.lane.b32.xlu1 %v2657_v24, %s4192_s23 }
 0x6e8   :  { %2685 = vrot.lane.b32.xlu0 %v2658_v37, %s4192_s23  ;;  %2687 = vrot.lane.b32.xlu1 %v2659_v9, %s4192_s23  ;;  %v6975_v37 = vld [vmem:[#allocation12_spill] sm:$0xff] }
 0x6ec   :  { %2584 = vrot.lane.b32.xlu1 %v2558_v4, %s4191_s22  ;;  %2689 = vrot.lane.b32.xlu0 %v2660_v12, %s4192_s23 }
 0x6f0   :  { %2588 = vrot.lane.b32.xlu1 %v2560_v17, %s4191_s22  ;;  %2586 = vrot.lane.b32.xlu0 %v2559_v8, %s4191_s22 }
 0x6f4   :  { %2478 = vrot.lane.b32.xlu1 %v2452_v53, %s4190_s7  ;;  %2590 = vrot.lane.b32.xlu0 %v2561_v28, %s4191_s22 }
 0x6f8   :  { %2482 = vrot.lane.b32.xlu1 %v2454_v32, %s4190_s7  ;;  %2480 = vrot.lane.b32.xlu0 %v2453_v40, %s4190_s7 }
 0x6fc   :  { %2378 = vrot.lane.b32.xlu1 %v2352_v5, %s4194_s25  ;;  %2484 = vrot.lane.b32.xlu0 %v2455_v29, %s4190_s7 }
 0x700   :  { %2382 = vrot.lane.b32.xlu1 %v2354_v21, %s4194_s25  ;;  %2380 = vrot.lane.b32.xlu0 %v2353_v54, %s4194_s25 }
 0x702   :  { %v2995_v18 = vpop.permute.xlu1 %2994  ;;  %v2993_v57 = vpop.permute.xlu0 %2992 }
 0x703   :  { %v6272_v31 = vsel %vm2437_vm13, %v2993_v57, %v2995_v18 }
 0x704   :  { %3104 = vrot.lane.b32.xlu1 %v3078_v13, %s4191_s22  ;;  %2384 = vrot.lane.b32.xlu0 %v2355_v52, %s4194_s25  ;;  %v6976_v52 = vld [vmem:[#allocation13_spill] sm:$0xff] }
 0x706   :  { %v2897_v51 = vpop.permute.xlu1 %2896  ;;  %v2997_v1 = vpop.permute.xlu0 %2996 }
 0x707   :  { %v3012_v20 = vsel %vm2437_vm13, %v2995_v18, %v2997_v1  ;;  %v3013_v30 = vsel %vm2437_vm13, %v2997_v1, %v6976_v52  ;;  %v6978_v1 = vld [vmem:[#allocation15_spill] sm:$0xff] }
 0x708   :  { %3108 = vrot.lane.b32.xlu1 %v3080_v38, %s4191_s22  ;;  %3106 = vrot.lane.b32.xlu0 %v3079_v26, %s4191_s22  ;;  %v6977_v26 = vld [vmem:[#allocation14_spill] sm:$0xff] }
 0x70a   :  { %v6284_v34 = vpop.permute.xlu1 %2790  ;;  %v2991_v19 = vpop.permute.xlu0 %2990 }
 0x70b   :  { %v3010_v3 = vsel %vm2437_vm13, %v2991_v19, %v2993_v57 }
 0x70c   :  { %3102 = vrot.lane.b32.xlu1 %v3077_v2, %s4191_s22  ;;  %3092 = vrot.lane.b32.xlu0 %v3072_v43, %s4191_s22 }
 0x70e   :  { %v6293_v60 = vpop.permute.xlu1 %2675  ;;  %v2895_v62 = vpop.permute.xlu0 %2894 }
 0x70f   :  { %v2913_v33 = vsel %vm2386_vm15, %v2895_v62, %v2897_v51 }
 0x710   :  { %3100 = vrot.lane.b32.xlu1 %v6974_v46, %s4191_s22 }
 0x712   :  { %v2899_v39 = vpop.permute.xlu0 %2898  ;;  %v6298_v15 = vpop.permute.xlu1 %2679 }
 0x713   :  { %v2914_v22 = vsel %vm2386_vm15, %v2897_v51, %v2899_v39 }
 0x716   :  { %v2893_v47 = vpop.permute.xlu0 %2892  ;;  %v6301_v44 = vpop.permute.xlu1 %2576 }
 0x71a   :  { %v6303_v10 = vpop.permute.xlu0 %2788  ;;  %v6305_v48 = vpop.permute.xlu1 %2580 }
 0x71e   :  { %v6307_v56 = vpop.permute.xlu0 %2792  ;;  %v6309_v16 = vpop.permute.xlu1 %2470 }
 0x722   :  { %v6311_v42 = vpop.permute.xlu0 %2786  ;;  %v6313_v59 = vpop.permute.xlu1 %2474 }
 0x726   :  { %v6315_v35 = vpop.permute.xlu0 %2673  ;;  %v6317_v0 = vpop.permute.xlu1 %2370 }
 0x72a   :  { %v6319_v36 = vpop.permute.xlu0 %2677  ;;  %v6321_v63 = vpop.permute.xlu1 %2374 }
 0x72e   :  { %v6323_v14 = vpop.permute.xlu0 %2574  ;;  %v6325_v11 = vpop.permute.xlu1 %3096 }
 0x732   :  { %v6327_v61 = vpop.permute.xlu0 %2578  ;;  %v3003_v41 = vpop.permute.xlu1 %3002 }
 0x736   :  { %v6329_v45 = vpop.permute.xlu0 %2468  ;;  %v3007_v24 = vpop.permute.xlu1 %3006 }
 0x737   :  { %v3017_v9 = vsel %vm2437_vm13, %v3007_v24, %v6975_v37  ;;  %v6979_v37 = vld [vmem:[#allocation16_spill] sm:$0xff] }
 0x738   :  { %3317 = vmatprep.subr.mxu1 %v3017_v9 }
 0x73a   :  { %v6333_v4 = vpop.permute.xlu0 %2472  ;;  %v3001_v12 = vpop.permute.xlu1 %3000 }
 0x73b   :  { %v3014_v13 = vsel %vm2437_vm13, %v3001_v12, %v3003_v41 }
 0x73e   :  { %v6335_v17 = vpop.permute.xlu0 %2368  ;;  %v2905_v8 = vpop.permute.xlu1 %2904 }
 0x742   :  { %v6337_v53 = vpop.permute.xlu0 %2372  ;;  %v2909_v28 = vpop.permute.xlu1 %2908 }
 0x743   :  { %v2919_v19 = vsel %vm2386_vm15, %v2909_v28, %v6977_v26 }
 0x746   :  { %v6339_v32 = vpop.permute.xlu0 %3094  ;;  %v2903_v40 = vpop.permute.xlu1 %2902 }
 0x747   :  { %v2916_v46 = vsel %vm2386_vm15, %v2903_v40, %v2905_v8 }
 0x74a   :  { %v6341_v5 = vpop.permute.xlu0 %3098  ;;  %v2799_v29 = vpop.permute.xlu1 %2798 }
 0x74e   :  { %v3005_v21 = vpop.permute.xlu0 %3004  ;;  %v2803_v54 = vpop.permute.xlu1 %2802 }
 0x74f   :  { %v3016_v18 = vsel %vm2437_vm13, %v3005_v21, %v3007_v24  ;;  %v3015_v57 = vsel %vm2437_vm13, %v3003_v41, %v3005_v21  ;;  %v2915_v41 = vsel %vm2386_vm15, %v2899_v39, %v6978_v1  ;;  %v6980_v39 = vld [vmem:[#allocation17_spill] sm:$0xff] }
 0x750   :  { %3228 = vmatprep.subr.mxu0 %v3015_v57  ;;  %3318 = vmatpush1.msra.mxu1 %v3016_v18  ;;  %v6983_v18 = vld [vmem:[#allocation21_spill] sm:$0xff] }
 0x751   :  { %3229 = vmatpush1.msra.mxu0 %v3014_v13  ;;  %3319 = vmatprep.subr.mxu1 %v3013_v30 }
 0x752   :  { %v2907_v51 = vpop.permute.xlu0 %2906  ;;  %3230 = vmatprep.subr.mxu0 %v6272_v31  ;;  %3320 = vmatpush1.msra.mxu1 %v3012_v20  ;;  %v2797_v38 = vpop.permute.xlu1 %2796  ;;  %v2912_v31 = vsel %vm2386_vm15, %v2893_v47, %v2895_v62  ;;  %v2809_v62 = vsel %vm2642_vm5, %v6307_v56, %v6980_v39  ;;  %v2806_v47 = vsel %vm2642_vm5, %v6311_v42, %v6303_v10  ;;  %v6981_v42 = vld [vmem:[#allocation19_spill] sm:$0xff] }
 0x753   :  { %v2918_v2 = vsel %vm2386_vm15, %v2907_v51, %v2909_v28  ;;  %3231 = vmatpush1.msra.mxu0 %v3010_v3  ;;  %3321 = vmatprep.subr.mxu1 %v2919_v19  ;;  %v2917_v43 = vsel %vm2386_vm15, %v2905_v8, %v2907_v51  ;;  %v2813_v3 = vsel %vm2642_vm5, %v2803_v54, %v6979_v37 }
 0x754   :  { %3232 = vmatprep.subr.mxu0 %v2917_v43  ;;  %3322 = vmatpush1.msra.mxu1 %v2918_v2  ;;  %v2810_v8 = vsel %vm2642_vm5, %v2797_v38, %v2799_v29  ;;  %v2595_v51 = vsel %vm2337_vm9, %v6327_v61, %v6305_v48  ;;  %v2594_v38 = vsel %vm2337_vm9, %v6301_v44, %v6327_v61  ;;  %v6985_v2 = vld [vmem:[#allocation23_spill] sm:$0xff]  ;;  %v6986_v48 = vld [vmem:[#allocation22_spill] sm:$0xff] }
 0x755   :  { %3233 = vmatpush1.msra.mxu0 %v2916_v46  ;;  %3323 = vmatprep.subr.mxu1 %v2915_v41  ;;  %v2487_v46 = vsel %vm2437_vm13, %v6329_v45, %v6309_v16  ;;  %v2486_v1 = vsel %vm2437_vm13, %v6986_v48, %v6329_v45  ;;  %v3557_v48 = vld [vmem:[%s6772_s10 + $0x1d8] sm:$0xff] }
 0x756   :  { %v2801_v20 = vpop.permute.xlu0 %2800  ;;  %3234 = vmatprep.subr.mxu0 %v2913_v33  ;;  %3324 = vmatpush1.msra.mxu1 %v2914_v22  ;;  %v2684_v24 = vpop.permute.xlu1 %2683  ;;  %v2808_v33 = vsel %vm2642_vm5, %v6284_v34, %v6307_v56  ;;  %v2807_v22 = vsel %vm2642_vm5, %v6303_v10, %v6284_v34 }
 0x757   :  { %v2812_v9 = vsel %vm2642_vm5, %v2801_v20, %v2803_v54  ;;  %3235 = vmatpush1.msra.mxu0 %v2912_v31  ;;  %3325 = vmatprep.subr.mxu1 %v2813_v3  ;;  %v2811_v12 = vsel %vm2642_vm5, %v2799_v29, %v2801_v20  ;;  %v2489_v20 = vsel %vm2437_vm13, %v6333_v4, %v6313_v59  ;;  %v6988_v59 = vld [vmem:[#allocation25_spill] sm:$0xff] }
 0x758   :  { %3236 = vmatprep.subr.mxu0 %v2811_v12  ;;  %3326 = vmatpush1.msra.mxu1 %v2812_v9  ;;  %v6987_v9 = vld [vmem:[#allocation24_spill] sm:$0xff]  ;;  %v2387_v39 = vsel %vm2386_vm15, %v6988_v59, %v6335_v17 }
 0x759   :  { %3237 = vmatpush1.msra.mxu0 %v2810_v8  ;;  %3327 = vmatprep.subr.mxu1 %v2809_v62  ;;  %v2388_v8 = vsel %vm2386_vm15, %v6335_v17, %v6317_v0  ;;  %v3538_v59 = vld [vmem:[%s6772_s10 + $0x140] sm:$0xff] }
 0x75a   :  { %v2686_v28 = vpop.permute.xlu0 %2685  ;;  %3238 = vmatprep.subr.mxu0 %v2807_v22  ;;  %3328 = vmatpush1.msra.mxu1 %v2808_v33  ;;  %v2688_v40 = vpop.permute.xlu1 %2687  ;;  %v2390_v22 = vsel %vm2386_vm15, %v6337_v53, %v6321_v63 }
 0x75b   :  { %3239 = vmatpush1.msra.mxu0 %v2806_v47  ;;  %3329 = vmatprep.subr.mxu1 %v6013_v7  ;;  %v2697_v56 = vsel %vm2691_vm1, %v2684_v24, %v2686_v28  ;;  %v2389_v47 = vsel %vm2386_vm15, %v6317_v0, %v6337_v53  ;;  %v3113_v0 = vsel %vm2337_vm9, %v6339_v32, %v6325_v11  ;;  %v3136_v53 = vld [vmem:[%s6771_s3] sm:$0xff] }
 0x75c   :  { %3240 = vmatprep.subr.mxu0 %v6009_v58  ;;  %3330 = vmatpush1.msra.mxu1 %v6011_v23  ;;  %v2696_v58 = vsel %vm2691_vm1, %v6981_v42, %v2684_v24  ;;  %v2698_v23 = vsel %vm2691_vm1, %v2686_v28, %v2688_v40  ;;  %v2488_v24 = vsel %vm2437_vm13, %v6309_v16, %v6333_v4 }
 0x75d   :  { %3241 = vmatpush1.msra.mxu0 %v6007_v49  ;;  %3331 = vmatprep.subr.mxu1 %v5975_v55  ;;  %v2694_v49 = vsel %vm2691_vm1, %v6293_v60, %v6319_v36 }
 0x75e   :  { %3242 = vmatprep.subr.mxu0 %v5971_v25  ;;  %v2585_v34 = vpop.permute.xlu1 %2584  ;;  %3332 = vmatpush1.msra.mxu1 %v5973_v50  ;;  %v2690_v10 = vpop.permute.xlu0 %2689  ;;  %v2693_v25 = vsel %vm2691_vm1, %v6315_v35, %v6293_v60  ;;  %v6982_v50 = vld [vmem:[#allocation18_spill] sm:$0xff] }
 0x75f   :  { %3243 = vmatpush1.msra.mxu0 %v5969_v27  ;;  %v2699_v7 = vsel %vm2691_vm1, %v2688_v40, %v2690_v10  ;;  %v2695_v27 = vsel %vm2691_vm1, %v6319_v36, %v6298_v15  ;;  %v2692_v55 = vsel %vm2691_vm1, %v6982_v50, %v6315_v35  ;;  %v2596_v57 = vsel %vm2337_vm9, %v6983_v18, %v2585_v34  ;;  %v6984_v35 = vld [vmem:[#allocation20_spill] sm:$0xff]  ;;  %v3143_v18 = vld [vmem:[%s6771_s3 + $0x38] sm:$0xff] }
 0x760   :  { %3244 = vmatprep.subr.mxu0 %v2697_v56  ;;  %3333 = vmatprep.subr.mxu1 %v2699_v7  ;;  %v2593_v15 = vsel %vm2337_vm9, %v6323_v14, %v6301_v44  ;;  %v2592_v60 = vsel %vm2337_vm9, %v6984_v35, %v6323_v14  ;;  %v3114_v50 = vsel %vm2337_vm9, %v6325_v11, %v6341_v5  ;;  %v3561_v11 = vld [vmem:[%s6772_s10 + $0x1f8] sm:$0xff]  ;;  %v3526_v35 = vld [vmem:[%s6772_s10 + $0xe0] sm:$0xff] }
 0x761   :  { %3245 = vmatpush1.msra.mxu0 %v2696_v58  ;;  %3334 = vmatpush1.msra.mxu1 %v2698_v23  ;;  %v3139_v58 = vld [vmem:[%s6771_s3 + $0x18] sm:$0xff] }
 0x762   :  { %3246 = vmatprep.subr.mxu0 %v2693_v25  ;;  %v2589_v29 = vpop.permute.xlu1 %2588  ;;  %3335 = vmatprep.subr.mxu1 %v2695_v27  ;;  %v2587_v21 = vpop.permute.xlu0 %2586  ;;  %v3513_v25 = vld [vmem:[%s6772_s10 + $0x78] sm:$0xff] }
 0x763   :  { %3247 = vmatpush1.msra.mxu0 %v2692_v55  ;;  %3336 = vmatpush1.msra.mxu1 %v2694_v49  ;;  %v2597_v54 = vsel %vm2337_vm9, %v2585_v34, %v2587_v21  ;;  %v2598_v30 = vsel %vm2337_vm9, %v2587_v21, %v2589_v29  ;;  %v3138_v55 = vld [vmem:[%s6771_s3 + $0x10] sm:$0xff]  ;;  %v3141_v49 = vld [vmem:[%s6771_s3 + $0x28] sm:$0xff] }
 0x764   :  { %3248 = vmatprep.subr.mxu0 %v2597_v54  ;;  %v3511_v21 = vld [vmem:[%s6772_s10 + $0x68] sm:$0xff]  ;;  %v3140_v54 = vld [vmem:[%s6771_s3 + $0x20] sm:$0xff] }
 0x765   :  { %3249 = vmatpush1.msra.mxu0 %v2596_v57  ;;  %v3545_v57 = vld [vmem:[%s6772_s10 + $0x178] sm:$0xff] }
 0x766   :  { %v2479_v36 = vpop.permute.xlu1 %2478  ;;  %3250 = vmatprep.subr.mxu0 %v2593_v15  ;;  %v2591_v13 = vpop.permute.xlu0 %2590  ;;  %v3560_v15 = vld [vmem:[%s6772_s10 + $0x1f0] sm:$0xff] }
 0x767   :  { %3251 = vmatpush1.msra.mxu0 %v2592_v60  ;;  %v2599_v52 = vsel %vm2337_vm9, %v2589_v29, %v2591_v13  ;;  %v2490_v43 = vsel %vm2437_vm13, %v6985_v2, %v2479_v36  ;;  %v3512_v29 = vld [vmem:[%s6772_s10 + $0x70] sm:$0xff]  ;;  %v3510_v60 = vld [vmem:[%s6772_s10 + $0x60] sm:$0xff]  ;;  %v3523_v2 = vld [vmem:[%s6772_s10 + $0xc8] sm:$0xff] }
 0x768   :  { %3337 = vmatprep.subr.mxu1 %v2599_v52  ;;  %v3544_v13 = vld [vmem:[%s6772_s10 + $0x170] sm:$0xff]  ;;  %v3525_v52 = vld [vmem:[%s6772_s10 + $0xd8] sm:$0xff] }
 0x769   :  { %3338 = vmatpush1.msra.mxu1 %v2598_v30  ;;  %v3559_v30 = vld [vmem:[%s6772_s10 + $0x1e8] sm:$0xff] }
 0x76a   :  { %v2483_v26 = vpop.permute.xlu1 %2482  ;;  %3339 = vmatprep.subr.mxu1 %v2595_v51  ;;  %v2481_v14 = vpop.permute.xlu0 %2480  ;;  %v3509_v51 = vld [vmem:[%s6772_s10 + $0x58] sm:$0xff] }
 0x76b   :  { %3340 = vmatpush1.msra.mxu1 %v2594_v38  ;;  %v2491_v19 = vsel %vm2437_vm13, %v2479_v36, %v2481_v14  ;;  %v2492_v31 = vsel %vm2437_vm13, %v2481_v14, %v2483_v26  ;;  %v3142_v36 = vld [vmem:[%s6771_s3 + $0x30] sm:$0xff] }
 0x76c   :  { %3252 = vmatprep.subr.mxu0 %v2491_v19  ;;  %v3524_v38 = vld [vmem:[%s6772_s10 + $0xd0] sm:$0xff]  ;;  %v3558_v19 = vld [vmem:[%s6772_s10 + $0x1e0] sm:$0xff] }
 0x76d   :  { %3253 = vmatpush1.msra.mxu0 %v2490_v43  ;;  %v3508_v14 = vld [vmem:[%s6772_s10 + $0x50] sm:$0xff]  ;;  %v3542_v43 = vld [vmem:[%s6772_s10 + $0x160] sm:$0xff] }
 0x76e   :  { %v2379_v44 = vpop.permute.xlu1 %2378  ;;  %3254 = vmatprep.subr.mxu0 %v2487_v46  ;;  %v2485_v61 = vpop.permute.xlu0 %2484  ;;  %v3507_v46 = vld [vmem:[%s6772_s10 + $0x48] sm:$0xff] }
 0x76f   :  { %3255 = vmatpush1.msra.mxu0 %v2486_v1  ;;  %v2493_v41 = vsel %vm2437_vm13, %v2483_v26, %v2485_v61  ;;  %v2391_v12 = vsel %vm2386_vm15, %v6987_v9, %v2379_v44  ;;  %vm6989_vm13 = vmmov %vm6973_vm2  ;;  %v3543_v26 = vld [vmem:[%s6772_s10 + $0x168] sm:$0xff]  ;;  %v3522_v1 = vld [vmem:[%s6772_s10 + $0xc0] sm:$0xff] }
 0x770   :  { %3341 = vmatprep.subr.mxu1 %v2493_v41  ;;  %v3506_v61 = vld [vmem:[%s6772_s10 + $0x40] sm:$0xff]  ;;  %v3556_v41 = vld [vmem:[%s6772_s10 + $0x1d0] sm:$0xff] }
 0x771   :  { %3342 = vmatpush1.msra.mxu1 %v2492_v31  ;;  %v3521_v31 = vld [vmem:[%s6772_s10 + $0xb8] sm:$0xff]  ;;  %v3504_v9 = vld [vmem:[%s6772_s10 + $0x30] sm:$0xff] }
 0x772   :  { %v2383_v37 = vpop.permute.xlu1 %2382  ;;  %3343 = vmatprep.subr.mxu1 %v2489_v20  ;;  %v2381_v45 = vpop.permute.xlu0 %2380  ;;  %v3540_v20 = vld [vmem:[%s6772_s10 + $0x150] sm:$0xff] }
 0x773   :  { %3344 = vmatpush1.msra.mxu1 %v2488_v24  ;;  %v2392_v3 = vsel %vm2386_vm15, %v2379_v44, %v2381_v45  ;;  %v2393_v33 = vsel %vm2386_vm15, %v2381_v45, %v2383_v37  ;;  %v3541_v44 = vld [vmem:[%s6772_s10 + $0x158] sm:$0xff]  ;;  %v3520_v45 = vld [vmem:[%s6772_s10 + $0xb0] sm:$0xff] }
 0x774   :  { %3256 = vmatprep.subr.mxu0 %v2392_v3  ;;  %v3505_v24 = vld [vmem:[%s6772_s10 + $0x38] sm:$0xff]  ;;  %v3539_v3 = vld [vmem:[%s6772_s10 + $0x148] sm:$0xff] }
 0x775   :  { %3257 = vmatpush1.msra.mxu0 %v2391_v12  ;;  %v3554_v12 = vld [vmem:[%s6772_s10 + $0x1c0] sm:$0xff] }
 0x776   :  { %v3105_v16 = vpop.permute.xlu1 %3104  ;;  %3258 = vmatprep.subr.mxu0 %v2388_v8  ;;  %v2385_v4 = vpop.permute.xlu0 %2384  ;;  %v3519_v8 = vld [vmem:[%s6772_s10 + $0xa8] sm:$0xff] }
 0x777   :  { %3259 = vmatpush1.msra.mxu0 %v2387_v39  ;;  %v2394_v62 = vsel %vm2386_vm15, %v2383_v37, %v2385_v4  ;;  %v3555_v37 = vld [vmem:[%s6772_s10 + $0x1c8] sm:$0xff]  ;;  %v3518_v4 = vld [vmem:[%s6772_s10 + $0xa0] sm:$0xff] }
 0x778   :  { %3345 = vmatprep.subr.mxu1 %v2394_v62  ;;  %v3503_v39 = vld [vmem:[%s6772_s10 + $0x28] sm:$0xff]  ;;  %v3537_v62 = vld [vmem:[%s6772_s10 + $0x138] sm:$0xff] }
 0x779   :  { %3346 = vmatpush1.msra.mxu1 %v2393_v33  ;;  %v3502_v33 = vld [vmem:[%s6772_s10 + $0x20] sm:$0xff] }
 0x77a   :  { %v3109_v28 = vpop.permute.xlu1 %3108  ;;  %3347 = vmatprep.subr.mxu1 %v2390_v22  ;;  %v3107_v17 = vpop.permute.xlu0 %3106  ;;  %v3552_v22 = vld [vmem:[%s6772_s10 + $0x1b0] sm:$0xff] }
 0x77b   :  { %v3118_v40 = vsel %vm2337_vm9, %v3107_v17, %v3109_v28  ;;  %3348 = vmatpush1.msra.mxu1 %v2389_v47  ;;  %v3117_v34 = vsel %vm2337_vm9, %v3105_v16, %v3107_v17  ;;  %v3119_v10 = vsel %vm2337_vm9, %v3109_v28, %v5824_v6  ;;  %v3529_v6 = vld [vmem:[%s6772_s10 + $0xf8] sm:$0xff]  ;;  %v3536_v28 = vld [vmem:[%s6772_s10 + $0x130] sm:$0xff] }
 0x77c   :  { %3288 = vmatprep.subr.mxu0 %v3117_v34  ;;  %3377 = vmatprep.subr.mxu1 %v3119_v10  ;;  %v3517_v47 = vld [vmem:[%s6772_s10 + $0x98] sm:$0xff]  ;;  %v3516_v34 = vld [vmem:[%s6772_s10 + $0x90] sm:$0xff]  ;;  %v3535_v10 = vld [vmem:[%s6772_s10 + $0x128] sm:$0xff] }
 0x77d   :  { %3378 = vmatpush2.msra.mxu1 %v3118_v40  ;;  %v3501_v17 = vld [vmem:[%s6772_s10 + $0x18] sm:$0xff]  ;;  %v3551_v40 = vld [vmem:[%s6772_s10 + $0x1a8] sm:$0xff] }
 0x77e   :  { %v3103_v56 = vpop.permute.xlu1 %3102  ;;  %v3093_v63 = vpop.permute.xlu0 %3092 }
 0x77f   :  { %v3116_v7 = vsel %vm2337_vm9, %v3103_v56, %v3105_v16  ;;  %v3112_v42 = vsel %vm2337_vm9, %v3093_v63, %v6339_v32  ;;  %v3528_v32 = vld [vmem:[%s6772_s10 + $0xf0] sm:$0xff]  ;;  %v3553_v16 = vld [vmem:[%s6772_s10 + $0x1b8] sm:$0xff]  ;;  %v3550_v63 = vld [vmem:[%s6772_s10 + $0x1a0] sm:$0xff] }
 0x780   :  { %3289 = vmatpush2.msra.mxu0 %v3116_v7  ;;  %v3500_v56 = vld [vmem:[%s6772_s10 + $0x10] sm:$0xff]  ;;  %v3534_v7 = vld [vmem:[%s6772_s10 + $0x120] sm:$0xff] }
 0x781   :  { %3290 = vmatprep.subr.mxu0 %v3113_v0  ;;  %v3549_v0 = vld [vmem:[%s6772_s10 + $0x198] sm:$0xff] }
 0x782   :  { %v3101_v23 = vpop.permute.xlu1 %3100  ;;  %3291 = vmatpush2.msra.mxu0 %v3112_v42  ;;  %v3499_v42 = vld [vmem:[%s6772_s10 + $0x8] sm:$0xff] }
 0x783   :  { %3293 = vmatmul.mubr.f32.vlgmr.msra.gmra.mxu0 %v3136_v53  ;;  %v3115_v27 = vsel %vm2337_vm9, %v6341_v5, %v3101_v23  ;;  %3828 = vmatprep.subr.mxu0 %v3529_v6  ;;  %v3527_v5 = vld [vmem:[%s6772_s10 + $0xe8] sm:$0xff]  ;;  %v3533_v6 = vld [vmem:[%s6772_s10 + $0x118] sm:$0xff]  ;;  %v3514_v23 = vld [vmem:[%s6772_s10 + $0x80] sm:$0xff] }
 0x784   :  { %3379 = vmatprep.subr.mxu1 %v3115_v27  ;;  %3821 = vmatprep.mubr.msk.f32.mxu0 %vm6989_vm13, %v3139_v58  ;;  %v3498_v27 = vld [vmem:[%s6772_s10] sm:$0xff] }
 0x785   :  { %3380 = vmatpush2.msra.mxu1 %v3114_v50  ;;  %3829 = vmatpush3.msra.mxu0 %v3513_v25  ;;  %v3532_v25 = vld [vmem:[%s6772_s10 + $0x110] sm:$0xff]  ;;  %v3531_v50 = vld [vmem:[%s6772_s10 + $0x108] sm:$0xff] }
 0x786   :  { %3382 = vmatmul.mubr.f32.vlgmr.msra.gmra.mxu1 %v3136_v53  ;;  %3830 = vmatprep.subr.mxu0 %v3528_v32  ;;  %v3515_v53 = vld [vmem:[%s6772_s10 + $0x88] sm:$0xff] }
 0x787   :  { %3299 = vmatmul.mubr.f32.gmra.mxu0 %v3138_v55  ;;  %3825 = vmatprep.mubr.msk.f32.mxu1 %vm6990_vm8, %v3139_v58  ;;  %v3548_v58 = vld [vmem:[%s6772_s10 + $0x190] sm:$0xff]  ;;  %v3547_v32 = vld [vmem:[%s6772_s10 + $0x188] sm:$0xff] }
 0x788   :  { %3822 = vmatprep.mubr.msk.f32.mxu0 %vm6991_vm4, %v3141_v49  ;;  %3831 = vmatpush3.msra.mxu0 %v3512_v29 }
 0x789   :  { %3872 = vmatprep.subr.mxu1 %v3561_v11  ;;  %3832 = vmatprep.subr.mxu0 %v3527_v5 }
 0x78a   :  { %3388 = vmatmul.mubr.f32.gmra.mxu1 %v3138_v55  ;;  %3833 = vmatpush3.msra.mxu0 %v3511_v21  ;;  %v3546_v55 = vld [vmem:[%s6772_s10 + $0x180] sm:$0xff] }
 0x78b   :  { %3305 = vmatmul.mubr.f32.gmra.mxu0 %v3140_v54  ;;  %3826 = vmatprep.mubr.msk.f32.mxu1 %vm6992_vm14, %v3141_v49  ;;  %v3530_v49 = vld [vmem:[%s6772_s10 + $0x100] sm:$0xff] }
 0x78c   :  { %3823 = vmatprep.mubr.msk.f32.mxu0 %vm6993_vm7, %v3143_v18  ;;  %3873 = vmatpush3.msra.mxu1 %v3545_v57 }
 0x78d   :  { %3874 = vmatprep.subr.mxu1 %v3560_v15  ;;  %3834 = vmatprep.subr.mxu0 %v3526_v35 }
 0x78e   :  { %3394 = vmatmul.mubr.f32.gmra.mxu1 %v3140_v54  ;;  %3835 = vmatpush3.msra.mxu0 %v3510_v60 }
 0x78f   :  { %3311 = vmatmul.mubr.f32.gmra.mxu0 %v3142_v36  ;;  %3827 = vmatprep.mubr.msk.f32.mxu1 %vm6994_vm10, %v3143_v18 }
 0x790   :  { %3875 = vmatpush3.msra.mxu1 %v3544_v13  ;;  %3836 = vmatprep.subr.mxu0 %v3525_v52 }
 0x791   :  { %3876 = vmatprep.subr.mxu1 %v3559_v30  ;;  %3837 = vmatpush3.msra.mxu0 %v3509_v51 }
 0x792   :  { %3400 = vmatmul.mubr.f32.gmra.mxu1 %v3142_v36  ;;  %3838 = vmatprep.subr.mxu0 %v3524_v38 }
 0x793   :  { %3877 = vmatpush3.msra.mxu1 %v3543_v26  ;;  %3839 = vmatpush3.msra.mxu0 %v3508_v14 }
 0x794   :  { %3878 = vmatprep.subr.mxu1 %v3558_v19  ;;  %3840 = vmatprep.subr.mxu0 %v3523_v2 }
 0x795   :  { %3879 = vmatpush3.msra.mxu1 %v3542_v43  ;;  %3841 = vmatpush3.msra.mxu0 %v3507_v46 }
 0x796   :  { %3880 = vmatprep.subr.mxu1 %v3557_v48  ;;  %3842 = vmatprep.subr.mxu0 %v3522_v1 }
 0x797   :  { %3881 = vmatpush3.msra.mxu1 %v3541_v44  ;;  %3843 = vmatpush3.msra.mxu0 %v3506_v61 }
 0x798   :  { %3882 = vmatprep.subr.mxu1 %v3556_v41  ;;  %3844 = vmatprep.subr.mxu0 %v3521_v31 }
 0x799   :  { %3883 = vmatpush3.msra.mxu1 %v3540_v20  ;;  %3845 = vmatpush3.msra.mxu0 %v3505_v24 }
 0x79a   :  { %3884 = vmatprep.subr.mxu1 %v3555_v37  ;;  %3846 = vmatprep.subr.mxu0 %v3520_v45 }
 0x79b   :  { %3885 = vmatpush3.msra.mxu1 %v3539_v3  ;;  %3847 = vmatpush3.msra.mxu0 %v3504_v9 }
 0x79c   :  { %3886 = vmatprep.subr.mxu1 %v3554_v12  ;;  %3848 = vmatprep.subr.mxu0 %v3519_v8 }
 0x79d   :  { %3887 = vmatpush3.msra.mxu1 %v3538_v59  ;;  %3849 = vmatpush3.msra.mxu0 %v3503_v39 }
 0x79e   :  { %3888 = vmatprep.subr.mxu1 %v3553_v16  ;;  %3850 = vmatprep.subr.mxu0 %v3518_v4 }
 0x79f   :  { %3889 = vmatpush3.msra.mxu1 %v3537_v62  ;;  %3851 = vmatpush3.msra.mxu0 %v3502_v33 }
 0x7a0   :  { %3890 = vmatprep.subr.mxu1 %v3552_v22  ;;  %3852 = vmatprep.subr.mxu0 %v3517_v47 }
 0x7a1   :  { %3891 = vmatpush3.msra.mxu1 %v3536_v28  ;;  %3853 = vmatpush3.msra.mxu0 %v3501_v17 }
 0x7a2   :  { %3892 = vmatprep.subr.mxu1 %v3551_v40  ;;  %3854 = vmatprep.subr.mxu0 %v3516_v34 }
 0x7a3   :  { %3893 = vmatpush3.msra.mxu1 %v3535_v10  ;;  %3855 = vmatpush3.msra.mxu0 %v3500_v56 }
 0x7a4   :  { %3894 = vmatprep.subr.mxu1 %v3550_v63  ;;  %3856 = vmatprep.subr.mxu0 %v3515_v53 }
 0x7a5   :  { %3895 = vmatpush3.msra.mxu1 %v3534_v7  ;;  %3857 = vmatpush3.msra.mxu0 %v3499_v42 }
 0x7a6   :  { %3896 = vmatprep.subr.mxu1 %v3549_v0  ;;  %3858 = vmatprep.subr.mxu0 %v3514_v23  ;;  %v3495_v23 = vld [vmem:[%s6773_s9 + $0x8] sm:$0xff] }
 0x7a7   :  { %3897 = vmatpush3.msra.mxu1 %v3533_v6  ;;  %3859 = vmatpush3.msra.mxu0 %v3498_v27 }
 0x7a8   :  { %3898 = vmatprep.subr.mxu1 %v3548_v58  ;;  %v3494_v58 = vld [vmem:[%s6773_s9] sm:$0xff] }
 0x7a9   :  { %3899 = vmatpush3.msra.mxu1 %v3532_v25 }
 0x7aa   :  { %3900 = vmatprep.subr.mxu1 %v3547_v32 }
 0x7ab   :  { %3901 = vmatpush3.msra.mxu1 %v3531_v50 }
 0x7ac   :  { %3902 = vmatprep.subr.mxu1 %v3546_v55 }
 0x7ad   :  { %3903 = vmatpush3.msra.mxu1 %v3530_v49 }
 0x843   :  { %v3294_v29 = vpop.f32.mrf.mxu0 }
 0x844   :  { %v3430_v5 = vmul.f32 %v3294_v29, %v3294_v29 }
 0x845   :  { %v3296_v11 = vpop.f32.mrf.mxu0 }
 0x846   :  { %v3406_v21 = vadd.f32 %v3296_v11, %v3294_v29  ;;  %v3431_v54 = vmul.f32 %v3296_v11, %v3296_v11  ;;  %v3383_v18 = vpop.f32.mrf.mxu1  ;;  %3626 = vmatprep.mubr.f32.mxu0 %v3296_v11 }
 0x847   :  { %v3432_v57 = vmul.f32 %v3383_v18, %v3383_v18  ;;  %v3300_v15 = vpop.f32.mrf.mxu0  ;;  %3627 = vmatmul.mubr.f32.vlgmr.msra.gmra.mxu0 %v3294_v29 }
 0x848   :  { %v3446_v35 = vadd.f32 %v3431_v54, %v3430_v5  ;;  %v3407_v60 = vadd.f32 %v3406_v21, %v3383_v18  ;;  %v3385_v36 = vpop.f32.mrf.mxu1  ;;  %v3434_v13 = vmul.f32 %v3300_v15, %v3300_v15 }
 0x849   :  { %v3433_v52 = vmul.f32 %v3385_v36, %v3385_v36  ;;  %v3302_v30 = vpop.f32.mrf.mxu0  ;;  %3711 = vmatprep.mubr.f32.mxu1 %v3385_v36 }
 0x84a   :  { %v3447_v51 = vadd.f32 %v3446_v35, %v3432_v57  ;;  %v3408_v38 = vadd.f32 %v3407_v60, %v3385_v36  ;;  %v3411_v26 = vadd.f32 %v3302_v30, %v3300_v15  ;;  %v3435_v14 = vmul.f32 %v3302_v30, %v3302_v30  ;;  %v3389_v19 = vpop.f32.mrf.mxu1  ;;  %3631 = vmatprep.mubr.f32.mxu0 %v3302_v30 }
 0x84b   :  { %v3436_v2 = vmul.f32 %v3389_v19, %v3389_v19  ;;  %3712 = vmatmul.mubr.f32.vlgmr.msra.gmra.mxu1 %v3383_v18  ;;  %v3306_v43 = vpop.f32.mrf.mxu0  ;;  %3632 = vmatmul.mubr.f32.gmra.mxu0 %v3300_v15 }
 0x84c   :  { %v3451_v46 = vadd.f32 %v3435_v14, %v3434_v13  ;;  %v3391_v48 = vpop.f32.mrf.mxu1  ;;  %3409 = vadd.xlane.f32.xlu1 %v3408_v38  ;;  %v3448_v1 = vadd.f32 %v3447_v51, %v3433_v52  ;;  %v3412_v44 = vadd.f32 %v3411_v26, %v3389_v19  ;;  %v3438_v45 = vmul.f32 %v3306_v43, %v3306_v43 }
 0x84d   :  { %v3437_v61 = vmul.f32 %v3391_v48, %v3391_v48  ;;  %v3308_v41 = vpop.f32.mrf.mxu0  ;;  %3716 = vmatprep.mubr.f32.mxu1 %v3391_v48 }
 0x84e   :  { %v3452_v31 = vadd.f32 %v3451_v46, %v3436_v2  ;;  %v3416_v20 = vadd.f32 %v3308_v41, %v3306_v43  ;;  %v3439_v24 = vmul.f32 %v3308_v41, %v3308_v41  ;;  %v3395_v37 = vpop.f32.mrf.mxu1  ;;  %3449 = vadd.xlane.f32.xlu0 %v3448_v1  ;;  %3636 = vmatprep.mubr.f32.mxu0 %v3308_v41  ;;  %v3486_v46 = vld [vmem:[%s6774_s8] sm:$0xff] }
 0x84f   :  { %3717 = vmatmul.mubr.f32.gmra.mxu1 %v3389_v19  ;;  %v3312_v3 = vpop.f32.mrf.mxu0  ;;  %3637 = vmatmul.mubr.f32.gmra.mxu0 %v3306_v43  ;;  %v3413_v8 = vadd.f32 %v3412_v44, %v3391_v48  ;;  %v3440_v16 = vmul.f32 %v3395_v37, %v3395_v37 }
 0x850   :  { %v3397_v9 = vpop.f32.mrf.mxu1  ;;  %v3453_v12 = vadd.f32 %v3452_v31, %v3437_v61  ;;  %v3456_v59 = vadd.f32 %v3439_v24, %v3438_v45  ;;  %v3417_v39 = vadd.f32 %v3416_v20, %v3395_v37  ;;  %v3442_v62 = vmul.f32 %v3312_v3, %v3312_v3  ;;  %v3487_v61 = vld [vmem:[%s6774_s8 + $0x8] sm:$0xff]  ;;  %v3488_v20 = vld [vmem:[%s6774_s8 + $0x10] sm:$0xff]  ;;  %v3489_v24 = vld [vmem:[%s6774_s8 + $0x18] sm:$0xff] }
 0x851   :  { %v3314_v4 = vpop.f32.mrf.mxu0  ;;  %3721 = vmatprep.mubr.f32.mxu1 %v3397_v9  ;;  %v3441_v63 = vmul.f32 %v3397_v9, %v3397_v9 }
 0x852   :  { %v3421_v33 = vadd.f32 %v3314_v4, %v3312_v3  ;;  %v3443_v22 = vmul.f32 %v3314_v4, %v3314_v4  ;;  %v3401_v47 = vpop.f32.mrf.mxu1  ;;  %3454 = vadd.xlane.f32.xlu1 %v3453_v12  ;;  %3414 = vadd.xlane.f32.xlu0 %v3413_v8  ;;  %v3457_v10 = vadd.f32 %v3456_v59, %v3440_v16  ;;  %v3496_v12 = vld [vmem:[%s6773_s9 + $0x10] sm:$0xff]  ;;  %v3497_v8 = vld [vmem:[%s6773_s9 + $0x18] sm:$0xff] }
 0x853   :  { %v3444_v28 = vmul.f32 %v3401_v47, %v3401_v47  ;;  %3722 = vmatmul.mubr.f32.gmra.mxu1 %v3395_v37  ;;  %3641 = vmatprep.mubr.f32.mxu0 %v3314_v4  ;;  %v3418_v56 = vadd.f32 %v3417_v39, %v3397_v9 }
 0x854   :  { %v3461_v17 = vadd.f32 %v3443_v22, %v3442_v62  ;;  %v3422_v40 = vadd.f32 %v3421_v33, %v3401_v47  ;;  %v3403_v34 = vpop.f32.mrf.mxu1  ;;  %3642 = vmatmul.mubr.f32.gmra.mxu0 %v3312_v3  ;;  %v3458_v6 = vadd.f32 %v3457_v10, %v3441_v63 }
 0x855   :  { %3726 = vmatprep.mubr.f32.mxu1 %v3403_v34  ;;  %v3445_v53 = vmul.f32 %v3403_v34, %v3403_v34 }
 0x856   :  { %v3462_v7 = vadd.f32 %v3461_v17, %v3444_v28  ;;  %v3423_v0 = vadd.f32 %v3422_v40, %v3403_v34  ;;  %3419 = vadd.xlane.f32.xlu0 %v3418_v56 }
 0x857   :  { %3727 = vmatmul.mubr.f32.gmra.mxu1 %v3401_v47 }
 0x858   :  { %3424 = vadd.xlane.f32.xlu1 %v3423_v0  ;;  %v3463_v42 = vadd.f32 %v3462_v7, %v3445_v53 }
 0x85a   :  { %3459 = vadd.xlane.f32.xlu0 %v3458_v6 }
 0x85c   :  { %3464 = vadd.xlane.f32.xlu1 %v3463_v42 }
 0x86d   :  { %3762 = vperm.xlu1 %3958, %v3494_v58  }
 0x870   :  { %3767 = vperm.xlu0 %4064, %v3495_v23  }
 0x8d5   :  { %v3410_v25 = vpop.xlane.xlu1 %3409 }
 0x8d6   :  { %v6690_v27 = vmul.f32 0.03125, %v3410_v25 }
 0x8d7   :  { %v3450_v32 = vpop.xlane.xlu0 %3449 }
 0x8d8   :  { %v3470_v50 = vmul.f32 %v6690_v27, %v6690_v27  ;;  %v3466_v55 = vmul.f32 0.03125, %v3450_v32 }
 0x8da   :  { %v3474_v49 = vsub.f32 %v3466_v55, %v3470_v50 }
 0x8db   :  { %v3455_v11 = vpop.xlane.xlu1 %3454  ;;  %v3415_v5 = vpop.xlane.xlu0 %3414 }
 0x8dc   :  { %v3478_v29 = vadd.f32 1e-05, %v3474_v49  ;;  %v6694_v21 = vmul.f32 0.03125, %v3415_v5  ;;  %v3467_v54 = vmul.f32 0.03125, %v3455_v11 }
 0x8de   :  { %4151 = vrsqrt.f32 %v3478_v29  ;;  %v3471_v18 = vmul.f32 %v6694_v21, %v6694_v21 }
 0x8df   :  { %v3420_v57 = vpop.xlane.xlu0 %3419 }
 0x8e0   :  { %v3475_v15 = vsub.f32 %v3467_v54, %v3471_v18  ;;  %v6698_v35 = vmul.f32 0.03125, %v3420_v57 }
 0x8e1   :  { %v3425_v60 = vpop.xlane.xlu1 %3424 }
 0x8e2   :  { %v6700_v36 = vmul.f32 0.03125, %v3425_v60  ;;  %v3479_v13 = vadd.f32 1e-05, %v3475_v15  ;;  %v3472_v30 = vmul.f32 %v6698_v35, %v6698_v35 }
 0x8e3   :  { %v3460_v52 = vpop.xlane.xlu0 %3459 }
 0x8e4   :  { %4153 = vrsqrt.f32 %v3479_v13  ;;  %v3468_v51 = vmul.f32 0.03125, %v3460_v52  ;;  %v3473_v26 = vmul.f32 %v6700_v36, %v6700_v36 }
 0x8e5   :  { %v3465_v38 = vpop.xlane.xlu1 %3464 }
 0x8e6   :  { %v3469_v14 = vmul.f32 0.03125, %v3465_v38  ;;  %v3476_v19 = vsub.f32 %v3468_v51, %v3472_v30 }
 0x8e8   :  { %v3477_v2 = vsub.f32 %v3469_v14, %v3473_v26  ;;  %v3480_v43 = vadd.f32 1e-05, %v3476_v19 }
 0x8e9   :  { %v3763_v25 = vpop.permute.xlu1 %3762 }
 0x8ea   :  { %v3481_v48 = vadd.f32 1e-05, %v3477_v2  ;;  %4155 = vrsqrt.f32 %v3480_v43 }
 0x8eb   :  { %v4152_v1 = vpop.eup %4151  ;;  %v3768_v56 = vpop.permute.xlu0 %3767 }
 0x8ec   :  { %4157 = vrsqrt.f32 %v3481_v48  ;;  %v3490_v44 = vmul.f32 %v4152_v1, %v3486_v46 }
 0x8ee   :  { %3738 = vperm.xlu0 %4064, %v3490_v44  }
 0x8f1   :  { %v4154_v41 = vpop.eup %4153 }
 0x8f2   :  { %v3491_v31 = vmul.f32 %v4154_v41, %v3487_v61 }
 0x8f4   :  { %3743 = vperm.xlu1 %3958, %v3491_v31  }
 0x8f7   :  { %v4156_v37 = vpop.eup %4155 }
 0x8f8   :  { %v3492_v3 = vmul.f32 %v4156_v37, %v3488_v20 }
 0x8f9   :  { %v4158_v45 = vpop.eup %4157 }
 0x8fa   :  { %v3493_v9 = vmul.f32 %v4158_v45, %v3489_v24  ;;  %3748 = vperm.xlu1 %3958, %v3492_v3  }
 0x8fc   :  { %3753 = vperm.xlu0 %4064, %v3493_v9  }
 0x8fe   :  { %3772 = vperm.xlu1 %3958, %v3496_v12  }
 0x900   :  { %3777 = vperm.xlu0 %4064, %v3497_v8  }
 0x907   :  { %v3860_v39 = vpop.f32.mrf.mxu0 }
 0x909   :  { %v3861_v4 = vpop.f32.mrf.mxu0 }
 0x90a   :  { %v3862_v40 = vadd.f32 %v3861_v4, %v3860_v39 }
 0x90b   :  { %v3904_v59 = vpop.f32.mrf.mxu1  ;;  %v3863_v33 = vpop.f32.mrf.mxu0 }
 0x90d   :  { %v3905_v16 = vpop.f32.mrf.mxu1  ;;  %v3864_v47 = vpop.f32.mrf.mxu0 }
 0x90e   :  { %v3906_v28 = vadd.f32 %v3905_v16, %v3904_v59  ;;  %v3865_v6 = vadd.f32 %v3864_v47, %v3863_v33 }
 0x90f   :  { %v3907_v62 = vpop.f32.mrf.mxu1  ;;  %v3866_v34 = vpop.f32.mrf.mxu0 }
 0x910   :  { %v3714_v10 = vadd.f32 %v3906_v28, %v3862_v40 }
 0x911   :  { %v3908_v22 = vpop.f32.mrf.mxu1  ;;  %v3867_v0 = vpop.f32.mrf.mxu0 }
 0x912   :  { %v3909_v7 = vadd.f32 %v3908_v22, %v3907_v62  ;;  %v3732_v53 = vsub.f32 %v3714_v10, %v6690_v27  ;;  %v3868_v57 = vadd.f32 %v3867_v0, %v3866_v34 }
 0x913   :  { %v3910_v17 = vpop.f32.mrf.mxu1 }
 0x914   :  { %v3719_v32 = vadd.f32 %v3909_v7, %v3865_v6  ;;  %v3869_v50 = vpop.f32.mrf.mxu0 }
 0x915   :  { %v3911_v63 = vpop.f32.mrf.mxu1 }
 0x916   :  { %v3912_v11 = vadd.f32 %v3911_v63, %v3910_v17  ;;  %v3870_v5 = vpop.f32.mrf.mxu0  ;;  %v3733_v54 = vsub.f32 %v3719_v32, %v6694_v21 }
 0x917   :  { %v3913_v42 = vpop.f32.mrf.mxu1  ;;  %v3871_v60 = vadd.f32 %v3870_v5, %v3869_v50 }
 0x918   :  { %v3724_v13 = vadd.f32 %v3912_v11, %v3868_v57 }
 0x919   :  { %v3914_v49 = vpop.f32.mrf.mxu1 }
 0x91a   :  { %v3915_v18 = vadd.f32 %v3914_v49, %v3913_v42  ;;  %v3734_v21 = vsub.f32 %v3724_v13, %v6698_v35 }
 0x91c   :  { %v3729_v30 = vadd.f32 %v3915_v18, %v3871_v60 }
 0x91e   :  { %v3735_v14 = vsub.f32 %v3729_v30, %v6700_v36 }
 0x969   :  { %v3739_v58 = vpop.permute.xlu0 %3738 }
 0x96a   :  { %v3756_v23 = vmul.f32 %v3739_v58, %v3732_v53 }
 0x96c   :  { %v3780_v55 = vadd.f32 %v3763_v25, %v3756_v23 }
 0x96e   :  { %v3784_v29 = vmax.f32 %v3780_v55, 0.0 }
 0x96f   :  { %v3744_v27 = vpop.permute.xlu1 %3743 }
 0x970   :  { %3788 = vst.msk [vmem:[%s6775_s11] sm:$0xff] %vm2691_vm1, %v3784_v29  ;;  %3796 = vrot.lane.b32.xlu1 %v3784_v29, %s4193_s24  ;;  %v3757_v15 = vmul.f32 %v3744_v27, %v3733_v54 }
 0x972   :  { %v3781_v52 = vadd.f32 %v3768_v56, %v3757_v15 }
 0x974   :  { %v3785_v51 = vmax.f32 %v3781_v52, 0.0 }
 0x975   :  { %v3749_v38 = vpop.permute.xlu1 %3748 }
 0x976   :  { %3789 = vst.msk [vmem:[%s6775_s11 + $0x8] sm:$0xff] %vm2691_vm1, %v3785_v51  ;;  %3798 = vrot.lane.b32.xlu0 %v3785_v51, %s4193_s24  ;;  %v3758_v19 = vmul.f32 %v3749_v38, %v3734_v21 }
 0x977   :  { %v3754_v26 = vpop.permute.xlu0 %3753 }
 0x978   :  { %v3759_v2 = vmul.f32 %v3754_v26, %v3735_v14 }
 0x979   :  { %v3773_v43 = vpop.permute.xlu1 %3772 }
 0x97a   :  { %v3782_v46 = vadd.f32 %v3773_v43, %v3758_v19 }
 0x97b   :  { %v3778_v48 = vpop.permute.xlu0 %3777 }
 0x97c   :  { %v3783_v1 = vadd.f32 %v3778_v48, %v3759_v2  ;;  %v3786_v44 = vmax.f32 %v3782_v46, 0.0 }
 0x97e   :  { %v3787_v61 = vmax.f32 %v3783_v1, 0.0  ;;  %3790 = vst.msk [vmem:[%s6775_s11 + $0x10] sm:$0xff] %vm2691_vm1, %v3786_v44  ;;  %3800 = vrot.lane.b32.xlu1 %v3786_v44, %s4193_s24 }
 0x980   :  { %3791 = vst.msk [vmem:[%s6775_s11 + $0x18] sm:$0xff] %vm2691_vm1, %v3787_v61  ;;  %3802 = vrot.lane.b32.xlu0 %v3787_v61, %s4193_s24 }
 0x9e2   :  { %v3797_v35 = vpop.permute.xlu1 %3796 }
 0x9e3   :  { %3808 = vst.msk [vmem:[%s6775_s11 + $0x20] sm:$0xff] %vm2691_vm1, %v3797_v35 }
 0x9e8   :  { %v3799_v36 = vpop.permute.xlu0 %3798 }
 0x9e9   :  { %3809 = vst.msk [vmem:[%s6775_s11 + $0x28] sm:$0xff] %vm2691_vm1, %v3799_v36 }
 0x9f0   :  { %v3801_v41 = vpop.permute.xlu1 %3800 }
 0x9f1   :  { %3810 = vst.msk [vmem:[%s6775_s11 + $0x30] sm:$0xff] %vm2691_vm1, %v3801_v41 }
 0x9f2   :  { %v3803_v31 = vpop.permute.xlu0 %3802 }
 0x9f3   :  { %3811 = vst.msk [vmem:[%s6775_s11 + $0x38] sm:$0xff] %vm2691_vm1, %v3803_v31 }

</bundles_post_ra>
